<compile_context>
chip_gen: v6e
topology: v6e:2x2x1
jax: 0.10.0
libtpu: 0.0.40
codegen_flags: <defaults>
</compile_context>

<pallas_src>
import jax
import jax.numpy as jnp
from jax.experimental import pallas as pl
from jax.experimental.pallas import tpu as pltpu

VMEM = pl.BlockSpec(memory_space=pltpu.MemorySpace.VMEM)

N_CONV = 3   # conv1 / conv2 / conv3
N_LSTM = 9   # 3 stacked nn.LSTM modules x 3 layers each


# ------------------------------ fused kernel ---------------------------------
def _fused_forward_kernel(*refs):
    # ---- unpack: inputs, output, scratch ------------------------------------
    pos = 0
    x_ref = refs[pos]; pos += 1
    conv_params = [(refs[pos + 2 * i], refs[pos + 2 * i + 1]) for i in range(N_CONV)]
    pos += 2 * N_CONV
    lstm_params = [(refs[pos + 3 * i], refs[pos + 3 * i + 1], refs[pos + 3 * i + 2])
                   for i in range(N_LSTM)]
    pos += 3 * N_LSTM
    w1_ref, b1_ref, w2_ref, b2_ref = refs[pos:pos + 4]; pos += 4
    o_ref = refs[pos]; pos += 1
    conv_pads = refs[pos:pos + N_CONV]; pos += N_CONV   # time-padded conv input buffers
    seq_bufs = refs[pos:pos + N_LSTM]                   # input sequence of each LSTM layer

    B, L, _ = x_ref.shape

    # ---- stage (B, T, Cin) input into the time-major, time-padded scratch ----
    pad0 = conv_pads[0]
    cin0 = pad0.shape[2]
    zrow = jnp.zeros((B, cin0), jnp.float32)
    pad0[0, :, :] = zrow
    pad0[L + 1, :, :] = zrow
    for t in range(L):                    # tiny static copy loop (layout only)
        pad0[1 + t, :, :] = x_ref[:, t, :]

    # ---- Conv1d(k=3, pad=1) + ReLU + MaxPool1d(2), x3 -------------------------
    # NOTE: 3 tap-matmuls per layer over ALL positions (instead of 6 parity ones);
    # the full K-merge into one matmul is skipped to avoid unaligned lane concat.
    T = L
    for ci, (w_ref, b_ref) in enumerate(conv_params):
        Cin = w_ref.shape[1]
        Cout = w_ref.shape[2]
        src = conv_pads[ci]
        acc = None
        for k in range(3):                              # conv taps
            tap = src[pl.ds(k, T), :, :]                # (T, B, Cin), shifted window
            part = jnp.dot(tap.reshape(T * B, Cin), w_ref[k],
                           preferred_element_type=jnp.float32)
            acc = part if acc is None else acc + part
        z = jnp.maximum(acc + b_ref[...], 0.0)          # (T*B, Cout), rows t*B+b
        Th = T // 2
        last_conv = (ci + 1 == N_CONV)
        if last_conv:
            dst, off = seq_bufs[0], 0
        else:
            dst, off = conv_pads[ci + 1], 1
            zc = jnp.zeros((B, Cout), jnp.float32)
            dst[0, :, :] = zc                           # zero next layer's halo rows
            dst[Th + 1, :, :] = zc
        for p in range(Th):                             # MaxPool1d(2) over time
            even = z[(2 * p) * B:(2 * p + 1) * B, :]
            odd = z[(2 * p + 1) * B:(2 * p + 2) * B, :]
            dst[off + p, :, :] = jnp.maximum(even, odd)
        T = Th
    # nn.Dropout(p=0.5): identity at inference.

    # ---- 9 LSTM layers --------------------------------------------------------
    Tl = T                                              # = L // 8
    h_last = None
    for li, (wih_ref, whh_ref, b_ref) in enumerate(lstm_params):
        xin = seq_bufs[li][...]                         # (Tl, B, D) input sequence
        D = xin.shape[2]
        H = whh_ref.shape[0]
        # hoisted input projection + pre-folded bias: one matmul for all timesteps
        gates_in = jnp.dot(xin.reshape(Tl * B, D), wih_ref[...],
                           preferred_element_type=jnp.float32) + b_ref[...]  # (Tl*B, 4H)
        whh = whh_ref[...]
        h = jnp.zeros((B, H), jnp.float32)
        c = jnp.zeros((B, H), jnp.float32)
        write_seq = (li + 1 < N_LSTM)
        for t in range(Tl):                             # serial recurrence, Tl tiny & static
            g = gates_in[t * B:(t + 1) * B, :] + jnp.dot(
                h, whh, preferred_element_type=jnp.float32)
            i_g = jax.nn.sigmoid(g[:, 0 * H:1 * H])
            f_g = jax.nn.sigmoid(g[:, 1 * H:2 * H])
            g_g = jnp.tanh(g[:, 2 * H:3 * H])
            o_g = jax.nn.sigmoid(g[:, 3 * H:4 * H])
            c = f_g * c + i_g * g_g
            h = o_g * jnp.tanh(c)
            if write_seq:
                seq_bufs[li + 1][t, :, :] = h           # stays in VMEM scratch
        h_last = h
        # inter-layer LSTM dropout(0.2) is train-only -> identity.

    # ---- head: fc1 -> ReLU -> fc2 (feats = last-timestep hidden state) --------
    hid = jnp.maximum(
        jnp.dot(h_last, w1_ref[...], preferred_element_type=jnp.float32) + b1_ref[...],
        0.0)
    o_ref[...] = (jnp.dot(hid, w2_ref[...], preferred_element_type=jnp.float32)
                  + b2_ref[...])


# --------------------------------- wrapper -----------------------------------
def hybrid_forward(params, x):
    x = x.astype(jnp.float32)
    B, L, _ = x.shape
    assert L % 8 == 0, "seq_len must be divisible by 8 (3x MaxPool1d(2))"
    lstm_all = [layer for stack in ('lstm1', 'lstm2', 'lstm3') for layer in params[stack]]
    num_classes = params['fc2'][0].shape[1]

    inputs = [x]
    for w, b in params['convs']:
        inputs += [w, b]
    for wih, whh, b in lstm_all:
        inputs += [wih, whh, b]
    inputs += [params['fc1'][0], params['fc1'][1], params['fc2'][0], params['fc2'][1]]

    # VMEM scratch: time-padded conv input buffers + per-LSTM-layer input sequences.
    scratch = []
    T = L
    cin = x.shape[2]
    for w, _ in params['convs']:
        scratch.append(pltpu.VMEM((T + 2, B, cin), jnp.float32))
        cin = w.shape[2]
        T //= 2
    Tl = T
    for wih, _, _ in lstm_all:
        scratch.append(pltpu.VMEM((Tl, B, wih.shape[0]), jnp.float32))

    return pl.pallas_call(
        _fused_forward_kernel,
        out_shape=jax.ShapeDtypeStruct((B, num_classes), jnp.float32),
        in_specs=[VMEM] * len(inputs),
        out_specs=VMEM,
        scratch_shapes=scratch,
    )(*inputs)


# ------------------------------- parameters ----------------------------------
def init_params(key, n_features, lstm_hidden, num_classes):
    Hh = lstm_hidden // 2
    keys = iter(jax.random.split(key, 128))

    def uni(shape, bound):
        return jax.random.uniform(next(keys), shape, jnp.float32, -bound, bound)

    params = {}
    # conv weights stored pre-transposed: (k, Cin, Cout)
    params['convs'] = []
    for cin, cout in [(n_features, 32), (32, 64), (64, 128)]:
        bound = 1.0 / (cin * 3) ** 0.5
        params['convs'].append((uni((3, cin, cout), bound), uni((1, cout), bound)))

    def lstm_stack(dims):
        layers = []
        for d_in, h in dims:
            bound = 1.0 / h ** 0.5
            wih = uni((d_in, 4 * h), bound)                       # torch weight_ih.T
            whh = uni((h, 4 * h), bound)                          # torch weight_hh.T
            b = uni((1, 4 * h), bound) + uni((1, 4 * h), bound)   # b_ih + b_hh
            layers.append((wih, whh, b))
        return layers

    params['lstm1'] = lstm_stack([(128, Hh), (Hh, Hh), (Hh, Hh)])
    params['lstm2'] = lstm_stack([(Hh, lstm_hidden), (lstm_hidden, lstm_hidden),
                                  (lstm_hidden, lstm_hidden)])
    params['lstm3'] = lstm_stack([(lstm_hidden, Hh), (Hh, Hh), (Hh, Hh)])

    b1 = 1.0 / Hh ** 0.5
    params['fc1'] = (uni((Hh, 128), b1), uni((1, 128), b1))
    b2 = 1.0 / 128 ** 0.5
    params['fc2'] = (uni((128, num_classes), b2), uni((1, num_classes), b2))
    return params


# --------------------------- pure-JAX reference -------------------------------
def _reference_forward(params, x):
    y = x.astype(jnp.float32)
    for w, b in params['convs']:                      # w: (3, Cin, Cout)
        _, T, _ = y.shape
        ypad = jnp.pad(y, ((0, 0), (1, 1), (0, 0)))
        z = b[0] + sum(jnp.einsum('btc,cd->btd', ypad[:, k:k + T, :], w[k])
                       for k in range(3))
        z = jnp.maximum(z, 0.0)
        y = jnp.maximum(z[:, 0::2, :], z[:, 1::2, :])
    for stack in ('lstm1', 'lstm2', 'lstm3'):
        for wih, whh, b in params[stack]:
            Bb, T, _ = y.shape
            H = whh.shape[0]
            h = jnp.zeros((Bb, H), jnp.float32)
            c = jnp.zeros((Bb, H), jnp.float32)
            outs = []
            for t in range(T):
                g = y[:, t, :] @ wih + h @ whh + b
                i = jax.nn.sigmoid(g[:, 0 * H:1 * H])
                f = jax.nn.sigmoid(g[:, 1 * H:2 * H])
                gg = jnp.tanh(g[:, 2 * H:3 * H])
                o = jax.nn.sigmoid(g[:, 3 * H:4 * H])
                c = f * c + i * gg
                h = o * jnp.tanh(c)
                outs.append(h)
            y = jnp.stack(outs, axis=1)
    feats = y[:, -1, :]
    w1, b1 = params['fc1']
    w2, b2 = params['fc2']
    return jnp.maximum(feats @ w1 + b1, 0.0) @ w2 + b2


if __name__ == "__main__":
    # Small shapes consistent with the module: seq_len must survive 3x MaxPool(2).
    B, seq_len, n_features = 2, 16, 4
    lstm_hidden, num_classes = 32, 3

    key = jax.random.PRNGKey(0)
    k_param, k_x = jax.random.split(key)
    params = init_params(k_param, n_features, lstm_hidden, num_classes)
    x = jax.random.normal(k_x, (B, seq_len, n_features), jnp.float32)

    fwd = jax.jit(hybrid_forward)
    logits = jax.block_until_ready(fwd(params, x))
    assert logits.shape == (B, num_classes), logits.shape
    assert bool(jnp.all(jnp.isfinite(logits)))

    ref = _reference_forward(params, x)
    err = float(jnp.max(jnp.abs(logits - ref)))
    assert err < 2e-2, f"mismatch vs pure-JAX reference: max abs err = {err}"
    print("KERNEL_OK")
</pallas_src>

<mosaic_0001>
module attributes {stable_mosaic.version = 11 : i64} {
  func.func @_fused_forward_kernel(%arg0: memref<2x16x4xf32, #tpu.memory_space<vmem>>, %arg1: memref<3x4x32xf32, #tpu.memory_space<vmem>>, %arg2: memref<1x32xf32, #tpu.memory_space<vmem>>, %arg3: memref<3x32x64xf32, #tpu.memory_space<vmem>>, %arg4: memref<1x64xf32, #tpu.memory_space<vmem>>, %arg5: memref<3x64x128xf32, #tpu.memory_space<vmem>>, %arg6: memref<1x128xf32, #tpu.memory_space<vmem>>, %arg7: memref<128x64xf32, #tpu.memory_space<vmem>>, %arg8: memref<16x64xf32, #tpu.memory_space<vmem>>, %arg9: memref<1x64xf32, #tpu.memory_space<vmem>>, %arg10: memref<16x64xf32, #tpu.memory_space<vmem>>, %arg11: memref<16x64xf32, #tpu.memory_space<vmem>>, %arg12: memref<1x64xf32, #tpu.memory_space<vmem>>, %arg13: memref<16x64xf32, #tpu.memory_space<vmem>>, %arg14: memref<16x64xf32, #tpu.memory_space<vmem>>, %arg15: memref<1x64xf32, #tpu.memory_space<vmem>>, %arg16: memref<16x128xf32, #tpu.memory_space<vmem>>, %arg17: memref<32x128xf32, #tpu.memory_space<vmem>>, %arg18: memref<1x128xf32, #tpu.memory_space<vmem>>, %arg19: memref<32x128xf32, #tpu.memory_space<vmem>>, %arg20: memref<32x128xf32, #tpu.memory_space<vmem>>, %arg21: memref<1x128xf32, #tpu.memory_space<vmem>>, %arg22: memref<32x128xf32, #tpu.memory_space<vmem>>, %arg23: memref<32x128xf32, #tpu.memory_space<vmem>>, %arg24: memref<1x128xf32, #tpu.memory_space<vmem>>, %arg25: memref<32x64xf32, #tpu.memory_space<vmem>>, %arg26: memref<16x64xf32, #tpu.memory_space<vmem>>, %arg27: memref<1x64xf32, #tpu.memory_space<vmem>>, %arg28: memref<16x64xf32, #tpu.memory_space<vmem>>, %arg29: memref<16x64xf32, #tpu.memory_space<vmem>>, %arg30: memref<1x64xf32, #tpu.memory_space<vmem>>, %arg31: memref<16x64xf32, #tpu.memory_space<vmem>>, %arg32: memref<16x64xf32, #tpu.memory_space<vmem>>, %arg33: memref<1x64xf32, #tpu.memory_space<vmem>>, %arg34: memref<16x128xf32, #tpu.memory_space<vmem>>, %arg35: memref<1x128xf32, #tpu.memory_space<vmem>>, %arg36: memref<128x3xf32, #tpu.memory_space<vmem>>, %arg37: memref<1x3xf32, #tpu.memory_space<vmem>>, %arg38: memref<2x3xf32, #tpu.memory_space<vmem>>, %arg39: memref<18x2x4xf32, #tpu.memory_space<vmem>>, %arg40: memref<10x2x32xf32, #tpu.memory_space<vmem>>, %arg41: memref<6x2x64xf32, #tpu.memory_space<vmem>>, %arg42: memref<2x2x128xf32, #tpu.memory_space<vmem>>, %arg43: memref<2x2x16xf32, #tpu.memory_space<vmem>>, %arg44: memref<2x2x16xf32, #tpu.memory_space<vmem>>, %arg45: memref<2x2x16xf32, #tpu.memory_space<vmem>>, %arg46: memref<2x2x32xf32, #tpu.memory_space<vmem>>, %arg47: memref<2x2x32xf32, #tpu.memory_space<vmem>>, %arg48: memref<2x2x32xf32, #tpu.memory_space<vmem>>, %arg49: memref<2x2x16xf32, #tpu.memory_space<vmem>>, %arg50: memref<2x2x16xf32, #tpu.memory_space<vmem>>) attributes {dimension_semantics = [], scalar_prefetch = 0 : i64, scratch_operands = 12 : i64, tpu.core_type = #tpu.core_type<tc>} {
    %cst = arith.constant 0.000000e+00 : f32
    %0 = vector.broadcast %cst : f32 to vector<2x4xf32>
    %c0 = arith.constant 0 : index
    %c0_0 = arith.constant 0 : index
    %c0_1 = arith.constant 0 : index
    %1 = vector.load %arg39[%c0, %c0_0, %c0_1] : memref<18x2x4xf32, #tpu.memory_space<vmem>>, vector<1x2x4xf32>
    %2 = vector.shape_cast %1 : vector<1x2x4xf32> to vector<2x4xf32>
    %3 = vector.shape_cast %0 : vector<2x4xf32> to vector<1x2x4xf32>
    tpu.vector_store %arg39[%c0, %c0_0, %c0_1], %3 {strides = array<i32>} : memref<18x2x4xf32, #tpu.memory_space<vmem>>, vector<1x2x4xf32>,
    %c17 = arith.constant 17 : index
    %c0_2 = arith.constant 0 : index
    %c0_3 = arith.constant 0 : index
    %4 = vector.load %arg39[%c17, %c0_2, %c0_3] : memref<18x2x4xf32, #tpu.memory_space<vmem>>, vector<1x2x4xf32>
    %5 = vector.shape_cast %4 : vector<1x2x4xf32> to vector<2x4xf32>
    %6 = vector.shape_cast %0 : vector<2x4xf32> to vector<1x2x4xf32>
    tpu.vector_store %arg39[%c17, %c0_2, %c0_3], %6 {strides = array<i32>} : memref<18x2x4xf32, #tpu.memory_space<vmem>>, vector<1x2x4xf32>,
    %c0_4 = arith.constant 0 : index
    %c0_5 = arith.constant 0 : index
    %c0_6 = arith.constant 0 : index
    %7 = vector.load %arg0[%c0_4, %c0_5, %c0_6] : memref<2x16x4xf32, #tpu.memory_space<vmem>>, vector<2x1x4xf32>
    %8 = vector.shape_cast %7 : vector<2x1x4xf32> to vector<2x4xf32>
    %c1 = arith.constant 1 : index
    %c0_7 = arith.constant 0 : index
    %c0_8 = arith.constant 0 : index
    %9 = vector.load %arg39[%c1, %c0_7, %c0_8] : memref<18x2x4xf32, #tpu.memory_space<vmem>>, vector<1x2x4xf32>
    %10 = vector.shape_cast %9 : vector<1x2x4xf32> to vector<2x4xf32>
    %11 = vector.shape_cast %8 : vector<2x4xf32> to vector<1x2x4xf32>
    tpu.vector_store %arg39[%c1, %c0_7, %c0_8], %11 {strides = array<i32>} : memref<18x2x4xf32, #tpu.memory_space<vmem>>, vector<1x2x4xf32>,
    %c0_9 = arith.constant 0 : index
    %c1_10 = arith.constant 1 : index
    %c0_11 = arith.constant 0 : index
    %12 = vector.load %arg0[%c0_9, %c1_10, %c0_11] : memref<2x16x4xf32, #tpu.memory_space<vmem>>, vector<2x1x4xf32>
    %13 = vector.shape_cast %12 : vector<2x1x4xf32> to vector<2x4xf32>
    %c2 = arith.constant 2 : index
    %c0_12 = arith.constant 0 : index
    %c0_13 = arith.constant 0 : index
    %14 = vector.load %arg39[%c2, %c0_12, %c0_13] : memref<18x2x4xf32, #tpu.memory_space<vmem>>, vector<1x2x4xf32>
    %15 = vector.shape_cast %14 : vector<1x2x4xf32> to vector<2x4xf32>
    %16 = vector.shape_cast %13 : vector<2x4xf32> to vector<1x2x4xf32>
    tpu.vector_store %arg39[%c2, %c0_12, %c0_13], %16 {strides = array<i32>} : memref<18x2x4xf32, #tpu.memory_space<vmem>>, vector<1x2x4xf32>,
    %c0_14 = arith.constant 0 : index
    %c2_15 = arith.constant 2 : index
    %c0_16 = arith.constant 0 : index
    %17 = vector.load %arg0[%c0_14, %c2_15, %c0_16] : memref<2x16x4xf32, #tpu.memory_space<vmem>>, vector<2x1x4xf32>
    %18 = vector.shape_cast %17 : vector<2x1x4xf32> to vector<2x4xf32>
    %c3 = arith.constant 3 : index
    %c0_17 = arith.constant 0 : index
    %c0_18 = arith.constant 0 : index
    %19 = vector.load %arg39[%c3, %c0_17, %c0_18] : memref<18x2x4xf32, #tpu.memory_space<vmem>>, vector<1x2x4xf32>
    %20 = vector.shape_cast %19 : vector<1x2x4xf32> to vector<2x4xf32>
    %21 = vector.shape_cast %18 : vector<2x4xf32> to vector<1x2x4xf32>
    tpu.vector_store %arg39[%c3, %c0_17, %c0_18], %21 {strides = array<i32>} : memref<18x2x4xf32, #tpu.memory_space<vmem>>, vector<1x2x4xf32>,
    %c0_19 = arith.constant 0 : index
    %c3_20 = arith.constant 3 : index
    %c0_21 = arith.constant 0 : index
    %22 = vector.load %arg0[%c0_19, %c3_20, %c0_21] : memref<2x16x4xf32, #tpu.memory_space<vmem>>, vector<2x1x4xf32>
    %23 = vector.shape_cast %22 : vector<2x1x4xf32> to vector<2x4xf32>
    %c4 = arith.constant 4 : index
    %c0_22 = arith.constant 0 : index
    %c0_23 = arith.constant 0 : index
    %24 = vector.load %arg39[%c4, %c0_22, %c0_23] : memref<18x2x4xf32, #tpu.memory_space<vmem>>, vector<1x2x4xf32>
    %25 = vector.shape_cast %24 : vector<1x2x4xf32> to vector<2x4xf32>
    %26 = vector.shape_cast %23 : vector<2x4xf32> to vector<1x2x4xf32>
    tpu.vector_store %arg39[%c4, %c0_22, %c0_23], %26 {strides = array<i32>} : memref<18x2x4xf32, #tpu.memory_space<vmem>>, vector<1x2x4xf32>,
    %c0_24 = arith.constant 0 : index
    %c4_25 = arith.constant 4 : index
    %c0_26 = arith.constant 0 : index
    %27 = vector.load %arg0[%c0_24, %c4_25, %c0_26] : memref<2x16x4xf32, #tpu.memory_space<vmem>>, vector<2x1x4xf32>
    %28 = vector.shape_cast %27 : vector<2x1x4xf32> to vector<2x4xf32>
    %c5 = arith.constant 5 : index
    %c0_27 = arith.constant 0 : index
    %c0_28 = arith.constant 0 : index
    %29 = vector.load %arg39[%c5, %c0_27, %c0_28] : memref<18x2x4xf32, #tpu.memory_space<vmem>>, vector<1x2x4xf32>
    %30 = vector.shape_cast %29 : vector<1x2x4xf32> to vector<2x4xf32>
    %31 = vector.shape_cast %28 : vector<2x4xf32> to vector<1x2x4xf32>
    tpu.vector_store %arg39[%c5, %c0_27, %c0_28], %31 {strides = array<i32>} : memref<18x2x4xf32, #tpu.memory_space<vmem>>, vector<1x2x4xf32>,
    %c0_29 = arith.constant 0 : index
    %c5_30 = arith.constant 5 : index
    %c0_31 = arith.constant 0 : index
    %32 = vector.load %arg0[%c0_29, %c5_30, %c0_31] : memref<2x16x4xf32, #tpu.memory_space<vmem>>, vector<2x1x4xf32>
    %33 = vector.shape_cast %32 : vector<2x1x4xf32> to vector<2x4xf32>
    %c6 = arith.constant 6 : index
    %c0_32 = arith.constant 0 : index
    %c0_33 = arith.constant 0 : index
    %34 = vector.load %arg39[%c6, %c0_32, %c0_33] : memref<18x2x4xf32, #tpu.memory_space<vmem>>, vector<1x2x4xf32>
    %35 = vector.shape_cast %34 : vector<1x2x4xf32> to vector<2x4xf32>
    %36 = vector.shape_cast %33 : vector<2x4xf32> to vector<1x2x4xf32>
    tpu.vector_store %arg39[%c6, %c0_32, %c0_33], %36 {strides = array<i32>} : memref<18x2x4xf32, #tpu.memory_space<vmem>>, vector<1x2x4xf32>,
    %c0_34 = arith.constant 0 : index
    %c6_35 = arith.constant 6 : index
    %c0_36 = arith.constant 0 : index
    %37 = vector.load %arg0[%c0_34, %c6_35, %c0_36] : memref<2x16x4xf32, #tpu.memory_space<vmem>>, vector<2x1x4xf32>
    %38 = vector.shape_cast %37 : vector<2x1x4xf32> to vector<2x4xf32>
    %c7 = arith.constant 7 : index
    %c0_37 = arith.constant 0 : index
    %c0_38 = arith.constant 0 : index
    %39 = vector.load %arg39[%c7, %c0_37, %c0_38] : memref<18x2x4xf32, #tpu.memory_space<vmem>>, vector<1x2x4xf32>
    %40 = vector.shape_cast %39 : vector<1x2x4xf32> to vector<2x4xf32>
    %41 = vector.shape_cast %38 : vector<2x4xf32> to vector<1x2x4xf32>
    tpu.vector_store %arg39[%c7, %c0_37, %c0_38], %41 {strides = array<i32>} : memref<18x2x4xf32, #tpu.memory_space<vmem>>, vector<1x2x4xf32>,
    %c0_39 = arith.constant 0 : index
    %c7_40 = arith.constant 7 : index
    %c0_41 = arith.constant 0 : index
    %42 = vector.load %arg0[%c0_39, %c7_40, %c0_41] : memref<2x16x4xf32, #tpu.memory_space<vmem>>, vector<2x1x4xf32>
    %43 = vector.shape_cast %42 : vector<2x1x4xf32> to vector<2x4xf32>
    %c8 = arith.constant 8 : index
    %c0_42 = arith.constant 0 : index
    %c0_43 = arith.constant 0 : index
    %44 = vector.load %arg39[%c8, %c0_42, %c0_43] : memref<18x2x4xf32, #tpu.memory_space<vmem>>, vector<1x2x4xf32>
    %45 = vector.shape_cast %44 : vector<1x2x4xf32> to vector<2x4xf32>
    %46 = vector.shape_cast %43 : vector<2x4xf32> to vector<1x2x4xf32>
    tpu.vector_store %arg39[%c8, %c0_42, %c0_43], %46 {strides = array<i32>} : memref<18x2x4xf32, #tpu.memory_space<vmem>>, vector<1x2x4xf32>,
    %c0_44 = arith.constant 0 : index
    %c8_45 = arith.constant 8 : index
    %c0_46 = arith.constant 0 : index
    %47 = vector.load %arg0[%c0_44, %c8_45, %c0_46] : memref<2x16x4xf32, #tpu.memory_space<vmem>>, vector<2x1x4xf32>
    %48 = vector.shape_cast %47 : vector<2x1x4xf32> to vector<2x4xf32>
    %c9 = arith.constant 9 : index
    %c0_47 = arith.constant 0 : index
    %c0_48 = arith.constant 0 : index
    %49 = vector.load %arg39[%c9, %c0_47, %c0_48] : memref<18x2x4xf32, #tpu.memory_space<vmem>>, vector<1x2x4xf32>
    %50 = vector.shape_cast %49 : vector<1x2x4xf32> to vector<2x4xf32>
    %51 = vector.shape_cast %48 : vector<2x4xf32> to vector<1x2x4xf32>
    tpu.vector_store %arg39[%c9, %c0_47, %c0_48], %51 {strides = array<i32>} : memref<18x2x4xf32, #tpu.memory_space<vmem>>, vector<1x2x4xf32>,
    %c0_49 = arith.constant 0 : index
    %c9_50 = arith.constant 9 : index
    %c0_51 = arith.constant 0 : index
    %52 = vector.load %arg0[%c0_49, %c9_50, %c0_51] : memref<2x16x4xf32, #tpu.memory_space<vmem>>, vector<2x1x4xf32>
    %53 = vector.shape_cast %52 : vector<2x1x4xf32> to vector<2x4xf32>
    %c10 = arith.constant 10 : index
    %c0_52 = arith.constant 0 : index
    %c0_53 = arith.constant 0 : index
    %54 = vector.load %arg39[%c10, %c0_52, %c0_53] : memref<18x2x4xf32, #tpu.memory_space<vmem>>, vector<1x2x4xf32>
    %55 = vector.shape_cast %54 : vector<1x2x4xf32> to vector<2x4xf32>
    %56 = vector.shape_cast %53 : vector<2x4xf32> to vector<1x2x4xf32>
    tpu.vector_store %arg39[%c10, %c0_52, %c0_53], %56 {strides = array<i32>} : memref<18x2x4xf32, #tpu.memory_space<vmem>>, vector<1x2x4xf32>,
    %c0_54 = arith.constant 0 : index
    %c10_55 = arith.constant 10 : index
    %c0_56 = arith.constant 0 : index
    %57 = vector.load %arg0[%c0_54, %c10_55, %c0_56] : memref<2x16x4xf32, #tpu.memory_space<vmem>>, vector<2x1x4xf32>
    %58 = vector.shape_cast %57 : vector<2x1x4xf32> to vector<2x4xf32>
    %c11 = arith.constant 11 : index
    %c0_57 = arith.constant 0 : index
    %c0_58 = arith.constant 0 : index
    %59 = vector.load %arg39[%c11, %c0_57, %c0_58] : memref<18x2x4xf32, #tpu.memory_space<vmem>>, vector<1x2x4xf32>
    %60 = vector.shape_cast %59 : vector<1x2x4xf32> to vector<2x4xf32>
    %61 = vector.shape_cast %58 : vector<2x4xf32> to vector<1x2x4xf32>
    tpu.vector_store %arg39[%c11, %c0_57, %c0_58], %61 {strides = array<i32>} : memref<18x2x4xf32, #tpu.memory_space<vmem>>, vector<1x2x4xf32>,
    %c0_59 = arith.constant 0 : index
    %c11_60 = arith.constant 11 : index
    %c0_61 = arith.constant 0 : index
    %62 = vector.load %arg0[%c0_59, %c11_60, %c0_61] : memref<2x16x4xf32, #tpu.memory_space<vmem>>, vector<2x1x4xf32>
    %63 = vector.shape_cast %62 : vector<2x1x4xf32> to vector<2x4xf32>
    %c12 = arith.constant 12 : index
    %c0_62 = arith.constant 0 : index
    %c0_63 = arith.constant 0 : index
    %64 = vector.load %arg39[%c12, %c0_62, %c0_63] : memref<18x2x4xf32, #tpu.memory_space<vmem>>, vector<1x2x4xf32>
    %65 = vector.shape_cast %64 : vector<1x2x4xf32> to vector<2x4xf32>
    %66 = vector.shape_cast %63 : vector<2x4xf32> to vector<1x2x4xf32>
    tpu.vector_store %arg39[%c12, %c0_62, %c0_63], %66 {strides = array<i32>} : memref<18x2x4xf32, #tpu.memory_space<vmem>>, vector<1x2x4xf32>,
    %c0_64 = arith.constant 0 : index
    %c12_65 = arith.constant 12 : index
    %c0_66 = arith.constant 0 : index
    %67 = vector.load %arg0[%c0_64, %c12_65, %c0_66] : memref<2x16x4xf32, #tpu.memory_space<vmem>>, vector<2x1x4xf32>
    %68 = vector.shape_cast %67 : vector<2x1x4xf32> to vector<2x4xf32>
    %c13 = arith.constant 13 : index
    %c0_67 = arith.constant 0 : index
    %c0_68 = arith.constant 0 : index
    %69 = vector.load %arg39[%c13, %c0_67, %c0_68] : memref<18x2x4xf32, #tpu.memory_space<vmem>>, vector<1x2x4xf32>
    %70 = vector.shape_cast %69 : vector<1x2x4xf32> to vector<2x4xf32>
    %71 = vector.shape_cast %68 : vector<2x4xf32> to vector<1x2x4xf32>
    tpu.vector_store %arg39[%c13, %c0_67, %c0_68], %71 {strides = array<i32>} : memref<18x2x4xf32, #tpu.memory_space<vmem>>, vector<1x2x4xf32>,
    %c0_69 = arith.constant 0 : index
    %c13_70 = arith.constant 13 : index
    %c0_71 = arith.constant 0 : index
    %72 = vector.load %arg0[%c0_69, %c13_70, %c0_71] : memref<2x16x4xf32, #tpu.memory_space<vmem>>, vector<2x1x4xf32>
    %73 = vector.shape_cast %72 : vector<2x1x4xf32> to vector<2x4xf32>
    %c14 = arith.constant 14 : index
    %c0_72 = arith.constant 0 : index
    %c0_73 = arith.constant 0 : index
    %74 = vector.load %arg39[%c14, %c0_72, %c0_73] : memref<18x2x4xf32, #tpu.memory_space<vmem>>, vector<1x2x4xf32>
    %75 = vector.shape_cast %74 : vector<1x2x4xf32> to vector<2x4xf32>
    %76 = vector.shape_cast %73 : vector<2x4xf32> to vector<1x2x4xf32>
    tpu.vector_store %arg39[%c14, %c0_72, %c0_73], %76 {strides = array<i32>} : memref<18x2x4xf32, #tpu.memory_space<vmem>>, vector<1x2x4xf32>,
    %c0_74 = arith.constant 0 : index
    %c14_75 = arith.constant 14 : index
    %c0_76 = arith.constant 0 : index
    %77 = vector.load %arg0[%c0_74, %c14_75, %c0_76] : memref<2x16x4xf32, #tpu.memory_space<vmem>>, vector<2x1x4xf32>
    %78 = vector.shape_cast %77 : vector<2x1x4xf32> to vector<2x4xf32>
    %c15 = arith.constant 15 : index
    %c0_77 = arith.constant 0 : index
    %c0_78 = arith.constant 0 : index
    %79 = vector.load %arg39[%c15, %c0_77, %c0_78] : memref<18x2x4xf32, #tpu.memory_space<vmem>>, vector<1x2x4xf32>
    %80 = vector.shape_cast %79 : vector<1x2x4xf32> to vector<2x4xf32>
    %81 = vector.shape_cast %78 : vector<2x4xf32> to vector<1x2x4xf32>
    tpu.vector_store %arg39[%c15, %c0_77, %c0_78], %81 {strides = array<i32>} : memref<18x2x4xf32, #tpu.memory_space<vmem>>, vector<1x2x4xf32>,
    %c0_79 = arith.constant 0 : index
    %c15_80 = arith.constant 15 : index
    %c0_81 = arith.constant 0 : index
    %82 = vector.load %arg0[%c0_79, %c15_80, %c0_81] : memref<2x16x4xf32, #tpu.memory_space<vmem>>, vector<2x1x4xf32>
    %83 = vector.shape_cast %82 : vector<2x1x4xf32> to vector<2x4xf32>
    %c16 = arith.constant 16 : index
    %c0_82 = arith.constant 0 : index
    %c0_83 = arith.constant 0 : index
    %84 = vector.load %arg39[%c16, %c0_82, %c0_83] : memref<18x2x4xf32, #tpu.memory_space<vmem>>, vector<1x2x4xf32>
    %85 = vector.shape_cast %84 : vector<1x2x4xf32> to vector<2x4xf32>
    %86 = vector.shape_cast %83 : vector<2x4xf32> to vector<1x2x4xf32>
    tpu.vector_store %arg39[%c16, %c0_82, %c0_83], %86 {strides = array<i32>} : memref<18x2x4xf32, #tpu.memory_space<vmem>>, vector<1x2x4xf32>,
    %c0_84 = arith.constant 0 : index
    %c0_85 = arith.constant 0 : index
    %c0_86 = arith.constant 0 : index
    %87 = vector.load %arg39[%c0_84, %c0_85, %c0_86] : memref<18x2x4xf32, #tpu.memory_space<vmem>>, vector<16x2x4xf32>
    %88 = vector.shape_cast %87 : vector<16x2x4xf32> to vector<32x4xf32>
    %c0_87 = arith.constant 0 : index
    %c0_88 = arith.constant 0 : index
    %c0_89 = arith.constant 0 : index
    %89 = vector.load %arg1[%c0_87, %c0_88, %c0_89] : memref<3x4x32xf32, #tpu.memory_space<vmem>>, vector<1x4x32xf32>
    %90 = vector.shape_cast %89 : vector<1x4x32xf32> to vector<4x32xf32>
    %cst_90 = arith.constant dense<0.000000e+00> : vector<32x32xf32>
    %91 = tpu.matmul %88, %90, %cst_90 {dimension_numbers = #tpu.dot_dimension_numbers<[1], [0], [0], [1], [0, 0, 1, 1], [], []>} : vector<32x4xf32>, vector<4x32xf32>, vector<32x32xf32> -> vector<32x32xf32>
    %c1_91 = arith.constant 1 : index
    %c0_92 = arith.constant 0 : index
    %c0_93 = arith.constant 0 : index
    %92 = vector.load %arg39[%c1_91, %c0_92, %c0_93] : memref<18x2x4xf32, #tpu.memory_space<vmem>>, vector<16x2x4xf32>
    %93 = vector.shape_cast %92 : vector<16x2x4xf32> to vector<32x4xf32>
    %c1_94 = arith.constant 1 : index
    %c0_95 = arith.constant 0 : index
    %c0_96 = arith.constant 0 : index
    %94 = vector.load %arg1[%c1_94, %c0_95, %c0_96] : memref<3x4x32xf32, #tpu.memory_space<vmem>>, vector<1x4x32xf32>
    %95 = vector.shape_cast %94 : vector<1x4x32xf32> to vector<4x32xf32>
    %cst_97 = arith.constant dense<0.000000e+00> : vector<32x32xf32>
    %96 = tpu.matmul %93, %95, %cst_97 {dimension_numbers = #tpu.dot_dimension_numbers<[1], [0], [0], [1], [0, 0, 1, 1], [], []>} : vector<32x4xf32>, vector<4x32xf32>, vector<32x32xf32> -> vector<32x32xf32>
    %97 = arith.addf %91, %96 : vector<32x32xf32>
    %c2_98 = arith.constant 2 : index
    %c0_99 = arith.constant 0 : index
    %c0_100 = arith.constant 0 : index
    %98 = vector.load %arg39[%c2_98, %c0_99, %c0_100] : memref<18x2x4xf32, #tpu.memory_space<vmem>>, vector<16x2x4xf32>
    %99 = vector.shape_cast %98 : vector<16x2x4xf32> to vector<32x4xf32>
    %c2_101 = arith.constant 2 : index
    %c0_102 = arith.constant 0 : index
    %c0_103 = arith.constant 0 : index
    %100 = vector.load %arg1[%c2_101, %c0_102, %c0_103] : memref<3x4x32xf32, #tpu.memory_space<vmem>>, vector<1x4x32xf32>
    %101 = vector.shape_cast %100 : vector<1x4x32xf32> to vector<4x32xf32>
    %cst_104 = arith.constant dense<0.000000e+00> : vector<32x32xf32>
    %102 = tpu.matmul %99, %101, %cst_104 {dimension_numbers = #tpu.dot_dimension_numbers<[1], [0], [0], [1], [0, 0, 1, 1], [], []>} : vector<32x4xf32>, vector<4x32xf32>, vector<32x32xf32> -> vector<32x32xf32>
    %103 = arith.addf %97, %102 : vector<32x32xf32>
    %c0_105 = arith.constant 0 : index
    %c0_106 = arith.constant 0 : index
    %104 = vector.load %arg2[%c0_105, %c0_106] : memref<1x32xf32, #tpu.memory_space<vmem>>, vector<1x32xf32>
    %105 = vector.broadcast %104 : vector<1x32xf32> to vector<32x32xf32>
    %106 = arith.addf %103, %105 : vector<32x32xf32>
    %cst_107 = arith.constant 0.000000e+00 : f32
    %107 = vector.broadcast %cst_107 : f32 to vector<32x32xf32>
    %108 = arith.maximumf %106, %107 : vector<32x32xf32>
    %cst_108 = arith.constant 0.000000e+00 : f32
    %109 = vector.broadcast %cst_108 : f32 to vector<2x32xf32>
    %c0_109 = arith.constant 0 : index
    %c0_110 = arith.constant 0 : index
    %c0_111 = arith.constant 0 : index
    %110 = vector.load %arg40[%c0_109, %c0_110, %c0_111] : memref<10x2x32xf32, #tpu.memory_space<vmem>>, vector<1x2x32xf32>
    %111 = vector.shape_cast %110 : vector<1x2x32xf32> to vector<2x32xf32>
    %112 = vector.shape_cast %109 : vector<2x32xf32> to vector<1x2x32xf32>
    tpu.vector_store %arg40[%c0_109, %c0_110, %c0_111], %112 {strides = array<i32>} : memref<10x2x32xf32, #tpu.memory_space<vmem>>, vector<1x2x32xf32>,
    %c9_112 = arith.constant 9 : index
    %c0_113 = arith.constant 0 : index
    %c0_114 = arith.constant 0 : index
    %113 = vector.load %arg40[%c9_112, %c0_113, %c0_114] : memref<10x2x32xf32, #tpu.memory_space<vmem>>, vector<1x2x32xf32>
    %114 = vector.shape_cast %113 : vector<1x2x32xf32> to vector<2x32xf32>
    %115 = vector.shape_cast %109 : vector<2x32xf32> to vector<1x2x32xf32>
    tpu.vector_store %arg40[%c9_112, %c0_113, %c0_114], %115 {strides = array<i32>} : memref<10x2x32xf32, #tpu.memory_space<vmem>>, vector<1x2x32xf32>,
    %116 = vector.extract_strided_slice %108 {offsets = [0, 0], sizes = [2, 32], strides = [1, 1]} : vector<32x32xf32> to vector<2x32xf32>
    %117 = vector.extract_strided_slice %108 {offsets = [2, 0], sizes = [2, 32], strides = [1, 1]} : vector<32x32xf32> to vector<2x32xf32>
    %118 = arith.maximumf %116, %117 : vector<2x32xf32>
    %c1_115 = arith.constant 1 : index
    %c0_116 = arith.constant 0 : index
    %c0_117 = arith.constant 0 : index
    %119 = vector.load %arg40[%c1_115, %c0_116, %c0_117] : memref<10x2x32xf32, #tpu.memory_space<vmem>>, vector<1x2x32xf32>
    %120 = vector.shape_cast %119 : vector<1x2x32xf32> to vector<2x32xf32>
    %121 = vector.shape_cast %118 : vector<2x32xf32> to vector<1x2x32xf32>
    tpu.vector_store %arg40[%c1_115, %c0_116, %c0_117], %121 {strides = array<i32>} : memref<10x2x32xf32, #tpu.memory_space<vmem>>, vector<1x2x32xf32>,
    %122 = vector.extract_strided_slice %108 {offsets = [4, 0], sizes = [2, 32], strides = [1, 1]} : vector<32x32xf32> to vector<2x32xf32>
    %123 = vector.extract_strided_slice %108 {offsets = [6, 0], sizes = [2, 32], strides = [1, 1]} : vector<32x32xf32> to vector<2x32xf32>
    %124 = arith.maximumf %122, %123 : vector<2x32xf32>
    %c2_118 = arith.constant 2 : index
    %c0_119 = arith.constant 0 : index
    %c0_120 = arith.constant 0 : index
    %125 = vector.load %arg40[%c2_118, %c0_119, %c0_120] : memref<10x2x32xf32, #tpu.memory_space<vmem>>, vector<1x2x32xf32>
    %126 = vector.shape_cast %125 : vector<1x2x32xf32> to vector<2x32xf32>
    %127 = vector.shape_cast %124 : vector<2x32xf32> to vector<1x2x32xf32>
    tpu.vector_store %arg40[%c2_118, %c0_119, %c0_120], %127 {strides = array<i32>} : memref<10x2x32xf32, #tpu.memory_space<vmem>>, vector<1x2x32xf32>,
    %128 = vector.extract_strided_slice %108 {offsets = [8, 0], sizes = [2, 32], strides = [1, 1]} : vector<32x32xf32> to vector<2x32xf32>
    %129 = vector.extract_strided_slice %108 {offsets = [10, 0], sizes = [2, 32], strides = [1, 1]} : vector<32x32xf32> to vector<2x32xf32>
    %130 = arith.maximumf %128, %129 : vector<2x32xf32>
    %c3_121 = arith.constant 3 : index
    %c0_122 = arith.constant 0 : index
    %c0_123 = arith.constant 0 : index
    %131 = vector.load %arg40[%c3_121, %c0_122, %c0_123] : memref<10x2x32xf32, #tpu.memory_space<vmem>>, vector<1x2x32xf32>
    %132 = vector.shape_cast %131 : vector<1x2x32xf32> to vector<2x32xf32>
    %133 = vector.shape_cast %130 : vector<2x32xf32> to vector<1x2x32xf32>
    tpu.vector_store %arg40[%c3_121, %c0_122, %c0_123], %133 {strides = array<i32>} : memref<10x2x32xf32, #tpu.memory_space<vmem>>, vector<1x2x32xf32>,
    %134 = vector.extract_strided_slice %108 {offsets = [12, 0], sizes = [2, 32], strides = [1, 1]} : vector<32x32xf32> to vector<2x32xf32>
    %135 = vector.extract_strided_slice %108 {offsets = [14, 0], sizes = [2, 32], strides = [1, 1]} : vector<32x32xf32> to vector<2x32xf32>
    %136 = arith.maximumf %134, %135 : vector<2x32xf32>
    %c4_124 = arith.constant 4 : index
    %c0_125 = arith.constant 0 : index
    %c0_126 = arith.constant 0 : index
    %137 = vector.load %arg40[%c4_124, %c0_125, %c0_126] : memref<10x2x32xf32, #tpu.memory_space<vmem>>, vector<1x2x32xf32>
    %138 = vector.shape_cast %137 : vector<1x2x32xf32> to vector<2x32xf32>
    %139 = vector.shape_cast %136 : vector<2x32xf32> to vector<1x2x32xf32>
    tpu.vector_store %arg40[%c4_124, %c0_125, %c0_126], %139 {strides = array<i32>} : memref<10x2x32xf32, #tpu.memory_space<vmem>>, vector<1x2x32xf32>,
    %140 = vector.extract_strided_slice %108 {offsets = [16, 0], sizes = [2, 32], strides = [1, 1]} : vector<32x32xf32> to vector<2x32xf32>
    %141 = vector.extract_strided_slice %108 {offsets = [18, 0], sizes = [2, 32], strides = [1, 1]} : vector<32x32xf32> to vector<2x32xf32>
    %142 = arith.maximumf %140, %141 : vector<2x32xf32>
    %c5_127 = arith.constant 5 : index
    %c0_128 = arith.constant 0 : index
    %c0_129 = arith.constant 0 : index
    %143 = vector.load %arg40[%c5_127, %c0_128, %c0_129] : memref<10x2x32xf32, #tpu.memory_space<vmem>>, vector<1x2x32xf32>
    %144 = vector.shape_cast %143 : vector<1x2x32xf32> to vector<2x32xf32>
    %145 = vector.shape_cast %142 : vector<2x32xf32> to vector<1x2x32xf32>
    tpu.vector_store %arg40[%c5_127, %c0_128, %c0_129], %145 {strides = array<i32>} : memref<10x2x32xf32, #tpu.memory_space<vmem>>, vector<1x2x32xf32>,
    %146 = vector.extract_strided_slice %108 {offsets = [20, 0], sizes = [2, 32], strides = [1, 1]} : vector<32x32xf32> to vector<2x32xf32>
    %147 = vector.extract_strided_slice %108 {offsets = [22, 0], sizes = [2, 32], strides = [1, 1]} : vector<32x32xf32> to vector<2x32xf32>
    %148 = arith.maximumf %146, %147 : vector<2x32xf32>
    %c6_130 = arith.constant 6 : index
    %c0_131 = arith.constant 0 : index
    %c0_132 = arith.constant 0 : index
    %149 = vector.load %arg40[%c6_130, %c0_131, %c0_132] : memref<10x2x32xf32, #tpu.memory_space<vmem>>, vector<1x2x32xf32>
    %150 = vector.shape_cast %149 : vector<1x2x32xf32> to vector<2x32xf32>
    %151 = vector.shape_cast %148 : vector<2x32xf32> to vector<1x2x32xf32>
    tpu.vector_store %arg40[%c6_130, %c0_131, %c0_132], %151 {strides = array<i32>} : memref<10x2x32xf32, #tpu.memory_space<vmem>>, vector<1x2x32xf32>,
    %152 = vector.extract_strided_slice %108 {offsets = [24, 0], sizes = [2, 32], strides = [1, 1]} : vector<32x32xf32> to vector<2x32xf32>
    %153 = vector.extract_strided_slice %108 {offsets = [26, 0], sizes = [2, 32], strides = [1, 1]} : vector<32x32xf32> to vector<2x32xf32>
    %154 = arith.maximumf %152, %153 : vector<2x32xf32>
    %c7_133 = arith.constant 7 : index
    %c0_134 = arith.constant 0 : index
    %c0_135 = arith.constant 0 : index
    %155 = vector.load %arg40[%c7_133, %c0_134, %c0_135] : memref<10x2x32xf32, #tpu.memory_space<vmem>>, vector<1x2x32xf32>
    %156 = vector.shape_cast %155 : vector<1x2x32xf32> to vector<2x32xf32>
    %157 = vector.shape_cast %154 : vector<2x32xf32> to vector<1x2x32xf32>
    tpu.vector_store %arg40[%c7_133, %c0_134, %c0_135], %157 {strides = array<i32>} : memref<10x2x32xf32, #tpu.memory_space<vmem>>, vector<1x2x32xf32>,
    %158 = vector.extract_strided_slice %108 {offsets = [28, 0], sizes = [2, 32], strides = [1, 1]} : vector<32x32xf32> to vector<2x32xf32>
    %159 = vector.extract_strided_slice %108 {offsets = [30, 0], sizes = [2, 32], strides = [1, 1]} : vector<32x32xf32> to vector<2x32xf32>
    %160 = arith.maximumf %158, %159 : vector<2x32xf32>
    %c8_136 = arith.constant 8 : index
    %c0_137 = arith.constant 0 : index
    %c0_138 = arith.constant 0 : index
    %161 = vector.load %arg40[%c8_136, %c0_137, %c0_138] : memref<10x2x32xf32, #tpu.memory_space<vmem>>, vector<1x2x32xf32>
    %162 = vector.shape_cast %161 : vector<1x2x32xf32> to vector<2x32xf32>
    %163 = vector.shape_cast %160 : vector<2x32xf32> to vector<1x2x32xf32>
    tpu.vector_store %arg40[%c8_136, %c0_137, %c0_138], %163 {strides = array<i32>} : memref<10x2x32xf32, #tpu.memory_space<vmem>>, vector<1x2x32xf32>,
    %c0_139 = arith.constant 0 : index
    %c0_140 = arith.constant 0 : index
    %c0_141 = arith.constant 0 : index
    %164 = vector.load %arg40[%c0_139, %c0_140, %c0_141] : memref<10x2x32xf32, #tpu.memory_space<vmem>>, vector<8x2x32xf32>
    %165 = vector.shape_cast %164 : vector<8x2x32xf32> to vector<16x32xf32>
    %c0_142 = arith.constant 0 : index
    %c0_143 = arith.constant 0 : index
    %c0_144 = arith.constant 0 : index
    %166 = vector.load %arg3[%c0_142, %c0_143, %c0_144] : memref<3x32x64xf32, #tpu.memory_space<vmem>>, vector<1x32x64xf32>
    %167 = vector.shape_cast %166 : vector<1x32x64xf32> to vector<32x64xf32>
    %cst_145 = arith.constant dense<0.000000e+00> : vector<16x64xf32>
    %168 = tpu.matmul %165, %167, %cst_145 {dimension_numbers = #tpu.dot_dimension_numbers<[1], [0], [0], [1], [0, 0, 1, 1], [], []>} : vector<16x32xf32>, vector<32x64xf32>, vector<16x64xf32> -> vector<16x64xf32>
    %c1_146 = arith.constant 1 : index
    %c0_147 = arith.constant 0 : index
    %c0_148 = arith.constant 0 : index
    %169 = vector.load %arg40[%c1_146, %c0_147, %c0_148] : memref<10x2x32xf32, #tpu.memory_space<vmem>>, vector<8x2x32xf32>
    %170 = vector.shape_cast %169 : vector<8x2x32xf32> to vector<16x32xf32>
    %c1_149 = arith.constant 1 : index
    %c0_150 = arith.constant 0 : index
    %c0_151 = arith.constant 0 : index
    %171 = vector.load %arg3[%c1_149, %c0_150, %c0_151] : memref<3x32x64xf32, #tpu.memory_space<vmem>>, vector<1x32x64xf32>
    %172 = vector.shape_cast %171 : vector<1x32x64xf32> to vector<32x64xf32>
    %cst_152 = arith.constant dense<0.000000e+00> : vector<16x64xf32>
    %173 = tpu.matmul %170, %172, %cst_152 {dimension_numbers = #tpu.dot_dimension_numbers<[1], [0], [0], [1], [0, 0, 1, 1], [], []>} : vector<16x32xf32>, vector<32x64xf32>, vector<16x64xf32> -> vector<16x64xf32>
    %174 = arith.addf %168, %173 : vector<16x64xf32>
    %c2_153 = arith.constant 2 : index
    %c0_154 = arith.constant 0 : index
    %c0_155 = arith.constant 0 : index
    %175 = vector.load %arg40[%c2_153, %c0_154, %c0_155] : memref<10x2x32xf32, #tpu.memory_space<vmem>>, vector<8x2x32xf32>
    %176 = vector.shape_cast %175 : vector<8x2x32xf32> to vector<16x32xf32>
    %c2_156 = arith.constant 2 : index
    %c0_157 = arith.constant 0 : index
    %c0_158 = arith.constant 0 : index
    %177 = vector.load %arg3[%c2_156, %c0_157, %c0_158] : memref<3x32x64xf32, #tpu.memory_space<vmem>>, vector<1x32x64xf32>
    %178 = vector.shape_cast %177 : vector<1x32x64xf32> to vector<32x64xf32>
    %cst_159 = arith.constant dense<0.000000e+00> : vector<16x64xf32>
    %179 = tpu.matmul %176, %178, %cst_159 {dimension_numbers = #tpu.dot_dimension_numbers<[1], [0], [0], [1], [0, 0, 1, 1], [], []>} : vector<16x32xf32>, vector<32x64xf32>, vector<16x64xf32> -> vector<16x64xf32>
    %180 = arith.addf %174, %179 : vector<16x64xf32>
    %c0_160 = arith.constant 0 : index
    %c0_161 = arith.constant 0 : index
    %181 = vector.load %arg4[%c0_160, %c0_161] : memref<1x64xf32, #tpu.memory_space<vmem>>, vector<1x64xf32>
    %182 = vector.broadcast %181 : vector<1x64xf32> to vector<16x64xf32>
    %183 = arith.addf %180, %182 : vector<16x64xf32>
    %cst_162 = arith.constant 0.000000e+00 : f32
    %184 = vector.broadcast %cst_162 : f32 to vector<16x64xf32>
    %185 = arith.maximumf %183, %184 : vector<16x64xf32>
    %cst_163 = arith.constant 0.000000e+00 : f32
    %186 = vector.broadcast %cst_163 : f32 to vector<2x64xf32>
    %c0_164 = arith.constant 0 : index
    %c0_165 = arith.constant 0 : index
    %c0_166 = arith.constant 0 : index
    %187 = vector.load %arg41[%c0_164, %c0_165, %c0_166] : memref<6x2x64xf32, #tpu.memory_space<vmem>>, vector<1x2x64xf32>
    %188 = vector.shape_cast %187 : vector<1x2x64xf32> to vector<2x64xf32>
    %189 = vector.shape_cast %186 : vector<2x64xf32> to vector<1x2x64xf32>
    tpu.vector_store %arg41[%c0_164, %c0_165, %c0_166], %189 {strides = array<i32>} : memref<6x2x64xf32, #tpu.memory_space<vmem>>, vector<1x2x64xf32>,
    %c5_167 = arith.constant 5 : index
    %c0_168 = arith.constant 0 : index
    %c0_169 = arith.constant 0 : index
    %190 = vector.load %arg41[%c5_167, %c0_168, %c0_169] : memref<6x2x64xf32, #tpu.memory_space<vmem>>, vector<1x2x64xf32>
    %191 = vector.shape_cast %190 : vector<1x2x64xf32> to vector<2x64xf32>
    %192 = vector.shape_cast %186 : vector<2x64xf32> to vector<1x2x64xf32>
    tpu.vector_store %arg41[%c5_167, %c0_168, %c0_169], %192 {strides = array<i32>} : memref<6x2x64xf32, #tpu.memory_space<vmem>>, vector<1x2x64xf32>,
    %193 = vector.extract_strided_slice %185 {offsets = [0, 0], sizes = [2, 64], strides = [1, 1]} : vector<16x64xf32> to vector<2x64xf32>
    %194 = vector.extract_strided_slice %185 {offsets = [2, 0], sizes = [2, 64], strides = [1, 1]} : vector<16x64xf32> to vector<2x64xf32>
    %195 = arith.maximumf %193, %194 : vector<2x64xf32>
    %c1_170 = arith.constant 1 : index
    %c0_171 = arith.constant 0 : index
    %c0_172 = arith.constant 0 : index
    %196 = vector.load %arg41[%c1_170, %c0_171, %c0_172] : memref<6x2x64xf32, #tpu.memory_space<vmem>>, vector<1x2x64xf32>
    %197 = vector.shape_cast %196 : vector<1x2x64xf32> to vector<2x64xf32>
    %198 = vector.shape_cast %195 : vector<2x64xf32> to vector<1x2x64xf32>
    tpu.vector_store %arg41[%c1_170, %c0_171, %c0_172], %198 {strides = array<i32>} : memref<6x2x64xf32, #tpu.memory_space<vmem>>, vector<1x2x64xf32>,
    %199 = vector.extract_strided_slice %185 {offsets = [4, 0], sizes = [2, 64], strides = [1, 1]} : vector<16x64xf32> to vector<2x64xf32>
    %200 = vector.extract_strided_slice %185 {offsets = [6, 0], sizes = [2, 64], strides = [1, 1]} : vector<16x64xf32> to vector<2x64xf32>
    %201 = arith.maximumf %199, %200 : vector<2x64xf32>
    %c2_173 = arith.constant 2 : index
    %c0_174 = arith.constant 0 : index
    %c0_175 = arith.constant 0 : index
    %202 = vector.load %arg41[%c2_173, %c0_174, %c0_175] : memref<6x2x64xf32, #tpu.memory_space<vmem>>, vector<1x2x64xf32>
    %203 = vector.shape_cast %202 : vector<1x2x64xf32> to vector<2x64xf32>
    %204 = vector.shape_cast %201 : vector<2x64xf32> to vector<1x2x64xf32>
    tpu.vector_store %arg41[%c2_173, %c0_174, %c0_175], %204 {strides = array<i32>} : memref<6x2x64xf32, #tpu.memory_space<vmem>>, vector<1x2x64xf32>,
    %205 = vector.extract_strided_slice %185 {offsets = [8, 0], sizes = [2, 64], strides = [1, 1]} : vector<16x64xf32> to vector<2x64xf32>
    %206 = vector.extract_strided_slice %185 {offsets = [10, 0], sizes = [2, 64], strides = [1, 1]} : vector<16x64xf32> to vector<2x64xf32>
    %207 = arith.maximumf %205, %206 : vector<2x64xf32>
    %c3_176 = arith.constant 3 : index
    %c0_177 = arith.constant 0 : index
    %c0_178 = arith.constant 0 : index
    %208 = vector.load %arg41[%c3_176, %c0_177, %c0_178] : memref<6x2x64xf32, #tpu.memory_space<vmem>>, vector<1x2x64xf32>
    %209 = vector.shape_cast %208 : vector<1x2x64xf32> to vector<2x64xf32>
    %210 = vector.shape_cast %207 : vector<2x64xf32> to vector<1x2x64xf32>
    tpu.vector_store %arg41[%c3_176, %c0_177, %c0_178], %210 {strides = array<i32>} : memref<6x2x64xf32, #tpu.memory_space<vmem>>, vector<1x2x64xf32>,
    %211 = vector.extract_strided_slice %185 {offsets = [12, 0], sizes = [2, 64], strides = [1, 1]} : vector<16x64xf32> to vector<2x64xf32>
    %212 = vector.extract_strided_slice %185 {offsets = [14, 0], sizes = [2, 64], strides = [1, 1]} : vector<16x64xf32> to vector<2x64xf32>
    %213 = arith.maximumf %211, %212 : vector<2x64xf32>
    %c4_179 = arith.constant 4 : index
    %c0_180 = arith.constant 0 : index
    %c0_181 = arith.constant 0 : index
    %214 = vector.load %arg41[%c4_179, %c0_180, %c0_181] : memref<6x2x64xf32, #tpu.memory_space<vmem>>, vector<1x2x64xf32>
    %215 = vector.shape_cast %214 : vector<1x2x64xf32> to vector<2x64xf32>
    %216 = vector.shape_cast %213 : vector<2x64xf32> to vector<1x2x64xf32>
    tpu.vector_store %arg41[%c4_179, %c0_180, %c0_181], %216 {strides = array<i32>} : memref<6x2x64xf32, #tpu.memory_space<vmem>>, vector<1x2x64xf32>,
    %c0_182 = arith.constant 0 : index
    %c0_183 = arith.constant 0 : index
    %c0_184 = arith.constant 0 : index
    %217 = vector.load %arg41[%c0_182, %c0_183, %c0_184] : memref<6x2x64xf32, #tpu.memory_space<vmem>>, vector<4x2x64xf32>
    %218 = vector.shape_cast %217 : vector<4x2x64xf32> to vector<8x64xf32>
    %c0_185 = arith.constant 0 : index
    %c0_186 = arith.constant 0 : index
    %c0_187 = arith.constant 0 : index
    %219 = vector.load %arg5[%c0_185, %c0_186, %c0_187] : memref<3x64x128xf32, #tpu.memory_space<vmem>>, vector<1x64x128xf32>
    %220 = vector.shape_cast %219 : vector<1x64x128xf32> to vector<64x128xf32>
    %cst_188 = arith.constant dense<0.000000e+00> : vector<8x128xf32>
    %221 = tpu.matmul %218, %220, %cst_188 {dimension_numbers = #tpu.dot_dimension_numbers<[1], [0], [0], [1], [0, 0, 1, 1], [], []>} : vector<8x64xf32>, vector<64x128xf32>, vector<8x128xf32> -> vector<8x128xf32>
    %c1_189 = arith.constant 1 : index
    %c0_190 = arith.constant 0 : index
    %c0_191 = arith.constant 0 : index
    %222 = vector.load %arg41[%c1_189, %c0_190, %c0_191] : memref<6x2x64xf32, #tpu.memory_space<vmem>>, vector<4x2x64xf32>
    %223 = vector.shape_cast %222 : vector<4x2x64xf32> to vector<8x64xf32>
    %c1_192 = arith.constant 1 : index
    %c0_193 = arith.constant 0 : index
    %c0_194 = arith.constant 0 : index
    %224 = vector.load %arg5[%c1_192, %c0_193, %c0_194] : memref<3x64x128xf32, #tpu.memory_space<vmem>>, vector<1x64x128xf32>
    %225 = vector.shape_cast %224 : vector<1x64x128xf32> to vector<64x128xf32>
    %cst_195 = arith.constant dense<0.000000e+00> : vector<8x128xf32>
    %226 = tpu.matmul %223, %225, %cst_195 {dimension_numbers = #tpu.dot_dimension_numbers<[1], [0], [0], [1], [0, 0, 1, 1], [], []>} : vector<8x64xf32>, vector<64x128xf32>, vector<8x128xf32> -> vector<8x128xf32>
    %227 = arith.addf %221, %226 : vector<8x128xf32>
    %c2_196 = arith.constant 2 : index
    %c0_197 = arith.constant 0 : index
    %c0_198 = arith.constant 0 : index
    %228 = vector.load %arg41[%c2_196, %c0_197, %c0_198] : memref<6x2x64xf32, #tpu.memory_space<vmem>>, vector<4x2x64xf32>
    %229 = vector.shape_cast %228 : vector<4x2x64xf32> to vector<8x64xf32>
    %c2_199 = arith.constant 2 : index
    %c0_200 = arith.constant 0 : index
    %c0_201 = arith.constant 0 : index
    %230 = vector.load %arg5[%c2_199, %c0_200, %c0_201] : memref<3x64x128xf32, #tpu.memory_space<vmem>>, vector<1x64x128xf32>
    %231 = vector.shape_cast %230 : vector<1x64x128xf32> to vector<64x128xf32>
    %cst_202 = arith.constant dense<0.000000e+00> : vector<8x128xf32>
    %232 = tpu.matmul %229, %231, %cst_202 {dimension_numbers = #tpu.dot_dimension_numbers<[1], [0], [0], [1], [0, 0, 1, 1], [], []>} : vector<8x64xf32>, vector<64x128xf32>, vector<8x128xf32> -> vector<8x128xf32>
    %233 = arith.addf %227, %232 : vector<8x128xf32>
    %c0_203 = arith.constant 0 : index
    %c0_204 = arith.constant 0 : index
    %234 = vector.load %arg6[%c0_203, %c0_204] : memref<1x128xf32, #tpu.memory_space<vmem>>, vector<1x128xf32>
    %235 = vector.broadcast %234 : vector<1x128xf32> to vector<8x128xf32>
    %236 = arith.addf %233, %235 : vector<8x128xf32>
    %cst_205 = arith.constant 0.000000e+00 : f32
    %237 = vector.broadcast %cst_205 : f32 to vector<8x128xf32>
    %238 = arith.maximumf %236, %237 : vector<8x128xf32>
    %239 = vector.extract_strided_slice %238 {offsets = [0, 0], sizes = [2, 128], strides = [1, 1]} : vector<8x128xf32> to vector<2x128xf32>
    %240 = vector.extract_strided_slice %238 {offsets = [2, 0], sizes = [2, 128], strides = [1, 1]} : vector<8x128xf32> to vector<2x128xf32>
    %241 = arith.maximumf %239, %240 : vector<2x128xf32>
    %c0_206 = arith.constant 0 : index
    %c0_207 = arith.constant 0 : index
    %c0_208 = arith.constant 0 : index
    %242 = vector.load %arg42[%c0_206, %c0_207, %c0_208] : memref<2x2x128xf32, #tpu.memory_space<vmem>>, vector<1x2x128xf32>
    %243 = vector.shape_cast %242 : vector<1x2x128xf32> to vector<2x128xf32>
    %244 = vector.shape_cast %241 : vector<2x128xf32> to vector<1x2x128xf32>
    tpu.vector_store %arg42[%c0_206, %c0_207, %c0_208], %244 {strides = array<i32>} : memref<2x2x128xf32, #tpu.memory_space<vmem>>, vector<1x2x128xf32>,
    %245 = vector.extract_strided_slice %238 {offsets = [4, 0], sizes = [2, 128], strides = [1, 1]} : vector<8x128xf32> to vector<2x128xf32>
    %246 = vector.extract_strided_slice %238 {offsets = [6, 0], sizes = [2, 128], strides = [1, 1]} : vector<8x128xf32> to vector<2x128xf32>
    %247 = arith.maximumf %245, %246 : vector<2x128xf32>
    %c1_209 = arith.constant 1 : index
    %c0_210 = arith.constant 0 : index
    %c0_211 = arith.constant 0 : index
    %248 = vector.load %arg42[%c1_209, %c0_210, %c0_211] : memref<2x2x128xf32, #tpu.memory_space<vmem>>, vector<1x2x128xf32>
    %249 = vector.shape_cast %248 : vector<1x2x128xf32> to vector<2x128xf32>
    %250 = vector.shape_cast %247 : vector<2x128xf32> to vector<1x2x128xf32>
    tpu.vector_store %arg42[%c1_209, %c0_210, %c0_211], %250 {strides = array<i32>} : memref<2x2x128xf32, #tpu.memory_space<vmem>>, vector<1x2x128xf32>,
    %c0_212 = arith.constant 0 : index
    %c0_213 = arith.constant 0 : index
    %c0_214 = arith.constant 0 : index
    %251 = vector.load %arg42[%c0_212, %c0_213, %c0_214] : memref<2x2x128xf32, #tpu.memory_space<vmem>>, vector<2x2x128xf32>
    %252 = vector.shape_cast %251 : vector<2x2x128xf32> to vector<4x128xf32>
    %c0_215 = arith.constant 0 : index
    %c0_216 = arith.constant 0 : index
    %253 = vector.load %arg7[%c0_215, %c0_216] : memref<128x64xf32, #tpu.memory_space<vmem>>, vector<128x64xf32>
    %cst_217 = arith.constant dense<0.000000e+00> : vector<4x64xf32>
    %254 = tpu.matmul %252, %253, %cst_217 {dimension_numbers = #tpu.dot_dimension_numbers<[1], [0], [0], [1], [0, 0, 1, 1], [], []>} : vector<4x128xf32>, vector<128x64xf32>, vector<4x64xf32> -> vector<4x64xf32>
    %c0_218 = arith.constant 0 : index
    %c0_219 = arith.constant 0 : index
    %255 = vector.load %arg9[%c0_218, %c0_219] : memref<1x64xf32, #tpu.memory_space<vmem>>, vector<1x64xf32>
    %256 = vector.broadcast %255 : vector<1x64xf32> to vector<4x64xf32>
    %257 = arith.addf %254, %256 : vector<4x64xf32>
    %c0_220 = arith.constant 0 : index
    %c0_221 = arith.constant 0 : index
    %258 = vector.load %arg8[%c0_220, %c0_221] : memref<16x64xf32, #tpu.memory_space<vmem>>, vector<16x64xf32>
    %cst_222 = arith.constant 0.000000e+00 : f32
    %259 = vector.broadcast %cst_222 : f32 to vector<2x16xf32>
    %cst_223 = arith.constant 0.000000e+00 : f32
    %260 = vector.broadcast %cst_223 : f32 to vector<2x16xf32>
    %261 = vector.extract_strided_slice %257 {offsets = [0, 0], sizes = [2, 64], strides = [1, 1]} : vector<4x64xf32> to vector<2x64xf32>
    %cst_224 = arith.constant dense<0.000000e+00> : vector<2x64xf32>
    %262 = tpu.matmul %259, %258, %cst_224 {dimension_numbers = #tpu.dot_dimension_numbers<[1], [0], [0], [1], [0, 0, 1, 1], [], []>} : vector<2x16xf32>, vector<16x64xf32>, vector<2x64xf32> -> vector<2x64xf32>
    %263 = arith.addf %261, %262 : vector<2x64xf32>
    %264 = vector.extract_strided_slice %263 {offsets = [0, 0], sizes = [2, 16], strides = [1, 1]} : vector<2x64xf32> to vector<2x16xf32>
    %265 = arith.negf %264 : vector<2x16xf32>
    %266 = math.exp %265 : vector<2x16xf32>
    %cst_225 = arith.constant 1.000000e+00 : f32
    %267 = vector.broadcast %cst_225 : f32 to vector<2x16xf32>
    %268 = arith.addf %267, %266 : vector<2x16xf32>
    %269 = arith.divf %267, %268 : vector<2x16xf32>
    %270 = vector.extract_strided_slice %263 {offsets = [0, 16], sizes = [2, 16], strides = [1, 1]} : vector<2x64xf32> to vector<2x16xf32>
    %271 = arith.negf %270 : vector<2x16xf32>
    %272 = math.exp %271 : vector<2x16xf32>
    %cst_226 = arith.constant 1.000000e+00 : f32
    %273 = vector.broadcast %cst_226 : f32 to vector<2x16xf32>
    %274 = arith.addf %273, %272 : vector<2x16xf32>
    %275 = arith.divf %273, %274 : vector<2x16xf32>
    %276 = vector.extract_strided_slice %263 {offsets = [0, 32], sizes = [2, 16], strides = [1, 1]} : vector<2x64xf32> to vector<2x16xf32>
    %277 = math.tanh %276 : vector<2x16xf32>
    %278 = vector.extract_strided_slice %263 {offsets = [0, 48], sizes = [2, 16], strides = [1, 1]} : vector<2x64xf32> to vector<2x16xf32>
    %279 = arith.negf %278 : vector<2x16xf32>
    %280 = math.exp %279 : vector<2x16xf32>
    %cst_227 = arith.constant 1.000000e+00 : f32
    %281 = vector.broadcast %cst_227 : f32 to vector<2x16xf32>
    %282 = arith.addf %281, %280 : vector<2x16xf32>
    %283 = arith.divf %281, %282 : vector<2x16xf32>
    %284 = arith.mulf %275, %260 : vector<2x16xf32>
    %285 = arith.mulf %269, %277 : vector<2x16xf32>
    %286 = arith.addf %284, %285 : vector<2x16xf32>
    %287 = math.tanh %286 : vector<2x16xf32>
    %288 = arith.mulf %283, %287 : vector<2x16xf32>
    %c0_228 = arith.constant 0 : index
    %c0_229 = arith.constant 0 : index
    %c0_230 = arith.constant 0 : index
    %289 = vector.load %arg43[%c0_228, %c0_229, %c0_230] : memref<2x2x16xf32, #tpu.memory_space<vmem>>, vector<1x2x16xf32>
    %290 = vector.shape_cast %289 : vector<1x2x16xf32> to vector<2x16xf32>
    %291 = vector.shape_cast %288 : vector<2x16xf32> to vector<1x2x16xf32>
    tpu.vector_store %arg43[%c0_228, %c0_229, %c0_230], %291 {strides = array<i32>} : memref<2x2x16xf32, #tpu.memory_space<vmem>>, vector<1x2x16xf32>,
    %292 = vector.extract_strided_slice %257 {offsets = [2, 0], sizes = [2, 64], strides = [1, 1]} : vector<4x64xf32> to vector<2x64xf32>
    %cst_231 = arith.constant dense<0.000000e+00> : vector<2x64xf32>
    %293 = tpu.matmul %288, %258, %cst_231 {dimension_numbers = #tpu.dot_dimension_numbers<[1], [0], [0], [1], [0, 0, 1, 1], [], []>} : vector<2x16xf32>, vector<16x64xf32>, vector<2x64xf32> -> vector<2x64xf32>
    %294 = arith.addf %292, %293 : vector<2x64xf32>
    %295 = vector.extract_strided_slice %294 {offsets = [0, 0], sizes = [2, 16], strides = [1, 1]} : vector<2x64xf32> to vector<2x16xf32>
    %296 = arith.negf %295 : vector<2x16xf32>
    %297 = math.exp %296 : vector<2x16xf32>
    %cst_232 = arith.constant 1.000000e+00 : f32
    %298 = vector.broadcast %cst_232 : f32 to vector<2x16xf32>
    %299 = arith.addf %298, %297 : vector<2x16xf32>
    %300 = arith.divf %298, %299 : vector<2x16xf32>
    %301 = vector.extract_strided_slice %294 {offsets = [0, 16], sizes = [2, 16], strides = [1, 1]} : vector<2x64xf32> to vector<2x16xf32>
    %302 = arith.negf %301 : vector<2x16xf32>
    %303 = math.exp %302 : vector<2x16xf32>
    %cst_233 = arith.constant 1.000000e+00 : f32
    %304 = vector.broadcast %cst_233 : f32 to vector<2x16xf32>
    %305 = arith.addf %304, %303 : vector<2x16xf32>
    %306 = arith.divf %304, %305 : vector<2x16xf32>
    %307 = vector.extract_strided_slice %294 {offsets = [0, 32], sizes = [2, 16], strides = [1, 1]} : vector<2x64xf32> to vector<2x16xf32>
    %308 = math.tanh %307 : vector<2x16xf32>
    %309 = vector.extract_strided_slice %294 {offsets = [0, 48], sizes = [2, 16], strides = [1, 1]} : vector<2x64xf32> to vector<2x16xf32>
    %310 = arith.negf %309 : vector<2x16xf32>
    %311 = math.exp %310 : vector<2x16xf32>
    %cst_234 = arith.constant 1.000000e+00 : f32
    %312 = vector.broadcast %cst_234 : f32 to vector<2x16xf32>
    %313 = arith.addf %312, %311 : vector<2x16xf32>
    %314 = arith.divf %312, %313 : vector<2x16xf32>
    %315 = arith.mulf %306, %286 : vector<2x16xf32>
    %316 = arith.mulf %300, %308 : vector<2x16xf32>
    %317 = arith.addf %315, %316 : vector<2x16xf32>
    %318 = math.tanh %317 : vector<2x16xf32>
    %319 = arith.mulf %314, %318 : vector<2x16xf32>
    %c1_235 = arith.constant 1 : index
    %c0_236 = arith.constant 0 : index
    %c0_237 = arith.constant 0 : index
    %320 = vector.load %arg43[%c1_235, %c0_236, %c0_237] : memref<2x2x16xf32, #tpu.memory_space<vmem>>, vector<1x2x16xf32>
    %321 = vector.shape_cast %320 : vector<1x2x16xf32> to vector<2x16xf32>
    %322 = vector.shape_cast %319 : vector<2x16xf32> to vector<1x2x16xf32>
    tpu.vector_store %arg43[%c1_235, %c0_236, %c0_237], %322 {strides = array<i32>} : memref<2x2x16xf32, #tpu.memory_space<vmem>>, vector<1x2x16xf32>,
    %c0_238 = arith.constant 0 : index
    %c0_239 = arith.constant 0 : index
    %c0_240 = arith.constant 0 : index
    %323 = vector.load %arg43[%c0_238, %c0_239, %c0_240] : memref<2x2x16xf32, #tpu.memory_space<vmem>>, vector<2x2x16xf32>
    %324 = vector.shape_cast %323 : vector<2x2x16xf32> to vector<4x16xf32>
    %c0_241 = arith.constant 0 : index
    %c0_242 = arith.constant 0 : index
    %325 = vector.load %arg10[%c0_241, %c0_242] : memref<16x64xf32, #tpu.memory_space<vmem>>, vector<16x64xf32>
    %cst_243 = arith.constant dense<0.000000e+00> : vector<4x64xf32>
    %326 = tpu.matmul %324, %325, %cst_243 {dimension_numbers = #tpu.dot_dimension_numbers<[1], [0], [0], [1], [0, 0, 1, 1], [], []>} : vector<4x16xf32>, vector<16x64xf32>, vector<4x64xf32> -> vector<4x64xf32>
    %c0_244 = arith.constant 0 : index
    %c0_245 = arith.constant 0 : index
    %327 = vector.load %arg12[%c0_244, %c0_245] : memref<1x64xf32, #tpu.memory_space<vmem>>, vector<1x64xf32>
    %328 = vector.broadcast %327 : vector<1x64xf32> to vector<4x64xf32>
    %329 = arith.addf %326, %328 : vector<4x64xf32>
    %c0_246 = arith.constant 0 : index
    %c0_247 = arith.constant 0 : index
    %330 = vector.load %arg11[%c0_246, %c0_247] : memref<16x64xf32, #tpu.memory_space<vmem>>, vector<16x64xf32>
    %cst_248 = arith.constant 0.000000e+00 : f32
    %331 = vector.broadcast %cst_248 : f32 to vector<2x16xf32>
    %cst_249 = arith.constant 0.000000e+00 : f32
    %332 = vector.broadcast %cst_249 : f32 to vector<2x16xf32>
    %333 = vector.extract_strided_slice %329 {offsets = [0, 0], sizes = [2, 64], strides = [1, 1]} : vector<4x64xf32> to vector<2x64xf32>
    %cst_250 = arith.constant dense<0.000000e+00> : vector<2x64xf32>
    %334 = tpu.matmul %331, %330, %cst_250 {dimension_numbers = #tpu.dot_dimension_numbers<[1], [0], [0], [1], [0, 0, 1, 1], [], []>} : vector<2x16xf32>, vector<16x64xf32>, vector<2x64xf32> -> vector<2x64xf32>
    %335 = arith.addf %333, %334 : vector<2x64xf32>
    %336 = vector.extract_strided_slice %335 {offsets = [0, 0], sizes = [2, 16], strides = [1, 1]} : vector<2x64xf32> to vector<2x16xf32>
    %337 = arith.negf %336 : vector<2x16xf32>
    %338 = math.exp %337 : vector<2x16xf32>
    %cst_251 = arith.constant 1.000000e+00 : f32
    %339 = vector.broadcast %cst_251 : f32 to vector<2x16xf32>
    %340 = arith.addf %339, %338 : vector<2x16xf32>
    %341 = arith.divf %339, %340 : vector<2x16xf32>
    %342 = vector.extract_strided_slice %335 {offsets = [0, 16], sizes = [2, 16], strides = [1, 1]} : vector<2x64xf32> to vector<2x16xf32>
    %343 = arith.negf %342 : vector<2x16xf32>
    %344 = math.exp %343 : vector<2x16xf32>
    %cst_252 = arith.constant 1.000000e+00 : f32
    %345 = vector.broadcast %cst_252 : f32 to vector<2x16xf32>
    %346 = arith.addf %345, %344 : vector<2x16xf32>
    %347 = arith.divf %345, %346 : vector<2x16xf32>
    %348 = vector.extract_strided_slice %335 {offsets = [0, 32], sizes = [2, 16], strides = [1, 1]} : vector<2x64xf32> to vector<2x16xf32>
    %349 = math.tanh %348 : vector<2x16xf32>
    %350 = vector.extract_strided_slice %335 {offsets = [0, 48], sizes = [2, 16], strides = [1, 1]} : vector<2x64xf32> to vector<2x16xf32>
    %351 = arith.negf %350 : vector<2x16xf32>
    %352 = math.exp %351 : vector<2x16xf32>
    %cst_253 = arith.constant 1.000000e+00 : f32
    %353 = vector.broadcast %cst_253 : f32 to vector<2x16xf32>
    %354 = arith.addf %353, %352 : vector<2x16xf32>
    %355 = arith.divf %353, %354 : vector<2x16xf32>
    %356 = arith.mulf %347, %332 : vector<2x16xf32>
    %357 = arith.mulf %341, %349 : vector<2x16xf32>
    %358 = arith.addf %356, %357 : vector<2x16xf32>
    %359 = math.tanh %358 : vector<2x16xf32>
    %360 = arith.mulf %355, %359 : vector<2x16xf32>
    %c0_254 = arith.constant 0 : index
    %c0_255 = arith.constant 0 : index
    %c0_256 = arith.constant 0 : index
    %361 = vector.load %arg44[%c0_254, %c0_255, %c0_256] : memref<2x2x16xf32, #tpu.memory_space<vmem>>, vector<1x2x16xf32>
    %362 = vector.shape_cast %361 : vector<1x2x16xf32> to vector<2x16xf32>
    %363 = vector.shape_cast %360 : vector<2x16xf32> to vector<1x2x16xf32>
    tpu.vector_store %arg44[%c0_254, %c0_255, %c0_256], %363 {strides = array<i32>} : memref<2x2x16xf32, #tpu.memory_space<vmem>>, vector<1x2x16xf32>,
    %364 = vector.extract_strided_slice %329 {offsets = [2, 0], sizes = [2, 64], strides = [1, 1]} : vector<4x64xf32> to vector<2x64xf32>
    %cst_257 = arith.constant dense<0.000000e+00> : vector<2x64xf32>
    %365 = tpu.matmul %360, %330, %cst_257 {dimension_numbers = #tpu.dot_dimension_numbers<[1], [0], [0], [1], [0, 0, 1, 1], [], []>} : vector<2x16xf32>, vector<16x64xf32>, vector<2x64xf32> -> vector<2x64xf32>
    %366 = arith.addf %364, %365 : vector<2x64xf32>
    %367 = vector.extract_strided_slice %366 {offsets = [0, 0], sizes = [2, 16], strides = [1, 1]} : vector<2x64xf32> to vector<2x16xf32>
    %368 = arith.negf %367 : vector<2x16xf32>
    %369 = math.exp %368 : vector<2x16xf32>
    %cst_258 = arith.constant 1.000000e+00 : f32
    %370 = vector.broadcast %cst_258 : f32 to vector<2x16xf32>
    %371 = arith.addf %370, %369 : vector<2x16xf32>
    %372 = arith.divf %370, %371 : vector<2x16xf32>
    %373 = vector.extract_strided_slice %366 {offsets = [0, 16], sizes = [2, 16], strides = [1, 1]} : vector<2x64xf32> to vector<2x16xf32>
    %374 = arith.negf %373 : vector<2x16xf32>
    %375 = math.exp %374 : vector<2x16xf32>
    %cst_259 = arith.constant 1.000000e+00 : f32
    %376 = vector.broadcast %cst_259 : f32 to vector<2x16xf32>
    %377 = arith.addf %376, %375 : vector<2x16xf32>
    %378 = arith.divf %376, %377 : vector<2x16xf32>
    %379 = vector.extract_strided_slice %366 {offsets = [0, 32], sizes = [2, 16], strides = [1, 1]} : vector<2x64xf32> to vector<2x16xf32>
    %380 = math.tanh %379 : vector<2x16xf32>
    %381 = vector.extract_strided_slice %366 {offsets = [0, 48], sizes = [2, 16], strides = [1, 1]} : vector<2x64xf32> to vector<2x16xf32>
    %382 = arith.negf %381 : vector<2x16xf32>
    %383 = math.exp %382 : vector<2x16xf32>
    %cst_260 = arith.constant 1.000000e+00 : f32
    %384 = vector.broadcast %cst_260 : f32 to vector<2x16xf32>
    %385 = arith.addf %384, %383 : vector<2x16xf32>
    %386 = arith.divf %384, %385 : vector<2x16xf32>
    %387 = arith.mulf %378, %358 : vector<2x16xf32>
    %388 = arith.mulf %372, %380 : vector<2x16xf32>
    %389 = arith.addf %387, %388 : vector<2x16xf32>
    %390 = math.tanh %389 : vector<2x16xf32>
    %391 = arith.mulf %386, %390 : vector<2x16xf32>
    %c1_261 = arith.constant 1 : index
    %c0_262 = arith.constant 0 : index
    %c0_263 = arith.constant 0 : index
    %392 = vector.load %arg44[%c1_261, %c0_262, %c0_263] : memref<2x2x16xf32, #tpu.memory_space<vmem>>, vector<1x2x16xf32>
    %393 = vector.shape_cast %392 : vector<1x2x16xf32> to vector<2x16xf32>
    %394 = vector.shape_cast %391 : vector<2x16xf32> to vector<1x2x16xf32>
    tpu.vector_store %arg44[%c1_261, %c0_262, %c0_263], %394 {strides = array<i32>} : memref<2x2x16xf32, #tpu.memory_space<vmem>>, vector<1x2x16xf32>,
    %c0_264 = arith.constant 0 : index
    %c0_265 = arith.constant 0 : index
    %c0_266 = arith.constant 0 : index
    %395 = vector.load %arg44[%c0_264, %c0_265, %c0_266] : memref<2x2x16xf32, #tpu.memory_space<vmem>>, vector<2x2x16xf32>
    %396 = vector.shape_cast %395 : vector<2x2x16xf32> to vector<4x16xf32>
    %c0_267 = arith.constant 0 : index
    %c0_268 = arith.constant 0 : index
    %397 = vector.load %arg13[%c0_267, %c0_268] : memref<16x64xf32, #tpu.memory_space<vmem>>, vector<16x64xf32>
    %cst_269 = arith.constant dense<0.000000e+00> : vector<4x64xf32>
    %398 = tpu.matmul %396, %397, %cst_269 {dimension_numbers = #tpu.dot_dimension_numbers<[1], [0], [0], [1], [0, 0, 1, 1], [], []>} : vector<4x16xf32>, vector<16x64xf32>, vector<4x64xf32> -> vector<4x64xf32>
    %c0_270 = arith.constant 0 : index
    %c0_271 = arith.constant 0 : index
    %399 = vector.load %arg15[%c0_270, %c0_271] : memref<1x64xf32, #tpu.memory_space<vmem>>, vector<1x64xf32>
    %400 = vector.broadcast %399 : vector<1x64xf32> to vector<4x64xf32>
    %401 = arith.addf %398, %400 : vector<4x64xf32>
    %c0_272 = arith.constant 0 : index
    %c0_273 = arith.constant 0 : index
    %402 = vector.load %arg14[%c0_272, %c0_273] : memref<16x64xf32, #tpu.memory_space<vmem>>, vector<16x64xf32>
    %cst_274 = arith.constant 0.000000e+00 : f32
    %403 = vector.broadcast %cst_274 : f32 to vector<2x16xf32>
    %cst_275 = arith.constant 0.000000e+00 : f32
    %404 = vector.broadcast %cst_275 : f32 to vector<2x16xf32>
    %405 = vector.extract_strided_slice %401 {offsets = [0, 0], sizes = [2, 64], strides = [1, 1]} : vector<4x64xf32> to vector<2x64xf32>
    %cst_276 = arith.constant dense<0.000000e+00> : vector<2x64xf32>
    %406 = tpu.matmul %403, %402, %cst_276 {dimension_numbers = #tpu.dot_dimension_numbers<[1], [0], [0], [1], [0, 0, 1, 1], [], []>} : vector<2x16xf32>, vector<16x64xf32>, vector<2x64xf32> -> vector<2x64xf32>
    %407 = arith.addf %405, %406 : vector<2x64xf32>
    %408 = vector.extract_strided_slice %407 {offsets = [0, 0], sizes = [2, 16], strides = [1, 1]} : vector<2x64xf32> to vector<2x16xf32>
    %409 = arith.negf %408 : vector<2x16xf32>
    %410 = math.exp %409 : vector<2x16xf32>
    %cst_277 = arith.constant 1.000000e+00 : f32
    %411 = vector.broadcast %cst_277 : f32 to vector<2x16xf32>
    %412 = arith.addf %411, %410 : vector<2x16xf32>
    %413 = arith.divf %411, %412 : vector<2x16xf32>
    %414 = vector.extract_strided_slice %407 {offsets = [0, 16], sizes = [2, 16], strides = [1, 1]} : vector<2x64xf32> to vector<2x16xf32>
    %415 = arith.negf %414 : vector<2x16xf32>
    %416 = math.exp %415 : vector<2x16xf32>
    %cst_278 = arith.constant 1.000000e+00 : f32
    %417 = vector.broadcast %cst_278 : f32 to vector<2x16xf32>
    %418 = arith.addf %417, %416 : vector<2x16xf32>
    %419 = arith.divf %417, %418 : vector<2x16xf32>
    %420 = vector.extract_strided_slice %407 {offsets = [0, 32], sizes = [2, 16], strides = [1, 1]} : vector<2x64xf32> to vector<2x16xf32>
    %421 = math.tanh %420 : vector<2x16xf32>
    %422 = vector.extract_strided_slice %407 {offsets = [0, 48], sizes = [2, 16], strides = [1, 1]} : vector<2x64xf32> to vector<2x16xf32>
    %423 = arith.negf %422 : vector<2x16xf32>
    %424 = math.exp %423 : vector<2x16xf32>
    %cst_279 = arith.constant 1.000000e+00 : f32
    %425 = vector.broadcast %cst_279 : f32 to vector<2x16xf32>
    %426 = arith.addf %425, %424 : vector<2x16xf32>
    %427 = arith.divf %425, %426 : vector<2x16xf32>
    %428 = arith.mulf %419, %404 : vector<2x16xf32>
    %429 = arith.mulf %413, %421 : vector<2x16xf32>
    %430 = arith.addf %428, %429 : vector<2x16xf32>
    %431 = math.tanh %430 : vector<2x16xf32>
    %432 = arith.mulf %427, %431 : vector<2x16xf32>
    %c0_280 = arith.constant 0 : index
    %c0_281 = arith.constant 0 : index
    %c0_282 = arith.constant 0 : index
    %433 = vector.load %arg45[%c0_280, %c0_281, %c0_282] : memref<2x2x16xf32, #tpu.memory_space<vmem>>, vector<1x2x16xf32>
    %434 = vector.shape_cast %433 : vector<1x2x16xf32> to vector<2x16xf32>
    %435 = vector.shape_cast %432 : vector<2x16xf32> to vector<1x2x16xf32>
    tpu.vector_store %arg45[%c0_280, %c0_281, %c0_282], %435 {strides = array<i32>} : memref<2x2x16xf32, #tpu.memory_space<vmem>>, vector<1x2x16xf32>,
    %436 = vector.extract_strided_slice %401 {offsets = [2, 0], sizes = [2, 64], strides = [1, 1]} : vector<4x64xf32> to vector<2x64xf32>
    %cst_283 = arith.constant dense<0.000000e+00> : vector<2x64xf32>
    %437 = tpu.matmul %432, %402, %cst_283 {dimension_numbers = #tpu.dot_dimension_numbers<[1], [0], [0], [1], [0, 0, 1, 1], [], []>} : vector<2x16xf32>, vector<16x64xf32>, vector<2x64xf32> -> vector<2x64xf32>
    %438 = arith.addf %436, %437 : vector<2x64xf32>
    %439 = vector.extract_strided_slice %438 {offsets = [0, 0], sizes = [2, 16], strides = [1, 1]} : vector<2x64xf32> to vector<2x16xf32>
    %440 = arith.negf %439 : vector<2x16xf32>
    %441 = math.exp %440 : vector<2x16xf32>
    %cst_284 = arith.constant 1.000000e+00 : f32
    %442 = vector.broadcast %cst_284 : f32 to vector<2x16xf32>
    %443 = arith.addf %442, %441 : vector<2x16xf32>
    %444 = arith.divf %442, %443 : vector<2x16xf32>
    %445 = vector.extract_strided_slice %438 {offsets = [0, 16], sizes = [2, 16], strides = [1, 1]} : vector<2x64xf32> to vector<2x16xf32>
    %446 = arith.negf %445 : vector<2x16xf32>
    %447 = math.exp %446 : vector<2x16xf32>
    %cst_285 = arith.constant 1.000000e+00 : f32
    %448 = vector.broadcast %cst_285 : f32 to vector<2x16xf32>
    %449 = arith.addf %448, %447 : vector<2x16xf32>
    %450 = arith.divf %448, %449 : vector<2x16xf32>
    %451 = vector.extract_strided_slice %438 {offsets = [0, 32], sizes = [2, 16], strides = [1, 1]} : vector<2x64xf32> to vector<2x16xf32>
    %452 = math.tanh %451 : vector<2x16xf32>
    %453 = vector.extract_strided_slice %438 {offsets = [0, 48], sizes = [2, 16], strides = [1, 1]} : vector<2x64xf32> to vector<2x16xf32>
    %454 = arith.negf %453 : vector<2x16xf32>
    %455 = math.exp %454 : vector<2x16xf32>
    %cst_286 = arith.constant 1.000000e+00 : f32
    %456 = vector.broadcast %cst_286 : f32 to vector<2x16xf32>
    %457 = arith.addf %456, %455 : vector<2x16xf32>
    %458 = arith.divf %456, %457 : vector<2x16xf32>
    %459 = arith.mulf %450, %430 : vector<2x16xf32>
    %460 = arith.mulf %444, %452 : vector<2x16xf32>
    %461 = arith.addf %459, %460 : vector<2x16xf32>
    %462 = math.tanh %461 : vector<2x16xf32>
    %463 = arith.mulf %458, %462 : vector<2x16xf32>
    %c1_287 = arith.constant 1 : index
    %c0_288 = arith.constant 0 : index
    %c0_289 = arith.constant 0 : index
    %464 = vector.load %arg45[%c1_287, %c0_288, %c0_289] : memref<2x2x16xf32, #tpu.memory_space<vmem>>, vector<1x2x16xf32>
    %465 = vector.shape_cast %464 : vector<1x2x16xf32> to vector<2x16xf32>
    %466 = vector.shape_cast %463 : vector<2x16xf32> to vector<1x2x16xf32>
    tpu.vector_store %arg45[%c1_287, %c0_288, %c0_289], %466 {strides = array<i32>} : memref<2x2x16xf32, #tpu.memory_space<vmem>>, vector<1x2x16xf32>,
    %c0_290 = arith.constant 0 : index
    %c0_291 = arith.constant 0 : index
    %c0_292 = arith.constant 0 : index
    %467 = vector.load %arg45[%c0_290, %c0_291, %c0_292] : memref<2x2x16xf32, #tpu.memory_space<vmem>>, vector<2x2x16xf32>
    %468 = vector.shape_cast %467 : vector<2x2x16xf32> to vector<4x16xf32>
    %c0_293 = arith.constant 0 : index
    %c0_294 = arith.constant 0 : index
    %469 = vector.load %arg16[%c0_293, %c0_294] : memref<16x128xf32, #tpu.memory_space<vmem>>, vector<16x128xf32>
    %cst_295 = arith.constant dense<0.000000e+00> : vector<4x128xf32>
    %470 = tpu.matmul %468, %469, %cst_295 {dimension_numbers = #tpu.dot_dimension_numbers<[1], [0], [0], [1], [0, 0, 1, 1], [], []>} : vector<4x16xf32>, vector<16x128xf32>, vector<4x128xf32> -> vector<4x128xf32>
    %c0_296 = arith.constant 0 : index
    %c0_297 = arith.constant 0 : index
    %471 = vector.load %arg18[%c0_296, %c0_297] : memref<1x128xf32, #tpu.memory_space<vmem>>, vector<1x128xf32>
    %472 = vector.broadcast %471 : vector<1x128xf32> to vector<4x128xf32>
    %473 = arith.addf %470, %472 : vector<4x128xf32>
    %c0_298 = arith.constant 0 : index
    %c0_299 = arith.constant 0 : index
    %474 = vector.load %arg17[%c0_298, %c0_299] : memref<32x128xf32, #tpu.memory_space<vmem>>, vector<32x128xf32>
    %cst_300 = arith.constant 0.000000e+00 : f32
    %475 = vector.broadcast %cst_300 : f32 to vector<2x32xf32>
    %cst_301 = arith.constant 0.000000e+00 : f32
    %476 = vector.broadcast %cst_301 : f32 to vector<2x32xf32>
    %477 = vector.extract_strided_slice %473 {offsets = [0, 0], sizes = [2, 128], strides = [1, 1]} : vector<4x128xf32> to vector<2x128xf32>
    %cst_302 = arith.constant dense<0.000000e+00> : vector<2x128xf32>
    %478 = tpu.matmul %475, %474, %cst_302 {dimension_numbers = #tpu.dot_dimension_numbers<[1], [0], [0], [1], [0, 0, 1, 1], [], []>} : vector<2x32xf32>, vector<32x128xf32>, vector<2x128xf32> -> vector<2x128xf32>
    %479 = arith.addf %477, %478 : vector<2x128xf32>
    %480 = vector.extract_strided_slice %479 {offsets = [0, 0], sizes = [2, 32], strides = [1, 1]} : vector<2x128xf32> to vector<2x32xf32>
    %481 = arith.negf %480 : vector<2x32xf32>
    %482 = math.exp %481 : vector<2x32xf32>
    %cst_303 = arith.constant 1.000000e+00 : f32
    %483 = vector.broadcast %cst_303 : f32 to vector<2x32xf32>
    %484 = arith.addf %483, %482 : vector<2x32xf32>
    %485 = arith.divf %483, %484 : vector<2x32xf32>
    %486 = vector.extract_strided_slice %479 {offsets = [0, 32], sizes = [2, 32], strides = [1, 1]} : vector<2x128xf32> to vector<2x32xf32>
    %487 = arith.negf %486 : vector<2x32xf32>
    %488 = math.exp %487 : vector<2x32xf32>
    %cst_304 = arith.constant 1.000000e+00 : f32
    %489 = vector.broadcast %cst_304 : f32 to vector<2x32xf32>
    %490 = arith.addf %489, %488 : vector<2x32xf32>
    %491 = arith.divf %489, %490 : vector<2x32xf32>
    %492 = vector.extract_strided_slice %479 {offsets = [0, 64], sizes = [2, 32], strides = [1, 1]} : vector<2x128xf32> to vector<2x32xf32>
    %493 = math.tanh %492 : vector<2x32xf32>
    %494 = vector.extract_strided_slice %479 {offsets = [0, 96], sizes = [2, 32], strides = [1, 1]} : vector<2x128xf32> to vector<2x32xf32>
    %495 = arith.negf %494 : vector<2x32xf32>
    %496 = math.exp %495 : vector<2x32xf32>
    %cst_305 = arith.constant 1.000000e+00 : f32
    %497 = vector.broadcast %cst_305 : f32 to vector<2x32xf32>
    %498 = arith.addf %497, %496 : vector<2x32xf32>
    %499 = arith.divf %497, %498 : vector<2x32xf32>
    %500 = arith.mulf %491, %476 : vector<2x32xf32>
    %501 = arith.mulf %485, %493 : vector<2x32xf32>
    %502 = arith.addf %500, %501 : vector<2x32xf32>
    %503 = math.tanh %502 : vector<2x32xf32>
    %504 = arith.mulf %499, %503 : vector<2x32xf32>
    %c0_306 = arith.constant 0 : index
    %c0_307 = arith.constant 0 : index
    %c0_308 = arith.constant 0 : index
    %505 = vector.load %arg46[%c0_306, %c0_307, %c0_308] : memref<2x2x32xf32, #tpu.memory_space<vmem>>, vector<1x2x32xf32>
    %506 = vector.shape_cast %505 : vector<1x2x32xf32> to vector<2x32xf32>
    %507 = vector.shape_cast %504 : vector<2x32xf32> to vector<1x2x32xf32>
    tpu.vector_store %arg46[%c0_306, %c0_307, %c0_308], %507 {strides = array<i32>} : memref<2x2x32xf32, #tpu.memory_space<vmem>>, vector<1x2x32xf32>,
    %508 = vector.extract_strided_slice %473 {offsets = [2, 0], sizes = [2, 128], strides = [1, 1]} : vector<4x128xf32> to vector<2x128xf32>
    %cst_309 = arith.constant dense<0.000000e+00> : vector<2x128xf32>
    %509 = tpu.matmul %504, %474, %cst_309 {dimension_numbers = #tpu.dot_dimension_numbers<[1], [0], [0], [1], [0, 0, 1, 1], [], []>} : vector<2x32xf32>, vector<32x128xf32>, vector<2x128xf32> -> vector<2x128xf32>
    %510 = arith.addf %508, %509 : vector<2x128xf32>
    %511 = vector.extract_strided_slice %510 {offsets = [0, 0], sizes = [2, 32], strides = [1, 1]} : vector<2x128xf32> to vector<2x32xf32>
    %512 = arith.negf %511 : vector<2x32xf32>
    %513 = math.exp %512 : vector<2x32xf32>
    %cst_310 = arith.constant 1.000000e+00 : f32
    %514 = vector.broadcast %cst_310 : f32 to vector<2x32xf32>
    %515 = arith.addf %514, %513 : vector<2x32xf32>
    %516 = arith.divf %514, %515 : vector<2x32xf32>
    %517 = vector.extract_strided_slice %510 {offsets = [0, 32], sizes = [2, 32], strides = [1, 1]} : vector<2x128xf32> to vector<2x32xf32>
    %518 = arith.negf %517 : vector<2x32xf32>
    %519 = math.exp %518 : vector<2x32xf32>
    %cst_311 = arith.constant 1.000000e+00 : f32
    %520 = vector.broadcast %cst_311 : f32 to vector<2x32xf32>
    %521 = arith.addf %520, %519 : vector<2x32xf32>
    %522 = arith.divf %520, %521 : vector<2x32xf32>
    %523 = vector.extract_strided_slice %510 {offsets = [0, 64], sizes = [2, 32], strides = [1, 1]} : vector<2x128xf32> to vector<2x32xf32>
    %524 = math.tanh %523 : vector<2x32xf32>
    %525 = vector.extract_strided_slice %510 {offsets = [0, 96], sizes = [2, 32], strides = [1, 1]} : vector<2x128xf32> to vector<2x32xf32>
    %526 = arith.negf %525 : vector<2x32xf32>
    %527 = math.exp %526 : vector<2x32xf32>
    %cst_312 = arith.constant 1.000000e+00 : f32
    %528 = vector.broadcast %cst_312 : f32 to vector<2x32xf32>
    %529 = arith.addf %528, %527 : vector<2x32xf32>
    %530 = arith.divf %528, %529 : vector<2x32xf32>
    %531 = arith.mulf %522, %502 : vector<2x32xf32>
    %532 = arith.mulf %516, %524 : vector<2x32xf32>
    %533 = arith.addf %531, %532 : vector<2x32xf32>
    %534 = math.tanh %533 : vector<2x32xf32>
    %535 = arith.mulf %530, %534 : vector<2x32xf32>
    %c1_313 = arith.constant 1 : index
    %c0_314 = arith.constant 0 : index
    %c0_315 = arith.constant 0 : index
    %536 = vector.load %arg46[%c1_313, %c0_314, %c0_315] : memref<2x2x32xf32, #tpu.memory_space<vmem>>, vector<1x2x32xf32>
    %537 = vector.shape_cast %536 : vector<1x2x32xf32> to vector<2x32xf32>
    %538 = vector.shape_cast %535 : vector<2x32xf32> to vector<1x2x32xf32>
    tpu.vector_store %arg46[%c1_313, %c0_314, %c0_315], %538 {strides = array<i32>} : memref<2x2x32xf32, #tpu.memory_space<vmem>>, vector<1x2x32xf32>,
    %c0_316 = arith.constant 0 : index
    %c0_317 = arith.constant 0 : index
    %c0_318 = arith.constant 0 : index
    %539 = vector.load %arg46[%c0_316, %c0_317, %c0_318] : memref<2x2x32xf32, #tpu.memory_space<vmem>>, vector<2x2x32xf32>
    %540 = vector.shape_cast %539 : vector<2x2x32xf32> to vector<4x32xf32>
    %c0_319 = arith.constant 0 : index
    %c0_320 = arith.constant 0 : index
    %541 = vector.load %arg19[%c0_319, %c0_320] : memref<32x128xf32, #tpu.memory_space<vmem>>, vector<32x128xf32>
    %cst_321 = arith.constant dense<0.000000e+00> : vector<4x128xf32>
    %542 = tpu.matmul %540, %541, %cst_321 {dimension_numbers = #tpu.dot_dimension_numbers<[1], [0], [0], [1], [0, 0, 1, 1], [], []>} : vector<4x32xf32>, vector<32x128xf32>, vector<4x128xf32> -> vector<4x128xf32>
    %c0_322 = arith.constant 0 : index
    %c0_323 = arith.constant 0 : index
    %543 = vector.load %arg21[%c0_322, %c0_323] : memref<1x128xf32, #tpu.memory_space<vmem>>, vector<1x128xf32>
    %544 = vector.broadcast %543 : vector<1x128xf32> to vector<4x128xf32>
    %545 = arith.addf %542, %544 : vector<4x128xf32>
    %c0_324 = arith.constant 0 : index
    %c0_325 = arith.constant 0 : index
    %546 = vector.load %arg20[%c0_324, %c0_325] : memref<32x128xf32, #tpu.memory_space<vmem>>, vector<32x128xf32>
    %cst_326 = arith.constant 0.000000e+00 : f32
    %547 = vector.broadcast %cst_326 : f32 to vector<2x32xf32>
    %cst_327 = arith.constant 0.000000e+00 : f32
    %548 = vector.broadcast %cst_327 : f32 to vector<2x32xf32>
    %549 = vector.extract_strided_slice %545 {offsets = [0, 0], sizes = [2, 128], strides = [1, 1]} : vector<4x128xf32> to vector<2x128xf32>
    %cst_328 = arith.constant dense<0.000000e+00> : vector<2x128xf32>
    %550 = tpu.matmul %547, %546, %cst_328 {dimension_numbers = #tpu.dot_dimension_numbers<[1], [0], [0], [1], [0, 0, 1, 1], [], []>} : vector<2x32xf32>, vector<32x128xf32>, vector<2x128xf32> -> vector<2x128xf32>
    %551 = arith.addf %549, %550 : vector<2x128xf32>
    %552 = vector.extract_strided_slice %551 {offsets = [0, 0], sizes = [2, 32], strides = [1, 1]} : vector<2x128xf32> to vector<2x32xf32>
    %553 = arith.negf %552 : vector<2x32xf32>
    %554 = math.exp %553 : vector<2x32xf32>
    %cst_329 = arith.constant 1.000000e+00 : f32
    %555 = vector.broadcast %cst_329 : f32 to vector<2x32xf32>
    %556 = arith.addf %555, %554 : vector<2x32xf32>
    %557 = arith.divf %555, %556 : vector<2x32xf32>
    %558 = vector.extract_strided_slice %551 {offsets = [0, 32], sizes = [2, 32], strides = [1, 1]} : vector<2x128xf32> to vector<2x32xf32>
    %559 = arith.negf %558 : vector<2x32xf32>
    %560 = math.exp %559 : vector<2x32xf32>
    %cst_330 = arith.constant 1.000000e+00 : f32
    %561 = vector.broadcast %cst_330 : f32 to vector<2x32xf32>
    %562 = arith.addf %561, %560 : vector<2x32xf32>
    %563 = arith.divf %561, %562 : vector<2x32xf32>
    %564 = vector.extract_strided_slice %551 {offsets = [0, 64], sizes = [2, 32], strides = [1, 1]} : vector<2x128xf32> to vector<2x32xf32>
    %565 = math.tanh %564 : vector<2x32xf32>
    %566 = vector.extract_strided_slice %551 {offsets = [0, 96], sizes = [2, 32], strides = [1, 1]} : vector<2x128xf32> to vector<2x32xf32>
    %567 = arith.negf %566 : vector<2x32xf32>
    %568 = math.exp %567 : vector<2x32xf32>
    %cst_331 = arith.constant 1.000000e+00 : f32
    %569 = vector.broadcast %cst_331 : f32 to vector<2x32xf32>
    %570 = arith.addf %569, %568 : vector<2x32xf32>
    %571 = arith.divf %569, %570 : vector<2x32xf32>
    %572 = arith.mulf %563, %548 : vector<2x32xf32>
    %573 = arith.mulf %557, %565 : vector<2x32xf32>
    %574 = arith.addf %572, %573 : vector<2x32xf32>
    %575 = math.tanh %574 : vector<2x32xf32>
    %576 = arith.mulf %571, %575 : vector<2x32xf32>
    %c0_332 = arith.constant 0 : index
    %c0_333 = arith.constant 0 : index
    %c0_334 = arith.constant 0 : index
    %577 = vector.load %arg47[%c0_332, %c0_333, %c0_334] : memref<2x2x32xf32, #tpu.memory_space<vmem>>, vector<1x2x32xf32>
    %578 = vector.shape_cast %577 : vector<1x2x32xf32> to vector<2x32xf32>
    %579 = vector.shape_cast %576 : vector<2x32xf32> to vector<1x2x32xf32>
    tpu.vector_store %arg47[%c0_332, %c0_333, %c0_334], %579 {strides = array<i32>} : memref<2x2x32xf32, #tpu.memory_space<vmem>>, vector<1x2x32xf32>,
    %580 = vector.extract_strided_slice %545 {offsets = [2, 0], sizes = [2, 128], strides = [1, 1]} : vector<4x128xf32> to vector<2x128xf32>
    %cst_335 = arith.constant dense<0.000000e+00> : vector<2x128xf32>
    %581 = tpu.matmul %576, %546, %cst_335 {dimension_numbers = #tpu.dot_dimension_numbers<[1], [0], [0], [1], [0, 0, 1, 1], [], []>} : vector<2x32xf32>, vector<32x128xf32>, vector<2x128xf32> -> vector<2x128xf32>
    %582 = arith.addf %580, %581 : vector<2x128xf32>
    %583 = vector.extract_strided_slice %582 {offsets = [0, 0], sizes = [2, 32], strides = [1, 1]} : vector<2x128xf32> to vector<2x32xf32>
    %584 = arith.negf %583 : vector<2x32xf32>
    %585 = math.exp %584 : vector<2x32xf32>
    %cst_336 = arith.constant 1.000000e+00 : f32
    %586 = vector.broadcast %cst_336 : f32 to vector<2x32xf32>
    %587 = arith.addf %586, %585 : vector<2x32xf32>
    %588 = arith.divf %586, %587 : vector<2x32xf32>
    %589 = vector.extract_strided_slice %582 {offsets = [0, 32], sizes = [2, 32], strides = [1, 1]} : vector<2x128xf32> to vector<2x32xf32>
    %590 = arith.negf %589 : vector<2x32xf32>
    %591 = math.exp %590 : vector<2x32xf32>
    %cst_337 = arith.constant 1.000000e+00 : f32
    %592 = vector.broadcast %cst_337 : f32 to vector<2x32xf32>
    %593 = arith.addf %592, %591 : vector<2x32xf32>
    %594 = arith.divf %592, %593 : vector<2x32xf32>
    %595 = vector.extract_strided_slice %582 {offsets = [0, 64], sizes = [2, 32], strides = [1, 1]} : vector<2x128xf32> to vector<2x32xf32>
    %596 = math.tanh %595 : vector<2x32xf32>
    %597 = vector.extract_strided_slice %582 {offsets = [0, 96], sizes = [2, 32], strides = [1, 1]} : vector<2x128xf32> to vector<2x32xf32>
    %598 = arith.negf %597 : vector<2x32xf32>
    %599 = math.exp %598 : vector<2x32xf32>
    %cst_338 = arith.constant 1.000000e+00 : f32
    %600 = vector.broadcast %cst_338 : f32 to vector<2x32xf32>
    %601 = arith.addf %600, %599 : vector<2x32xf32>
    %602 = arith.divf %600, %601 : vector<2x32xf32>
    %603 = arith.mulf %594, %574 : vector<2x32xf32>
    %604 = arith.mulf %588, %596 : vector<2x32xf32>
    %605 = arith.addf %603, %604 : vector<2x32xf32>
    %606 = math.tanh %605 : vector<2x32xf32>
    %607 = arith.mulf %602, %606 : vector<2x32xf32>
    %c1_339 = arith.constant 1 : index
    %c0_340 = arith.constant 0 : index
    %c0_341 = arith.constant 0 : index
    %608 = vector.load %arg47[%c1_339, %c0_340, %c0_341] : memref<2x2x32xf32, #tpu.memory_space<vmem>>, vector<1x2x32xf32>
    %609 = vector.shape_cast %608 : vector<1x2x32xf32> to vector<2x32xf32>
    %610 = vector.shape_cast %607 : vector<2x32xf32> to vector<1x2x32xf32>
    tpu.vector_store %arg47[%c1_339, %c0_340, %c0_341], %610 {strides = array<i32>} : memref<2x2x32xf32, #tpu.memory_space<vmem>>, vector<1x2x32xf32>,
    %c0_342 = arith.constant 0 : index
    %c0_343 = arith.constant 0 : index
    %c0_344 = arith.constant 0 : index
    %611 = vector.load %arg47[%c0_342, %c0_343, %c0_344] : memref<2x2x32xf32, #tpu.memory_space<vmem>>, vector<2x2x32xf32>
    %612 = vector.shape_cast %611 : vector<2x2x32xf32> to vector<4x32xf32>
    %c0_345 = arith.constant 0 : index
    %c0_346 = arith.constant 0 : index
    %613 = vector.load %arg22[%c0_345, %c0_346] : memref<32x128xf32, #tpu.memory_space<vmem>>, vector<32x128xf32>
    %cst_347 = arith.constant dense<0.000000e+00> : vector<4x128xf32>
    %614 = tpu.matmul %612, %613, %cst_347 {dimension_numbers = #tpu.dot_dimension_numbers<[1], [0], [0], [1], [0, 0, 1, 1], [], []>} : vector<4x32xf32>, vector<32x128xf32>, vector<4x128xf32> -> vector<4x128xf32>
    %c0_348 = arith.constant 0 : index
    %c0_349 = arith.constant 0 : index
    %615 = vector.load %arg24[%c0_348, %c0_349] : memref<1x128xf32, #tpu.memory_space<vmem>>, vector<1x128xf32>
    %616 = vector.broadcast %615 : vector<1x128xf32> to vector<4x128xf32>
    %617 = arith.addf %614, %616 : vector<4x128xf32>
    %c0_350 = arith.constant 0 : index
    %c0_351 = arith.constant 0 : index
    %618 = vector.load %arg23[%c0_350, %c0_351] : memref<32x128xf32, #tpu.memory_space<vmem>>, vector<32x128xf32>
    %cst_352 = arith.constant 0.000000e+00 : f32
    %619 = vector.broadcast %cst_352 : f32 to vector<2x32xf32>
    %cst_353 = arith.constant 0.000000e+00 : f32
    %620 = vector.broadcast %cst_353 : f32 to vector<2x32xf32>
    %621 = vector.extract_strided_slice %617 {offsets = [0, 0], sizes = [2, 128], strides = [1, 1]} : vector<4x128xf32> to vector<2x128xf32>
    %cst_354 = arith.constant dense<0.000000e+00> : vector<2x128xf32>
    %622 = tpu.matmul %619, %618, %cst_354 {dimension_numbers = #tpu.dot_dimension_numbers<[1], [0], [0], [1], [0, 0, 1, 1], [], []>} : vector<2x32xf32>, vector<32x128xf32>, vector<2x128xf32> -> vector<2x128xf32>
    %623 = arith.addf %621, %622 : vector<2x128xf32>
    %624 = vector.extract_strided_slice %623 {offsets = [0, 0], sizes = [2, 32], strides = [1, 1]} : vector<2x128xf32> to vector<2x32xf32>
    %625 = arith.negf %624 : vector<2x32xf32>
    %626 = math.exp %625 : vector<2x32xf32>
    %cst_355 = arith.constant 1.000000e+00 : f32
    %627 = vector.broadcast %cst_355 : f32 to vector<2x32xf32>
    %628 = arith.addf %627, %626 : vector<2x32xf32>
    %629 = arith.divf %627, %628 : vector<2x32xf32>
    %630 = vector.extract_strided_slice %623 {offsets = [0, 32], sizes = [2, 32], strides = [1, 1]} : vector<2x128xf32> to vector<2x32xf32>
    %631 = arith.negf %630 : vector<2x32xf32>
    %632 = math.exp %631 : vector<2x32xf32>
    %cst_356 = arith.constant 1.000000e+00 : f32
    %633 = vector.broadcast %cst_356 : f32 to vector<2x32xf32>
    %634 = arith.addf %633, %632 : vector<2x32xf32>
    %635 = arith.divf %633, %634 : vector<2x32xf32>
    %636 = vector.extract_strided_slice %623 {offsets = [0, 64], sizes = [2, 32], strides = [1, 1]} : vector<2x128xf32> to vector<2x32xf32>
    %637 = math.tanh %636 : vector<2x32xf32>
    %638 = vector.extract_strided_slice %623 {offsets = [0, 96], sizes = [2, 32], strides = [1, 1]} : vector<2x128xf32> to vector<2x32xf32>
    %639 = arith.negf %638 : vector<2x32xf32>
    %640 = math.exp %639 : vector<2x32xf32>
    %cst_357 = arith.constant 1.000000e+00 : f32
    %641 = vector.broadcast %cst_357 : f32 to vector<2x32xf32>
    %642 = arith.addf %641, %640 : vector<2x32xf32>
    %643 = arith.divf %641, %642 : vector<2x32xf32>
    %644 = arith.mulf %635, %620 : vector<2x32xf32>
    %645 = arith.mulf %629, %637 : vector<2x32xf32>
    %646 = arith.addf %644, %645 : vector<2x32xf32>
    %647 = math.tanh %646 : vector<2x32xf32>
    %648 = arith.mulf %643, %647 : vector<2x32xf32>
    %c0_358 = arith.constant 0 : index
    %c0_359 = arith.constant 0 : index
    %c0_360 = arith.constant 0 : index
    %649 = vector.load %arg48[%c0_358, %c0_359, %c0_360] : memref<2x2x32xf32, #tpu.memory_space<vmem>>, vector<1x2x32xf32>
    %650 = vector.shape_cast %649 : vector<1x2x32xf32> to vector<2x32xf32>
    %651 = vector.shape_cast %648 : vector<2x32xf32> to vector<1x2x32xf32>
    tpu.vector_store %arg48[%c0_358, %c0_359, %c0_360], %651 {strides = array<i32>} : memref<2x2x32xf32, #tpu.memory_space<vmem>>, vector<1x2x32xf32>,
    %652 = vector.extract_strided_slice %617 {offsets = [2, 0], sizes = [2, 128], strides = [1, 1]} : vector<4x128xf32> to vector<2x128xf32>
    %cst_361 = arith.constant dense<0.000000e+00> : vector<2x128xf32>
    %653 = tpu.matmul %648, %618, %cst_361 {dimension_numbers = #tpu.dot_dimension_numbers<[1], [0], [0], [1], [0, 0, 1, 1], [], []>} : vector<2x32xf32>, vector<32x128xf32>, vector<2x128xf32> -> vector<2x128xf32>
    %654 = arith.addf %652, %653 : vector<2x128xf32>
    %655 = vector.extract_strided_slice %654 {offsets = [0, 0], sizes = [2, 32], strides = [1, 1]} : vector<2x128xf32> to vector<2x32xf32>
    %656 = arith.negf %655 : vector<2x32xf32>
    %657 = math.exp %656 : vector<2x32xf32>
    %cst_362 = arith.constant 1.000000e+00 : f32
    %658 = vector.broadcast %cst_362 : f32 to vector<2x32xf32>
    %659 = arith.addf %658, %657 : vector<2x32xf32>
    %660 = arith.divf %658, %659 : vector<2x32xf32>
    %661 = vector.extract_strided_slice %654 {offsets = [0, 32], sizes = [2, 32], strides = [1, 1]} : vector<2x128xf32> to vector<2x32xf32>
    %662 = arith.negf %661 : vector<2x32xf32>
    %663 = math.exp %662 : vector<2x32xf32>
    %cst_363 = arith.constant 1.000000e+00 : f32
    %664 = vector.broadcast %cst_363 : f32 to vector<2x32xf32>
    %665 = arith.addf %664, %663 : vector<2x32xf32>
    %666 = arith.divf %664, %665 : vector<2x32xf32>
    %667 = vector.extract_strided_slice %654 {offsets = [0, 64], sizes = [2, 32], strides = [1, 1]} : vector<2x128xf32> to vector<2x32xf32>
    %668 = math.tanh %667 : vector<2x32xf32>
    %669 = vector.extract_strided_slice %654 {offsets = [0, 96], sizes = [2, 32], strides = [1, 1]} : vector<2x128xf32> to vector<2x32xf32>
    %670 = arith.negf %669 : vector<2x32xf32>
    %671 = math.exp %670 : vector<2x32xf32>
    %cst_364 = arith.constant 1.000000e+00 : f32
    %672 = vector.broadcast %cst_364 : f32 to vector<2x32xf32>
    %673 = arith.addf %672, %671 : vector<2x32xf32>
    %674 = arith.divf %672, %673 : vector<2x32xf32>
    %675 = arith.mulf %666, %646 : vector<2x32xf32>
    %676 = arith.mulf %660, %668 : vector<2x32xf32>
    %677 = arith.addf %675, %676 : vector<2x32xf32>
    %678 = math.tanh %677 : vector<2x32xf32>
    %679 = arith.mulf %674, %678 : vector<2x32xf32>
    %c1_365 = arith.constant 1 : index
    %c0_366 = arith.constant 0 : index
    %c0_367 = arith.constant 0 : index
    %680 = vector.load %arg48[%c1_365, %c0_366, %c0_367] : memref<2x2x32xf32, #tpu.memory_space<vmem>>, vector<1x2x32xf32>
    %681 = vector.shape_cast %680 : vector<1x2x32xf32> to vector<2x32xf32>
    %682 = vector.shape_cast %679 : vector<2x32xf32> to vector<1x2x32xf32>
    tpu.vector_store %arg48[%c1_365, %c0_366, %c0_367], %682 {strides = array<i32>} : memref<2x2x32xf32, #tpu.memory_space<vmem>>, vector<1x2x32xf32>,
    %c0_368 = arith.constant 0 : index
    %c0_369 = arith.constant 0 : index
    %c0_370 = arith.constant 0 : index
    %683 = vector.load %arg48[%c0_368, %c0_369, %c0_370] : memref<2x2x32xf32, #tpu.memory_space<vmem>>, vector<2x2x32xf32>
    %684 = vector.shape_cast %683 : vector<2x2x32xf32> to vector<4x32xf32>
    %c0_371 = arith.constant 0 : index
    %c0_372 = arith.constant 0 : index
    %685 = vector.load %arg25[%c0_371, %c0_372] : memref<32x64xf32, #tpu.memory_space<vmem>>, vector<32x64xf32>
    %cst_373 = arith.constant dense<0.000000e+00> : vector<4x64xf32>
    %686 = tpu.matmul %684, %685, %cst_373 {dimension_numbers = #tpu.dot_dimension_numbers<[1], [0], [0], [1], [0, 0, 1, 1], [], []>} : vector<4x32xf32>, vector<32x64xf32>, vector<4x64xf32> -> vector<4x64xf32>
    %c0_374 = arith.constant 0 : index
    %c0_375 = arith.constant 0 : index
    %687 = vector.load %arg27[%c0_374, %c0_375] : memref<1x64xf32, #tpu.memory_space<vmem>>, vector<1x64xf32>
    %688 = vector.broadcast %687 : vector<1x64xf32> to vector<4x64xf32>
    %689 = arith.addf %686, %688 : vector<4x64xf32>
    %c0_376 = arith.constant 0 : index
    %c0_377 = arith.constant 0 : index
    %690 = vector.load %arg26[%c0_376, %c0_377] : memref<16x64xf32, #tpu.memory_space<vmem>>, vector<16x64xf32>
    %cst_378 = arith.constant 0.000000e+00 : f32
    %691 = vector.broadcast %cst_378 : f32 to vector<2x16xf32>
    %cst_379 = arith.constant 0.000000e+00 : f32
    %692 = vector.broadcast %cst_379 : f32 to vector<2x16xf32>
    %693 = vector.extract_strided_slice %689 {offsets = [0, 0], sizes = [2, 64], strides = [1, 1]} : vector<4x64xf32> to vector<2x64xf32>
    %cst_380 = arith.constant dense<0.000000e+00> : vector<2x64xf32>
    %694 = tpu.matmul %691, %690, %cst_380 {dimension_numbers = #tpu.dot_dimension_numbers<[1], [0], [0], [1], [0, 0, 1, 1], [], []>} : vector<2x16xf32>, vector<16x64xf32>, vector<2x64xf32> -> vector<2x64xf32>
    %695 = arith.addf %693, %694 : vector<2x64xf32>
    %696 = vector.extract_strided_slice %695 {offsets = [0, 0], sizes = [2, 16], strides = [1, 1]} : vector<2x64xf32> to vector<2x16xf32>
    %697 = arith.negf %696 : vector<2x16xf32>
    %698 = math.exp %697 : vector<2x16xf32>
    %cst_381 = arith.constant 1.000000e+00 : f32
    %699 = vector.broadcast %cst_381 : f32 to vector<2x16xf32>
    %700 = arith.addf %699, %698 : vector<2x16xf32>
    %701 = arith.divf %699, %700 : vector<2x16xf32>
    %702 = vector.extract_strided_slice %695 {offsets = [0, 16], sizes = [2, 16], strides = [1, 1]} : vector<2x64xf32> to vector<2x16xf32>
    %703 = arith.negf %702 : vector<2x16xf32>
    %704 = math.exp %703 : vector<2x16xf32>
    %cst_382 = arith.constant 1.000000e+00 : f32
    %705 = vector.broadcast %cst_382 : f32 to vector<2x16xf32>
    %706 = arith.addf %705, %704 : vector<2x16xf32>
    %707 = arith.divf %705, %706 : vector<2x16xf32>
    %708 = vector.extract_strided_slice %695 {offsets = [0, 32], sizes = [2, 16], strides = [1, 1]} : vector<2x64xf32> to vector<2x16xf32>
    %709 = math.tanh %708 : vector<2x16xf32>
    %710 = vector.extract_strided_slice %695 {offsets = [0, 48], sizes = [2, 16], strides = [1, 1]} : vector<2x64xf32> to vector<2x16xf32>
    %711 = arith.negf %710 : vector<2x16xf32>
    %712 = math.exp %711 : vector<2x16xf32>
    %cst_383 = arith.constant 1.000000e+00 : f32
    %713 = vector.broadcast %cst_383 : f32 to vector<2x16xf32>
    %714 = arith.addf %713, %712 : vector<2x16xf32>
    %715 = arith.divf %713, %714 : vector<2x16xf32>
    %716 = arith.mulf %707, %692 : vector<2x16xf32>
    %717 = arith.mulf %701, %709 : vector<2x16xf32>
    %718 = arith.addf %716, %717 : vector<2x16xf32>
    %719 = math.tanh %718 : vector<2x16xf32>
    %720 = arith.mulf %715, %719 : vector<2x16xf32>
    %c0_384 = arith.constant 0 : index
    %c0_385 = arith.constant 0 : index
    %c0_386 = arith.constant 0 : index
    %721 = vector.load %arg49[%c0_384, %c0_385, %c0_386] : memref<2x2x16xf32, #tpu.memory_space<vmem>>, vector<1x2x16xf32>
    %722 = vector.shape_cast %721 : vector<1x2x16xf32> to vector<2x16xf32>
    %723 = vector.shape_cast %720 : vector<2x16xf32> to vector<1x2x16xf32>
    tpu.vector_store %arg49[%c0_384, %c0_385, %c0_386], %723 {strides = array<i32>} : memref<2x2x16xf32, #tpu.memory_space<vmem>>, vector<1x2x16xf32>,
    %724 = vector.extract_strided_slice %689 {offsets = [2, 0], sizes = [2, 64], strides = [1, 1]} : vector<4x64xf32> to vector<2x64xf32>
    %cst_387 = arith.constant dense<0.000000e+00> : vector<2x64xf32>
    %725 = tpu.matmul %720, %690, %cst_387 {dimension_numbers = #tpu.dot_dimension_numbers<[1], [0], [0], [1], [0, 0, 1, 1], [], []>} : vector<2x16xf32>, vector<16x64xf32>, vector<2x64xf32> -> vector<2x64xf32>
    %726 = arith.addf %724, %725 : vector<2x64xf32>
    %727 = vector.extract_strided_slice %726 {offsets = [0, 0], sizes = [2, 16], strides = [1, 1]} : vector<2x64xf32> to vector<2x16xf32>
    %728 = arith.negf %727 : vector<2x16xf32>
    %729 = math.exp %728 : vector<2x16xf32>
    %cst_388 = arith.constant 1.000000e+00 : f32
    %730 = vector.broadcast %cst_388 : f32 to vector<2x16xf32>
    %731 = arith.addf %730, %729 : vector<2x16xf32>
    %732 = arith.divf %730, %731 : vector<2x16xf32>
    %733 = vector.extract_strided_slice %726 {offsets = [0, 16], sizes = [2, 16], strides = [1, 1]} : vector<2x64xf32> to vector<2x16xf32>
    %734 = arith.negf %733 : vector<2x16xf32>
    %735 = math.exp %734 : vector<2x16xf32>
    %cst_389 = arith.constant 1.000000e+00 : f32
    %736 = vector.broadcast %cst_389 : f32 to vector<2x16xf32>
    %737 = arith.addf %736, %735 : vector<2x16xf32>
    %738 = arith.divf %736, %737 : vector<2x16xf32>
    %739 = vector.extract_strided_slice %726 {offsets = [0, 32], sizes = [2, 16], strides = [1, 1]} : vector<2x64xf32> to vector<2x16xf32>
    %740 = math.tanh %739 : vector<2x16xf32>
    %741 = vector.extract_strided_slice %726 {offsets = [0, 48], sizes = [2, 16], strides = [1, 1]} : vector<2x64xf32> to vector<2x16xf32>
    %742 = arith.negf %741 : vector<2x16xf32>
    %743 = math.exp %742 : vector<2x16xf32>
    %cst_390 = arith.constant 1.000000e+00 : f32
    %744 = vector.broadcast %cst_390 : f32 to vector<2x16xf32>
    %745 = arith.addf %744, %743 : vector<2x16xf32>
    %746 = arith.divf %744, %745 : vector<2x16xf32>
    %747 = arith.mulf %738, %718 : vector<2x16xf32>
    %748 = arith.mulf %732, %740 : vector<2x16xf32>
    %749 = arith.addf %747, %748 : vector<2x16xf32>
    %750 = math.tanh %749 : vector<2x16xf32>
    %751 = arith.mulf %746, %750 : vector<2x16xf32>
    %c1_391 = arith.constant 1 : index
    %c0_392 = arith.constant 0 : index
    %c0_393 = arith.constant 0 : index
    %752 = vector.load %arg49[%c1_391, %c0_392, %c0_393] : memref<2x2x16xf32, #tpu.memory_space<vmem>>, vector<1x2x16xf32>
    %753 = vector.shape_cast %752 : vector<1x2x16xf32> to vector<2x16xf32>
    %754 = vector.shape_cast %751 : vector<2x16xf32> to vector<1x2x16xf32>
    tpu.vector_store %arg49[%c1_391, %c0_392, %c0_393], %754 {strides = array<i32>} : memref<2x2x16xf32, #tpu.memory_space<vmem>>, vector<1x2x16xf32>,
    %c0_394 = arith.constant 0 : index
    %c0_395 = arith.constant 0 : index
    %c0_396 = arith.constant 0 : index
    %755 = vector.load %arg49[%c0_394, %c0_395, %c0_396] : memref<2x2x16xf32, #tpu.memory_space<vmem>>, vector<2x2x16xf32>
    %756 = vector.shape_cast %755 : vector<2x2x16xf32> to vector<4x16xf32>
    %c0_397 = arith.constant 0 : index
    %c0_398 = arith.constant 0 : index
    %757 = vector.load %arg28[%c0_397, %c0_398] : memref<16x64xf32, #tpu.memory_space<vmem>>, vector<16x64xf32>
    %cst_399 = arith.constant dense<0.000000e+00> : vector<4x64xf32>
    %758 = tpu.matmul %756, %757, %cst_399 {dimension_numbers = #tpu.dot_dimension_numbers<[1], [0], [0], [1], [0, 0, 1, 1], [], []>} : vector<4x16xf32>, vector<16x64xf32>, vector<4x64xf32> -> vector<4x64xf32>
    %c0_400 = arith.constant 0 : index
    %c0_401 = arith.constant 0 : index
    %759 = vector.load %arg30[%c0_400, %c0_401] : memref<1x64xf32, #tpu.memory_space<vmem>>, vector<1x64xf32>
    %760 = vector.broadcast %759 : vector<1x64xf32> to vector<4x64xf32>
    %761 = arith.addf %758, %760 : vector<4x64xf32>
    %c0_402 = arith.constant 0 : index
    %c0_403 = arith.constant 0 : index
    %762 = vector.load %arg29[%c0_402, %c0_403] : memref<16x64xf32, #tpu.memory_space<vmem>>, vector<16x64xf32>
    %cst_404 = arith.constant 0.000000e+00 : f32
    %763 = vector.broadcast %cst_404 : f32 to vector<2x16xf32>
    %cst_405 = arith.constant 0.000000e+00 : f32
    %764 = vector.broadcast %cst_405 : f32 to vector<2x16xf32>
    %765 = vector.extract_strided_slice %761 {offsets = [0, 0], sizes = [2, 64], strides = [1, 1]} : vector<4x64xf32> to vector<2x64xf32>
    %cst_406 = arith.constant dense<0.000000e+00> : vector<2x64xf32>
    %766 = tpu.matmul %763, %762, %cst_406 {dimension_numbers = #tpu.dot_dimension_numbers<[1], [0], [0], [1], [0, 0, 1, 1], [], []>} : vector<2x16xf32>, vector<16x64xf32>, vector<2x64xf32> -> vector<2x64xf32>
    %767 = arith.addf %765, %766 : vector<2x64xf32>
    %768 = vector.extract_strided_slice %767 {offsets = [0, 0], sizes = [2, 16], strides = [1, 1]} : vector<2x64xf32> to vector<2x16xf32>
    %769 = arith.negf %768 : vector<2x16xf32>
    %770 = math.exp %769 : vector<2x16xf32>
    %cst_407 = arith.constant 1.000000e+00 : f32
    %771 = vector.broadcast %cst_407 : f32 to vector<2x16xf32>
    %772 = arith.addf %771, %770 : vector<2x16xf32>
    %773 = arith.divf %771, %772 : vector<2x16xf32>
    %774 = vector.extract_strided_slice %767 {offsets = [0, 16], sizes = [2, 16], strides = [1, 1]} : vector<2x64xf32> to vector<2x16xf32>
    %775 = arith.negf %774 : vector<2x16xf32>
    %776 = math.exp %775 : vector<2x16xf32>
    %cst_408 = arith.constant 1.000000e+00 : f32
    %777 = vector.broadcast %cst_408 : f32 to vector<2x16xf32>
    %778 = arith.addf %777, %776 : vector<2x16xf32>
    %779 = arith.divf %777, %778 : vector<2x16xf32>
    %780 = vector.extract_strided_slice %767 {offsets = [0, 32], sizes = [2, 16], strides = [1, 1]} : vector<2x64xf32> to vector<2x16xf32>
    %781 = math.tanh %780 : vector<2x16xf32>
    %782 = vector.extract_strided_slice %767 {offsets = [0, 48], sizes = [2, 16], strides = [1, 1]} : vector<2x64xf32> to vector<2x16xf32>
    %783 = arith.negf %782 : vector<2x16xf32>
    %784 = math.exp %783 : vector<2x16xf32>
    %cst_409 = arith.constant 1.000000e+00 : f32
    %785 = vector.broadcast %cst_409 : f32 to vector<2x16xf32>
    %786 = arith.addf %785, %784 : vector<2x16xf32>
    %787 = arith.divf %785, %786 : vector<2x16xf32>
    %788 = arith.mulf %779, %764 : vector<2x16xf32>
    %789 = arith.mulf %773, %781 : vector<2x16xf32>
    %790 = arith.addf %788, %789 : vector<2x16xf32>
    %791 = math.tanh %790 : vector<2x16xf32>
    %792 = arith.mulf %787, %791 : vector<2x16xf32>
    %c0_410 = arith.constant 0 : index
    %c0_411 = arith.constant 0 : index
    %c0_412 = arith.constant 0 : index
    %793 = vector.load %arg50[%c0_410, %c0_411, %c0_412] : memref<2x2x16xf32, #tpu.memory_space<vmem>>, vector<1x2x16xf32>
    %794 = vector.shape_cast %793 : vector<1x2x16xf32> to vector<2x16xf32>
    %795 = vector.shape_cast %792 : vector<2x16xf32> to vector<1x2x16xf32>
    tpu.vector_store %arg50[%c0_410, %c0_411, %c0_412], %795 {strides = array<i32>} : memref<2x2x16xf32, #tpu.memory_space<vmem>>, vector<1x2x16xf32>,
    %796 = vector.extract_strided_slice %761 {offsets = [2, 0], sizes = [2, 64], strides = [1, 1]} : vector<4x64xf32> to vector<2x64xf32>
    %cst_413 = arith.constant dense<0.000000e+00> : vector<2x64xf32>
    %797 = tpu.matmul %792, %762, %cst_413 {dimension_numbers = #tpu.dot_dimension_numbers<[1], [0], [0], [1], [0, 0, 1, 1], [], []>} : vector<2x16xf32>, vector<16x64xf32>, vector<2x64xf32> -> vector<2x64xf32>
    %798 = arith.addf %796, %797 : vector<2x64xf32>
    %799 = vector.extract_strided_slice %798 {offsets = [0, 0], sizes = [2, 16], strides = [1, 1]} : vector<2x64xf32> to vector<2x16xf32>
    %800 = arith.negf %799 : vector<2x16xf32>
    %801 = math.exp %800 : vector<2x16xf32>
    %cst_414 = arith.constant 1.000000e+00 : f32
    %802 = vector.broadcast %cst_414 : f32 to vector<2x16xf32>
    %803 = arith.addf %802, %801 : vector<2x16xf32>
    %804 = arith.divf %802, %803 : vector<2x16xf32>
    %805 = vector.extract_strided_slice %798 {offsets = [0, 16], sizes = [2, 16], strides = [1, 1]} : vector<2x64xf32> to vector<2x16xf32>
    %806 = arith.negf %805 : vector<2x16xf32>
    %807 = math.exp %806 : vector<2x16xf32>
    %cst_415 = arith.constant 1.000000e+00 : f32
    %808 = vector.broadcast %cst_415 : f32 to vector<2x16xf32>
    %809 = arith.addf %808, %807 : vector<2x16xf32>
    %810 = arith.divf %808, %809 : vector<2x16xf32>
    %811 = vector.extract_strided_slice %798 {offsets = [0, 32], sizes = [2, 16], strides = [1, 1]} : vector<2x64xf32> to vector<2x16xf32>
    %812 = math.tanh %811 : vector<2x16xf32>
    %813 = vector.extract_strided_slice %798 {offsets = [0, 48], sizes = [2, 16], strides = [1, 1]} : vector<2x64xf32> to vector<2x16xf32>
    %814 = arith.negf %813 : vector<2x16xf32>
    %815 = math.exp %814 : vector<2x16xf32>
    %cst_416 = arith.constant 1.000000e+00 : f32
    %816 = vector.broadcast %cst_416 : f32 to vector<2x16xf32>
    %817 = arith.addf %816, %815 : vector<2x16xf32>
    %818 = arith.divf %816, %817 : vector<2x16xf32>
    %819 = arith.mulf %810, %790 : vector<2x16xf32>
    %820 = arith.mulf %804, %812 : vector<2x16xf32>
    %821 = arith.addf %819, %820 : vector<2x16xf32>
    %822 = math.tanh %821 : vector<2x16xf32>
    %823 = arith.mulf %818, %822 : vector<2x16xf32>
    %c1_417 = arith.constant 1 : index
    %c0_418 = arith.constant 0 : index
    %c0_419 = arith.constant 0 : index
    %824 = vector.load %arg50[%c1_417, %c0_418, %c0_419] : memref<2x2x16xf32, #tpu.memory_space<vmem>>, vector<1x2x16xf32>
    %825 = vector.shape_cast %824 : vector<1x2x16xf32> to vector<2x16xf32>
    %826 = vector.shape_cast %823 : vector<2x16xf32> to vector<1x2x16xf32>
    tpu.vector_store %arg50[%c1_417, %c0_418, %c0_419], %826 {strides = array<i32>} : memref<2x2x16xf32, #tpu.memory_space<vmem>>, vector<1x2x16xf32>,
    %c0_420 = arith.constant 0 : index
    %c0_421 = arith.constant 0 : index
    %c0_422 = arith.constant 0 : index
    %827 = vector.load %arg50[%c0_420, %c0_421, %c0_422] : memref<2x2x16xf32, #tpu.memory_space<vmem>>, vector<2x2x16xf32>
    %828 = vector.shape_cast %827 : vector<2x2x16xf32> to vector<4x16xf32>
    %c0_423 = arith.constant 0 : index
    %c0_424 = arith.constant 0 : index
    %829 = vector.load %arg31[%c0_423, %c0_424] : memref<16x64xf32, #tpu.memory_space<vmem>>, vector<16x64xf32>
    %cst_425 = arith.constant dense<0.000000e+00> : vector<4x64xf32>
    %830 = tpu.matmul %828, %829, %cst_425 {dimension_numbers = #tpu.dot_dimension_numbers<[1], [0], [0], [1], [0, 0, 1, 1], [], []>} : vector<4x16xf32>, vector<16x64xf32>, vector<4x64xf32> -> vector<4x64xf32>
    %c0_426 = arith.constant 0 : index
    %c0_427 = arith.constant 0 : index
    %831 = vector.load %arg33[%c0_426, %c0_427] : memref<1x64xf32, #tpu.memory_space<vmem>>, vector<1x64xf32>
    %832 = vector.broadcast %831 : vector<1x64xf32> to vector<4x64xf32>
    %833 = arith.addf %830, %832 : vector<4x64xf32>
    %c0_428 = arith.constant 0 : index
    %c0_429 = arith.constant 0 : index
    %834 = vector.load %arg32[%c0_428, %c0_429] : memref<16x64xf32, #tpu.memory_space<vmem>>, vector<16x64xf32>
    %cst_430 = arith.constant 0.000000e+00 : f32
    %835 = vector.broadcast %cst_430 : f32 to vector<2x16xf32>
    %cst_431 = arith.constant 0.000000e+00 : f32
    %836 = vector.broadcast %cst_431 : f32 to vector<2x16xf32>
    %837 = vector.extract_strided_slice %833 {offsets = [0, 0], sizes = [2, 64], strides = [1, 1]} : vector<4x64xf32> to vector<2x64xf32>
    %cst_432 = arith.constant dense<0.000000e+00> : vector<2x64xf32>
    %838 = tpu.matmul %835, %834, %cst_432 {dimension_numbers = #tpu.dot_dimension_numbers<[1], [0], [0], [1], [0, 0, 1, 1], [], []>} : vector<2x16xf32>, vector<16x64xf32>, vector<2x64xf32> -> vector<2x64xf32>
    %839 = arith.addf %837, %838 : vector<2x64xf32>
    %840 = vector.extract_strided_slice %839 {offsets = [0, 0], sizes = [2, 16], strides = [1, 1]} : vector<2x64xf32> to vector<2x16xf32>
    %841 = arith.negf %840 : vector<2x16xf32>
    %842 = math.exp %841 : vector<2x16xf32>
    %cst_433 = arith.constant 1.000000e+00 : f32
    %843 = vector.broadcast %cst_433 : f32 to vector<2x16xf32>
    %844 = arith.addf %843, %842 : vector<2x16xf32>
    %845 = arith.divf %843, %844 : vector<2x16xf32>
    %846 = vector.extract_strided_slice %839 {offsets = [0, 16], sizes = [2, 16], strides = [1, 1]} : vector<2x64xf32> to vector<2x16xf32>
    %847 = arith.negf %846 : vector<2x16xf32>
    %848 = math.exp %847 : vector<2x16xf32>
    %cst_434 = arith.constant 1.000000e+00 : f32
    %849 = vector.broadcast %cst_434 : f32 to vector<2x16xf32>
    %850 = arith.addf %849, %848 : vector<2x16xf32>
    %851 = arith.divf %849, %850 : vector<2x16xf32>
    %852 = vector.extract_strided_slice %839 {offsets = [0, 32], sizes = [2, 16], strides = [1, 1]} : vector<2x64xf32> to vector<2x16xf32>
    %853 = math.tanh %852 : vector<2x16xf32>
    %854 = vector.extract_strided_slice %839 {offsets = [0, 48], sizes = [2, 16], strides = [1, 1]} : vector<2x64xf32> to vector<2x16xf32>
    %855 = arith.negf %854 : vector<2x16xf32>
    %856 = math.exp %855 : vector<2x16xf32>
    %cst_435 = arith.constant 1.000000e+00 : f32
    %857 = vector.broadcast %cst_435 : f32 to vector<2x16xf32>
    %858 = arith.addf %857, %856 : vector<2x16xf32>
    %859 = arith.divf %857, %858 : vector<2x16xf32>
    %860 = arith.mulf %851, %836 : vector<2x16xf32>
    %861 = arith.mulf %845, %853 : vector<2x16xf32>
    %862 = arith.addf %860, %861 : vector<2x16xf32>
    %863 = math.tanh %862 : vector<2x16xf32>
    %864 = arith.mulf %859, %863 : vector<2x16xf32>
    %865 = vector.extract_strided_slice %833 {offsets = [2, 0], sizes = [2, 64], strides = [1, 1]} : vector<4x64xf32> to vector<2x64xf32>
    %cst_436 = arith.constant dense<0.000000e+00> : vector<2x64xf32>
    %866 = tpu.matmul %864, %834, %cst_436 {dimension_numbers = #tpu.dot_dimension_numbers<[1], [0], [0], [1], [0, 0, 1, 1], [], []>} : vector<2x16xf32>, vector<16x64xf32>, vector<2x64xf32> -> vector<2x64xf32>
    %867 = arith.addf %865, %866 : vector<2x64xf32>
    %868 = vector.extract_strided_slice %867 {offsets = [0, 0], sizes = [2, 16], strides = [1, 1]} : vector<2x64xf32> to vector<2x16xf32>
    %869 = arith.negf %868 : vector<2x16xf32>
    %870 = math.exp %869 : vector<2x16xf32>
    %cst_437 = arith.constant 1.000000e+00 : f32
    %871 = vector.broadcast %cst_437 : f32 to vector<2x16xf32>
    %872 = arith.addf %871, %870 : vector<2x16xf32>
    %873 = arith.divf %871, %872 : vector<2x16xf32>
    %874 = vector.extract_strided_slice %867 {offsets = [0, 16], sizes = [2, 16], strides = [1, 1]} : vector<2x64xf32> to vector<2x16xf32>
    %875 = arith.negf %874 : vector<2x16xf32>
    %876 = math.exp %875 : vector<2x16xf32>
    %cst_438 = arith.constant 1.000000e+00 : f32
    %877 = vector.broadcast %cst_438 : f32 to vector<2x16xf32>
    %878 = arith.addf %877, %876 : vector<2x16xf32>
    %879 = arith.divf %877, %878 : vector<2x16xf32>
    %880 = vector.extract_strided_slice %867 {offsets = [0, 32], sizes = [2, 16], strides = [1, 1]} : vector<2x64xf32> to vector<2x16xf32>
    %881 = math.tanh %880 : vector<2x16xf32>
    %882 = vector.extract_strided_slice %867 {offsets = [0, 48], sizes = [2, 16], strides = [1, 1]} : vector<2x64xf32> to vector<2x16xf32>
    %883 = arith.negf %882 : vector<2x16xf32>
    %884 = math.exp %883 : vector<2x16xf32>
    %cst_439 = arith.constant 1.000000e+00 : f32
    %885 = vector.broadcast %cst_439 : f32 to vector<2x16xf32>
    %886 = arith.addf %885, %884 : vector<2x16xf32>
    %887 = arith.divf %885, %886 : vector<2x16xf32>
    %888 = arith.mulf %879, %862 : vector<2x16xf32>
    %889 = arith.mulf %873, %881 : vector<2x16xf32>
    %890 = arith.addf %888, %889 : vector<2x16xf32>
    %891 = math.tanh %890 : vector<2x16xf32>
    %892 = arith.mulf %887, %891 : vector<2x16xf32>
    %c0_440 = arith.constant 0 : index
    %c0_441 = arith.constant 0 : index
    %893 = vector.load %arg34[%c0_440, %c0_441] : memref<16x128xf32, #tpu.memory_space<vmem>>, vector<16x128xf32>
    %cst_442 = arith.constant dense<0.000000e+00> : vector<2x128xf32>
    %894 = tpu.matmul %892, %893, %cst_442 {dimension_numbers = #tpu.dot_dimension_numbers<[1], [0], [0], [1], [0, 0, 1, 1], [], []>} : vector<2x16xf32>, vector<16x128xf32>, vector<2x128xf32> -> vector<2x128xf32>
    %c0_443 = arith.constant 0 : index
    %c0_444 = arith.constant 0 : index
    %895 = vector.load %arg35[%c0_443, %c0_444] : memref<1x128xf32, #tpu.memory_space<vmem>>, vector<1x128xf32>
    %896 = vector.broadcast %895 : vector<1x128xf32> to vector<2x128xf32>
    %897 = arith.addf %894, %896 : vector<2x128xf32>
    %cst_445 = arith.constant 0.000000e+00 : f32
    %898 = vector.broadcast %cst_445 : f32 to vector<2x128xf32>
    %899 = arith.maximumf %897, %898 : vector<2x128xf32>
    %c0_446 = arith.constant 0 : index
    %c0_447 = arith.constant 0 : index
    %900 = vector.load %arg36[%c0_446, %c0_447] : memref<128x3xf32, #tpu.memory_space<vmem>>, vector<128x3xf32>
    %cst_448 = arith.constant dense<0.000000e+00> : vector<2x3xf32>
    %901 = tpu.matmul %899, %900, %cst_448 {dimension_numbers = #tpu.dot_dimension_numbers<[1], [0], [0], [1], [0, 0, 1, 1], [], []>} : vector<2x128xf32>, vector<128x3xf32>, vector<2x3xf32> -> vector<2x3xf32>
    %c0_449 = arith.constant 0 : index
    %c0_450 = arith.constant 0 : index
    %902 = vector.load %arg37[%c0_449, %c0_450] : memref<1x3xf32, #tpu.memory_space<vmem>>, vector<1x3xf32>
    %903 = vector.broadcast %902 : vector<1x3xf32> to vector<2x3xf32>
    %904 = arith.addf %901, %903 : vector<2x3xf32>
    %c0_451 = arith.constant 0 : index
    %c0_452 = arith.constant 0 : index
    %905 = vector.load %arg38[%c0_451, %c0_452] : memref<2x3xf32, #tpu.memory_space<vmem>>, vector<2x3xf32>
    tpu.vector_store %arg38[%c0_451, %c0_452], %904 {strides = array<i32>} : memref<2x3xf32, #tpu.memory_space<vmem>>, vector<2x3xf32>,
    return
  }
}

</mosaic_0001>

<bundles_post_ra>
// kernel: hybrid_forward.1
= control target key start
LH: loop header
LB: loop body
LE: loop exit
PB: predicated region body
PF: predicated region fallthrough
CT: control target
= control target key end

     0   :  { %s6661_s6 = smov 1   ;;  %s6662_s10 = smov 2   ;;  %s7575_s0 = inlined_call_operand.smem [shape: u32[39], index: -1, kind: input, shape index: {}] }
   0x1   :  { %s6748_s5 = sld [smem:[%s7575_s0]]   ;;  %s6663_s14 = smov 3  }
   0x2   :  { %s6753_s9 = sld [smem:[%s7575_s0 + %s6661_s6]]   ;;  %s6664_s18 = smov 4  }
   0x3   :  { %s6758_s13 = sld [smem:[%s7575_s0 + %s6662_s10]]   ;;  %s6665_s22 = smov 5  }
   0x4   :  { %s6763_s17 = sld [smem:[%s7575_s0 + %s6663_s14]]   ;;  %s6666_s26 = smov 6  }
   0x5   :  { %s6768_s21 = sld [smem:[%s7575_s0 + %s6664_s18]]   ;;  %s6667_s30 = smov 7  }
   0x6   :  { %s6773_s25 = sld [smem:[%s7575_s0 + %s6665_s22]]   ;;  %s6668_s4 = smov 8  }
   0x7   :  { %7583 = sst [smem:[#allocation76_spill]] %s6748_s5  ;;  %s6669_s10 = smov 9  }
   0x8   :  { %s6778_s29 = sld [smem:[%s7575_s0 + %s6666_s26]]   ;;  %s6670_s15 = smov 10  }
   0x9   :  { %s6783_s3 = sld [smem:[%s7575_s0 + %s6667_s30]]   ;;  %s6671_s20 = smov 11  }
   0xa   :  { %7584 = sst [smem:[#allocation77_spill]] %s6763_s17  ;;  %s6672_s26 = smov 12  }
   0xb   :  { %7585 = sst [smem:[#allocation78_spill]] %s6768_s21  ;;  %s6673_s1 = smov 13  }
   0xc   :  { %7586 = sst [smem:[#allocation79_spill]] %s6773_s25  ;;  %s6674_s7 = smov 14  }
   0xd   :  { %s6788_s8 = sld [smem:[%s7575_s0 + %s6668_s4]]   ;;  %s6676_s22 = smov 16  }
   0xe   :  { %s6793_s14 = sld [smem:[%s7575_s0 + %s6669_s10]]   ;;  %s6677_s28 = smov 17  }
   0xf   :  { %7587 = sst [smem:[#allocation80_spill]] %s6783_s3 }
  0x10   :  { %s6798_s19 = sld [smem:[%s7575_s0 + %s6670_s15]]   ;;  %s6675_s15 = smov 15  }
  0x11   :  { %s6803_s24 = sld [smem:[%s7575_s0 + %s6671_s20]]  }
  0x12   :  { %s6808_s30 = sld [smem:[%s7575_s0 + %s6672_s26]]  }
  0x13   :  { %7588 = sst [smem:[#allocation81_spill]] %s6788_s8 }
  0x14   :  { %s6813_s6 = sld [smem:[%s7575_s0 + %s6673_s1]]  }
  0x15   :  { %s6818_s12 = sld [smem:[%s7575_s0 + %s6674_s7]]   ;;  %s6678_s7 = smov 18  }
  0x16   :  { %7589 = sst [smem:[#allocation82_spill]] %s6798_s19 }
  0x17   :  { %s6823_s20 = sld [smem:[%s7575_s0 + %s6675_s15]]   ;;  %s6679_s15 = smov 19  }
  0x18   :  { %7590 = sst [smem:[#allocation83_spill]] %s6808_s30 }
  0x19   :  { %s6828_s27 = sld [smem:[%s7575_s0 + %s6676_s22]]   ;;  %s6680_s22 = smov 20  }
  0x1a   :  { %s6833_s4 = sld [smem:[%s7575_s0 + %s6677_s28]]   ;;  %s6681_s28 = smov 21  }
  0x1b   :  { %7591 = sst [smem:[#allocation84_spill]] %s6818_s12 }
  0x1c   :  { %s6838_s3 = sld [smem:[%s7575_s0 + %s6678_s7]]   ;;  %s6682_s7 = smov 22  }
  0x1d   :  { %s6843_s25 = sld [smem:[%s7575_s0 + %s6679_s15]]   ;;  %s6683_s15 = smov 23  }
  0x1e   :  { %s6848_s17 = sld [smem:[%s7575_s0 + %s6680_s22]]   ;;  %s6684_s22 = smov 24  }
  0x1f   :  { %7592 = sst [smem:[#allocation85_spill]] %s6828_s27 }
  0x20   :  { %7593 = sst [smem:[#allocation86_spill]] %s6833_s4 }
  0x21   :  { %s6853_s4 = sld [smem:[%s7575_s0 + %s6681_s28]]   ;;  %s6685_s28 = smov 25  }
  0x22   :  { %s6858_s5 = sld [smem:[%s7575_s0 + %s6682_s7]]   ;;  %s6686_s7 = smov 26  }
  0x23   :  { %7594 = sst [smem:[#allocation87_spill]] %s6843_s25 }
  0x24   :  { %s6863_s25 = sld [smem:[%s7575_s0 + %s6683_s15]]   ;;  %s6687_s15 = smov 27  }
  0x25   :  { %s6868_s27 = sld [smem:[%s7575_s0 + %s6684_s22]]   ;;  %s6688_s22 = smov 28  }
  0x26   :  { %s6878_s12 = sld [smem:[%s7575_s0 + %s6686_s7]]   ;;  %s6690_s7 = smov 30  }
  0x27   :  { %7595 = sst [smem:[#allocation88_spill]] %s6853_s4 }
  0x28   :  { %s6873_s4 = sld [smem:[%s7575_s0 + %s6685_s28]]   ;;  %s6689_s28 = smov 29  }
  0x29   :  { %s6888_s30 = sld [smem:[%s7575_s0 + %s6688_s22]]   ;;  %s6692_s22 = smov 32  }
  0x2a   :  { %7596 = sst [smem:[#allocation89_spill]] %s6863_s25 }
  0x2b   :  { %s6883_s25 = sld [smem:[%s7575_s0 + %s6687_s15]]   ;;  %s6691_s15 = smov 31  }
  0x2c   :  { %7598 = sst [smem:[#allocation91_spill]] %s6878_s12 }
  0x2d   :  { %s6898_s12 = sld [smem:[%s7575_s0 + %s6690_s7]]   ;;  %s6694_s7 = smov 34  }
  0x2e   :  { %7597 = sst [smem:[#allocation90_spill]] %s6873_s4 }
  0x2f   :  { %7599 = sst [smem:[#allocation92_spill]] %s6888_s30 }
  0x30   :  { %s6893_s4 = sld [smem:[%s7575_s0 + %s6689_s28]]   ;;  %s6693_s28 = smov 33  }
  0x31   :  { %s6903_s19 = sld [smem:[%s7575_s0 + %s6691_s15]]   ;;  %s6695_s15 = smov 35  }
  0x32   :  { %s6908_s30 = sld [smem:[%s7575_s0 + %s6692_s22]]   ;;  %s6696_s22 = smov 36  }
  0x33   :  { %s6918_s8 = sld [smem:[%s7575_s0 + %s6694_s7]]   ;;  %s6698_s7 = smov 38  }
  0x34   :  { %s6928_s21 = sld [smem:[%s7575_s0 + %s6696_s22]]  }
  0x36   :  { %7600 = sst [smem:[#allocation93_spill]] %s6893_s4 }
  0x37   :  { %7601 = sst [smem:[#allocation94_spill]] %s6903_s19 }
  0x38   :  { %s6913_s4 = sld [smem:[%s7575_s0 + %s6693_s28]]   ;;  %s6697_s28 = smov 37  }
  0x39   :  { %7603 = sst [smem:[#allocation96_spill]] %s6918_s8 }
  0x3a   :  { %s6923_s19 = sld [smem:[%s7575_s0 + %s6695_s15]]  }
  0x3b   :  { %s6938_s8 = sld [smem:[%s7575_s0 + %s6698_s7]]  }
  0x3e   :  { %7602 = sst [smem:[#allocation95_spill]] %s6913_s4 }
  0x3f   :  { %s6933_s4 = sld [smem:[%s7575_s0 + %s6697_s28]]  }
  0x40   :  { %82 = vsyncpa [#allocation15], 0 }
  0x41   :  { %83 = vsyncpa [#allocation18], 0 }
  0x42   :  { %84 = vsyncpa [#allocation21], 0 }
  0x43   :  { %85 = vsyncpa [#allocation24], 0 }
  0x44   :  { %86 = vsyncpa [#allocation27], 0 }
  0x45   :  { %87 = vsyncpa [#allocation30], 0 }
  0x46   :  { %88 = vsyncpa [#allocation33], 0 }
  0x47   :  { %89 = vsyncpa [#allocation36], 0 }
  0x48   :  { %90 = vsyncpa [#allocation39], 0 }
  0x49   :  { %91 = vsyncpa [#allocation42], 0 }
  0x4a   :  { %92 = vsyncpa [#allocation45], 0 }
  0x4b   :  { %93 = vsyncpa [#allocation48], 0 }
  0x4c   :  { %94 = vsyncpa [#allocation51], 0 }
  0x4d   :  { %95 = vsyncpa [#allocation54], 0 }
  0x4e   :  { %96 = vsyncpa [#allocation57], 0 }
  0x4f   :  { %97 = vsyncpa [#allocation16], 0  ;;  %s6699_s15 = smov [#allocation17]   ;;  %s6700_s0 = smov [#allocation20]  }
  0x50   :  { %s118_s16 = sshll.u32 %s6699_s15, 4  ;;  %s142_s18 = sshll.u32 %s6700_s0, 4  ;;  %s119_s16 = int_to_ptr.vmem [resolvable:$true] %s118_s16  ;;  %s143_s18 = int_to_ptr.vmem [resolvable:$true] %s142_s18 }
  0x51   :  { %s6037_s22 = scalar_lea.vmem %s119_s16, 16  ;;  %s6041_s23 = scalar_lea.vmem %s119_s16, 32 }
  0x52   :  { %p6038_p0 = scmp.ne.s32.totalorder %s119_s16, %s6037_s22  ;;  %p6042_p1 = scmp.lt.s32.totalorder %s119_s16, %s119_s16 }
  0x53   :  { %p6043_p2 = scmp.lt.s32.totalorder %s6041_s23, %s6037_s22 }
  0x55   :  { %p6044_p3 = por %p6043_p2, %p6042_p1 }
  0x57   :  { %p6045_p4 = pnand %p6044_p3, %p6038_p0 }
  0x59   :  { %6048 = shalt.err (!%p6045_p4)
}
  0x5a   :  { %121 = dma.hbm_to_vmem [thread:$0]  %s6758_s13, 16, %s119_s16, [#allocation18]  }
  0x5b   :  { %s6057_s26 = scalar_lea.vmem %s143_s18, 16  ;;  %s6061_s28 = scalar_lea.vmem %s143_s18, 32 }
  0x5c   :  { %p6058_p5 = scmp.ne.s32.totalorder %s143_s18, %s6057_s26  ;;  %p6062_p6 = scmp.lt.s32.totalorder %s143_s18, %s143_s18 }
  0x5d   :  { %p6063_p7 = scmp.lt.s32.totalorder %s6061_s28, %s6057_s26 }
  0x5f   :  { %p6064_p8 = por %p6063_p7, %p6062_p6 }
  0x61   :  { %p6065_p9 = pnand %p6064_p8, %p6058_p5 }
  0x63   :  { %6068 = shalt.err (!%p6065_p9)
}
  0x64   :  { %145 = dma.hbm_to_vmem [thread:$0]  %s6778_s29, 16, %s143_s18, [#allocation21]  }
  0x65   :  { %s6701_s1 = smov [#allocation23]  }
  0x66   :  { %s166_s2 = sshll.u32 %s6701_s1, 4  ;;  %s167_s2 = int_to_ptr.vmem [resolvable:$true] %s166_s2 }
  0x67   :  { %s6077_s7 = scalar_lea.vmem %s167_s2, 16  ;;  %s6081_s10 = scalar_lea.vmem %s167_s2, 32 }
  0x68   :  { %p6078_p10 = scmp.ne.s32.totalorder %s167_s2, %s6077_s7  ;;  %p6082_p11 = scmp.lt.s32.totalorder %s167_s2, %s167_s2 }
  0x69   :  { %p6083_p12 = scmp.lt.s32.totalorder %s6081_s10, %s6077_s7 }
  0x6b   :  { %p6084_p13 = por %p6083_p12, %p6082_p11 }
  0x6d   :  { %p6085_p0 = pnand %p6084_p13, %p6078_p10 }
  0x6f   :  { %6088 = shalt.err (!%p6085_p0)
}
  0x70   :  { %169 = dma.hbm_to_vmem [thread:$0]  %s6793_s14, 16, %s167_s2, [#allocation24]  }
  0x71   :  { %s6702_s13 = smov [#allocation26]   ;;  %s6703_s15 = smov [#allocation29]  }
  0x72   :  { %s187_s11 = sshll.u32 %s6702_s13, 4  ;;  %s209_s16 = sshll.u32 %s6703_s15, 4  ;;  %s188_s11 = int_to_ptr.vmem [resolvable:$true] %s187_s11  ;;  %s210_s16 = int_to_ptr.vmem [resolvable:$true] %s209_s16 }
  0x73   :  { %s6097_s0 = scalar_lea.vmem %s188_s11, 256  ;;  %p6102_p2 = scmp.lt.s32.totalorder %s188_s11, %s188_s11 }
  0x74   :  { %p6098_p1 = scmp.ne.s32.totalorder %s188_s11, %s6097_s0  ;;  %p6103_p3 = scmp.lt.s32.totalorder %s6097_s0, %s6097_s0 }
  0x76   :  { %p6104_p4 = por %p6103_p3, %p6102_p2 }
  0x78   :  { %p6105_p5 = pnand %p6104_p4, %p6098_p1 }
  0x7a   :  { %6108 = shalt.err (!%p6105_p5)
}
  0x7b   :  { %s6704_s29 = smov 128   ;;  %s6705_s18 = smov 8  }
  0x7c   :  { %193 = dma.hbm_to_vmem [thread:$0]  %s6803_s24, 256, %s188_s11, [#allocation27], %s6704_s29, %s6704_s29, %s6705_s18  }
  0x7d   :  { %s6117_s14 = scalar_lea.vmem %s210_s16, 256  ;;  %p6122_p7 = scmp.lt.s32.totalorder %s210_s16, %s210_s16 }
  0x7e   :  { %p6118_p6 = scmp.ne.s32.totalorder %s210_s16, %s6117_s14  ;;  %p6123_p8 = scmp.lt.s32.totalorder %s6117_s14, %s6117_s14 }
  0x80   :  { %p6124_p9 = por %p6123_p8, %p6122_p7 }
  0x82   :  { %p6125_p10 = pnand %p6124_p9, %p6118_p6 }
  0x84   :  { %6128 = shalt.err (!%p6125_p10)
}
  0x85   :  { %215 = dma.hbm_to_vmem [thread:$0]  %s6813_s6, 256, %s210_s16, [#allocation30], %s6704_s29, %s6704_s29, %s6705_s18  }
  0x86   :  { %s6706_s22 = smov [#allocation32]   ;;  %s6707_s26 = smov [#allocation35]  }
  0x87   :  { %s234_s23 = sshll.u32 %s6706_s22, 4  ;;  %s258_s28 = sshll.u32 %s6707_s26, 4  ;;  %s235_s23 = int_to_ptr.vmem [resolvable:$true] %s234_s23  ;;  %s259_s28 = int_to_ptr.vmem [resolvable:$true] %s258_s28 }
  0x88   :  { %s6137_s1 = scalar_lea.vmem %s235_s23, 16  ;;  %s6141_s24 = scalar_lea.vmem %s235_s23, 32 }
  0x89   :  { %p6138_p11 = scmp.ne.s32.totalorder %s235_s23, %s6137_s1  ;;  %p6142_p12 = scmp.lt.s32.totalorder %s235_s23, %s235_s23 }
  0x8a   :  { %p6143_p13 = scmp.lt.s32.totalorder %s6141_s24, %s6137_s1 }
  0x8c   :  { %p6144_p0 = por %p6143_p13, %p6142_p12 }
  0x8e   :  { %p6145_p1 = pnand %p6144_p0, %p6138_p11 }
  0x90   :  { %6148 = shalt.err (!%p6145_p1)
}
  0x91   :  { %237 = dma.hbm_to_vmem [thread:$0]  %s6823_s20, 16, %s235_s23, [#allocation33]  }
  0x92   :  { %s6157_s2 = scalar_lea.vmem %s259_s28, 16  ;;  %s6161_s7 = scalar_lea.vmem %s259_s28, 32 }
  0x93   :  { %p6158_p2 = scmp.ne.s32.totalorder %s259_s28, %s6157_s2  ;;  %p6162_p3 = scmp.lt.s32.totalorder %s259_s28, %s259_s28 }
  0x94   :  { %p6163_p4 = scmp.lt.s32.totalorder %s6161_s7, %s6157_s2 }
  0x96   :  { %p6164_p5 = por %p6163_p4, %p6162_p3 }
  0x98   :  { %p6165_p6 = pnand %p6164_p5, %p6158_p2 }
  0x9a   :  { %6168 = shalt.err (!%p6165_p6)
}
  0x9b   :  { %261 = dma.hbm_to_vmem [thread:$0]  %s6838_s3, 16, %s259_s28, [#allocation36]  }
  0x9c   :  { %s6708_s6 = smov [#allocation38]   ;;  %s6709_s13 = smov [#allocation41]  }
  0x9d   :  { %s279_s10 = sshll.u32 %s6708_s6, 4  ;;  %s301_s11 = sshll.u32 %s6709_s13, 4  ;;  %s280_s10 = int_to_ptr.vmem [resolvable:$true] %s279_s10  ;;  %s302_s11 = int_to_ptr.vmem [resolvable:$true] %s301_s11 }
  0x9e   :  { %s6177_s15 = scalar_lea.vmem %s280_s10, 512  ;;  %p6182_p8 = scmp.lt.s32.totalorder %s280_s10, %s280_s10 }
  0x9f   :  { %p6178_p7 = scmp.ne.s32.totalorder %s280_s10, %s6177_s15  ;;  %p6183_p9 = scmp.lt.s32.totalorder %s6177_s15, %s6177_s15 }
  0xa1   :  { %p6184_p10 = por %p6183_p9, %p6182_p8 }
  0xa3   :  { %p6185_p11 = pnand %p6184_p10, %p6178_p7 }
  0xa5   :  { %6188 = shalt.err (!%p6185_p11)
}
  0xa6   :  { %285 = dma.hbm_to_vmem [thread:$0]  %s6848_s17, 512, %s280_s10, [#allocation39], %s6704_s29, %s6704_s29, %s6705_s18  }
  0xa7   :  { %s6197_s20 = scalar_lea.vmem %s302_s11, 512  ;;  %p6202_p13 = scmp.lt.s32.totalorder %s302_s11, %s302_s11 }
  0xa8   :  { %p6198_p12 = scmp.ne.s32.totalorder %s302_s11, %s6197_s20  ;;  %p6203_p0 = scmp.lt.s32.totalorder %s6197_s20, %s6197_s20 }
  0xaa   :  { %p6204_p1 = por %p6203_p0, %p6202_p13 }
  0xac   :  { %p6205_p2 = pnand %p6204_p1, %p6198_p12 }
  0xae   :  { %6208 = shalt.err (!%p6205_p2)
}
  0xaf   :  { %307 = dma.hbm_to_vmem [thread:$0]  %s6858_s5, 512, %s302_s11, [#allocation42], %s6704_s29, %s6704_s29, %s6705_s18  }
  0xb0   :  { %s6710_s3 = smov [#allocation44]   ;;  %s6711_s0 = smov [#allocation47]  }
  0xb1   :  { %s326_s16 = sshll.u32 %s6710_s3, 4  ;;  %s350_s14 = sshll.u32 %s6711_s0, 4  ;;  %s327_s16 = int_to_ptr.vmem [resolvable:$true] %s326_s16  ;;  %s351_s14 = int_to_ptr.vmem [resolvable:$true] %s350_s14 }
  0xb2   :  { %s6217_s22 = scalar_lea.vmem %s327_s16, 16  ;;  %s6221_s17 = scalar_lea.vmem %s327_s16, 32 }
  0xb3   :  { %p6218_p3 = scmp.ne.s32.totalorder %s327_s16, %s6217_s22  ;;  %p6222_p4 = scmp.lt.s32.totalorder %s327_s16, %s327_s16 }
  0xb4   :  { %p6223_p5 = scmp.lt.s32.totalorder %s6221_s17, %s6217_s22 }
  0xb6   :  { %p6224_p6 = por %p6223_p5, %p6222_p4 }
  0xb8   :  { %p6225_p7 = pnand %p6224_p6, %p6218_p3 }
  0xba   :  { %6228 = shalt.err (!%p6225_p7)
}
  0xbb   :  { %329 = dma.hbm_to_vmem [thread:$0]  %s6868_s27, 16, %s327_s16, [#allocation45]  }
  0xbc   :  { %s6237_s23 = scalar_lea.vmem %s351_s14, 16  ;;  %s6241_s26 = scalar_lea.vmem %s351_s14, 32 }
  0xbd   :  { %p6238_p8 = scmp.ne.s32.totalorder %s351_s14, %s6237_s23  ;;  %p6242_p9 = scmp.lt.s32.totalorder %s351_s14, %s351_s14 }
  0xbe   :  { %p6243_p10 = scmp.lt.s32.totalorder %s6241_s26, %s6237_s23 }
  0xc0   :  { %p6244_p11 = por %p6243_p10, %p6242_p9 }
  0xc2   :  { %p6245_p12 = pnand %p6244_p11, %p6238_p8 }
  0xc4   :  { %6248 = shalt.err (!%p6245_p12)
}
  0xc5   :  { %353 = dma.hbm_to_vmem [thread:$0]  %s6883_s25, 16, %s351_s14, [#allocation48]  }
  0xc6   :  { %s6712_s5 = smov [#allocation50]   ;;  %s6713_s1 = smov [#allocation53]  }
  0xc7   :  { %s374_s28 = sshll.u32 %s6712_s5, 4  ;;  %s395_s24 = sshll.u32 %s6713_s1, 4  ;;  %s375_s28 = int_to_ptr.vmem [resolvable:$true] %s374_s28  ;;  %s396_s24 = int_to_ptr.vmem [resolvable:$true] %s395_s24 }
  0xc8   :  { %s6257_s2 = scalar_lea.vmem %s375_s28, 16  ;;  %s6261_s7 = scalar_lea.vmem %s375_s28, 32 }
  0xc9   :  { %p6258_p13 = scmp.ne.s32.totalorder %s375_s28, %s6257_s2  ;;  %p6262_p0 = scmp.lt.s32.totalorder %s375_s28, %s375_s28 }
  0xca   :  { %p6263_p1 = scmp.lt.s32.totalorder %s6261_s7, %s6257_s2 }
  0xcc   :  { %p6264_p2 = por %p6263_p1, %p6262_p0 }
  0xce   :  { %p6265_p3 = pnand %p6264_p2, %p6258_p13 }
  0xd0   :  { %6268 = shalt.err (!%p6265_p3)
}
  0xd1   :  { %377 = dma.hbm_to_vmem [thread:$0]  %s6898_s12, 16, %s375_s28, [#allocation51]  }
  0xd2   :  { %s6277_s27 = scalar_lea.vmem %s396_s24, 256  ;;  %p6282_p5 = scmp.lt.s32.totalorder %s396_s24, %s396_s24 }
  0xd3   :  { %p6278_p4 = scmp.ne.s32.totalorder %s396_s24, %s6277_s27  ;;  %p6283_p6 = scmp.lt.s32.totalorder %s6277_s27, %s6277_s27 }
  0xd5   :  { %p6284_p7 = por %p6283_p6, %p6282_p5 }
  0xd7   :  { %p6285_p8 = pnand %p6284_p7, %p6278_p4 }
  0xd9   :  { %6288 = shalt.err (!%p6285_p8)
}
  0xda   :  { %401 = dma.hbm_to_vmem [thread:$0]  %s6908_s30, 256, %s396_s24, [#allocation54], %s6704_s29, %s6704_s29, %s6705_s18  }
  0xdb   :  { %s6714_s25 = smov [#allocation56]   ;;  %s6715_s10 = smov [#allocation14]  }
  0xdc   :  { %s422_s6 = sshll.u32 %s6714_s25, 4  ;;  %s105_s13 = sshll.u32 %s6715_s10, 4  ;;  %s423_s6 = int_to_ptr.vmem [resolvable:$true] %s422_s6  ;;  %s106_s13 = int_to_ptr.vmem [resolvable:$true] %s105_s13 }
  0xdd   :  { %s6297_s11 = scalar_lea.vmem %s423_s6, 16  ;;  %s6301_s12 = scalar_lea.vmem %s423_s6, 32 }
  0xde   :  { %p6298_p9 = scmp.ne.s32.totalorder %s423_s6, %s6297_s11  ;;  %p6302_p10 = scmp.lt.s32.totalorder %s423_s6, %s423_s6 }
  0xdf   :  { %p6303_p11 = scmp.lt.s32.totalorder %s6301_s12, %s6297_s11 }
  0xe1   :  { %p6304_p12 = por %p6303_p11, %p6302_p10 }
  0xe3   :  { %p6305_p13 = pnand %p6304_p12, %p6298_p9 }
  0xe5   :  { %6308 = shalt.err (!%p6305_p13)
}
  0xe6   :  { %425 = dma.hbm_to_vmem [thread:$0]  %s6923_s19, 16, %s423_s6, [#allocation57]  }
  0xe7   :  { %s6317_s15 = scalar_lea.vmem %s106_s13, 192  ;;  %p6322_p1 = scmp.lt.s32.totalorder %s106_s13, %s106_s13 }
  0xe8   :  { %p6318_p0 = scmp.ne.s32.totalorder %s106_s13, %s6317_s15  ;;  %p6323_p2 = scmp.lt.s32.totalorder %s6317_s15, %s6317_s15 }
  0xea   :  { %p6324_p3 = por %p6323_p2, %p6322_p1 }
  0xec   :  { %p6325_p4 = pnand %p6324_p3, %p6318_p0 }
  0xee   :  { %6328 = shalt.err (!%p6325_p4)
}
  0xef   :  { %s6716_s30 = smov 64   ;;  %s6717_s20 = smov 4  }
  0xf0   :  { %111 = dma.hbm_to_vmem [thread:$0]  %s6753_s9, 192, %s106_s13, [#allocation15], %s6716_s30, %s6716_s30, %s6717_s20  }
  0xf1   :  { %s6718_s3 = smov [#allocation19]   ;;  %s6719_s0 = smov [#allocation22]  }
  0xf2   :  { %s130_s16 = sshll.u32 %s6718_s3, 4  ;;  %s153_s14 = sshll.u32 %s6719_s0, 4  ;;  %s131_s16 = int_to_ptr.vmem [resolvable:$true] %s130_s16  ;;  %s154_s14 = int_to_ptr.vmem [resolvable:$true] %s153_s14 }
  0xf3   :  { %s6337_s19 = scalar_lea.vmem %s131_s16, 16  ;;  %s6341_s22 = scalar_lea.vmem %s131_s16, 32 }
  0xf4   :  { %p6338_p5 = scmp.ne.s32.totalorder %s131_s16, %s6337_s19  ;;  %p6342_p6 = scmp.lt.s32.totalorder %s131_s16, %s131_s16 }
  0xf5   :  { %p6343_p7 = scmp.lt.s32.totalorder %s6341_s22, %s6337_s19 }
  0xf7   :  { %p6344_p8 = por %p6343_p7, %p6342_p6 }
  0xf9   :  { %p6345_p9 = pnand %p6344_p8, %p6338_p5 }
  0xfb   :  { %6348 = shalt.err (!%p6345_p9)
}
  0xfc   :  { %s7604_s17 = sld [smem:[#allocation78_spill]]  ;;  %s6357_s23 = scalar_lea.vmem %s154_s14, 256 }
  0xfd   :  { %p6358_p10 = scmp.ne.s32.totalorder %s154_s14, %s6357_s23  ;;  %p6362_p11 = scmp.lt.s32.totalorder %s154_s14, %s154_s14 }
  0xfe   :  { %p6363_p12 = scmp.lt.s32.totalorder %s6357_s23, %s6357_s23 }
 0x100   :  { %p6364_p13 = por %p6363_p12, %p6362_p11 }
 0x102   :  { %133 = dma.hbm_to_vmem [thread:$0]  %s7604_s17, 16, %s131_s16, [#allocation18]  }
 0x103   :  { %p6365_p0 = pnand %p6364_p13, %p6358_p10 }
 0x105   :  { %6368 = shalt.err (!%p6365_p0)
}
 0x106   :  { %s7605_s9 = sld [smem:[#allocation81_spill]]  ;;  %s6720_s26 = smov [#allocation25]  }
 0x107   :  { %s175_s5 = sshll.u32 %s6720_s26, 4  ;;  %s6721_s28 = smov [#allocation28]   ;;  %s176_s5 = int_to_ptr.vmem [resolvable:$true] %s175_s5 }
 0x108   :  { %s200_s1 = sshll.u32 %s6721_s28, 4  ;;  %s6377_s24 = scalar_lea.vmem %s176_s5, 256  ;;  %s201_s1 = int_to_ptr.vmem [resolvable:$true] %s200_s1 }
 0x109   :  { %p6378_p1 = scmp.ne.s32.totalorder %s176_s5, %s6377_s24  ;;  %p6382_p2 = scmp.lt.s32.totalorder %s176_s5, %s176_s5 }
 0x10a   :  { %p6383_p3 = scmp.lt.s32.totalorder %s6377_s24, %s6377_s24 }
 0x10c   :  { %159 = dma.hbm_to_vmem [thread:$0]  %s7605_s9, 256, %s154_s14, [#allocation21], %s6704_s29, %s6704_s29, %s6705_s18  }
 0x10d   :  { %p6384_p4 = por %p6383_p3, %p6382_p2 }
 0x10f   :  { %p6385_p5 = pnand %p6384_p4, %p6378_p1 }
 0x111   :  { %6388 = shalt.err (!%p6385_p5)
}
 0x112   :  { %s7606_s2 = sld [smem:[#allocation82_spill]]  ;;  %s6397_s7 = scalar_lea.vmem %s201_s1, 16 }
 0x113   :  { %p6398_p6 = scmp.ne.s32.totalorder %s201_s1, %s6397_s7  ;;  %s6401_s27 = scalar_lea.vmem %s201_s1, 32 }
 0x114   :  { %p6402_p7 = scmp.lt.s32.totalorder %s201_s1, %s201_s1  ;;  %p6403_p8 = scmp.lt.s32.totalorder %s6401_s27, %s6397_s7 }
 0x116   :  { %p6404_p9 = por %p6403_p8, %p6402_p7 }
 0x118   :  { %181 = dma.hbm_to_vmem [thread:$0]  %s7606_s2, 256, %s176_s5, [#allocation24], %s6704_s29, %s6704_s29, %s6705_s18  }
 0x119   :  { %p6405_p10 = pnand %p6404_p9, %p6398_p6 }
 0x11b   :  { %6408 = shalt.err (!%p6405_p10)
}
 0x11c   :  { %s7607_s25 = sld [smem:[#allocation83_spill]]  ;;  %s6722_s6 = smov [#allocation31]  }
 0x11d   :  { %s221_s10 = sshll.u32 %s6722_s6, 4  ;;  %s6723_s13 = smov [#allocation34]   ;;  %s222_s10 = int_to_ptr.vmem [resolvable:$true] %s221_s10 }
 0x11e   :  { %s243_s11 = sshll.u32 %s6723_s13, 4  ;;  %s6417_s12 = scalar_lea.vmem %s222_s10, 256  ;;  %s244_s11 = int_to_ptr.vmem [resolvable:$true] %s243_s11 }
 0x11f   :  { %p6418_p11 = scmp.ne.s32.totalorder %s222_s10, %s6417_s12  ;;  %p6422_p12 = scmp.lt.s32.totalorder %s222_s10, %s222_s10 }
 0x120   :  { %p6423_p13 = scmp.lt.s32.totalorder %s6417_s12, %s6417_s12 }
 0x122   :  { %203 = dma.hbm_to_vmem [thread:$0]  %s7607_s25, 16, %s201_s1, [#allocation27]  }
 0x123   :  { %p6424_p0 = por %p6423_p13, %p6422_p12 }
 0x125   :  { %p6425_p1 = pnand %p6424_p0, %p6418_p11 }
 0x127   :  { %6428 = shalt.err (!%p6425_p1)
}
 0x128   :  { %s7608_s15 = sld [smem:[#allocation84_spill]]  ;;  %s6437_s20 = scalar_lea.vmem %s244_s11, 256 }
 0x129   :  { %p6438_p2 = scmp.ne.s32.totalorder %s244_s11, %s6437_s20  ;;  %p6442_p3 = scmp.lt.s32.totalorder %s244_s11, %s244_s11 }
 0x12a   :  { %p6443_p4 = scmp.lt.s32.totalorder %s6437_s20, %s6437_s20 }
 0x12c   :  { %p6444_p5 = por %p6443_p4, %p6442_p3 }
 0x12e   :  { %227 = dma.hbm_to_vmem [thread:$0]  %s7608_s15, 256, %s222_s10, [#allocation30], %s6704_s29, %s6704_s29, %s6705_s18  }
 0x12f   :  { %p6445_p6 = pnand %p6444_p5, %p6438_p2 }
 0x131   :  { %6448 = shalt.err (!%p6445_p6)
}
 0x132   :  { %s7609_s3 = sld [smem:[#allocation85_spill]]  ;;  %s6724_s16 = smov [#allocation37]  }
 0x133   :  { %s267_s0 = sshll.u32 %s6724_s16, 4  ;;  %s6725_s14 = smov [#allocation40]   ;;  %s268_s0 = int_to_ptr.vmem [resolvable:$true] %s267_s0 }
 0x134   :  { %s292_s19 = sshll.u32 %s6725_s14, 4  ;;  %s6457_s22 = scalar_lea.vmem %s268_s0, 512  ;;  %s293_s19 = int_to_ptr.vmem [resolvable:$true] %s292_s19 }
 0x135   :  { %p6458_p7 = scmp.ne.s32.totalorder %s268_s0, %s6457_s22  ;;  %p6462_p8 = scmp.lt.s32.totalorder %s268_s0, %s268_s0 }
 0x136   :  { %p6463_p9 = scmp.lt.s32.totalorder %s6457_s22, %s6457_s22 }
 0x138   :  { %249 = dma.hbm_to_vmem [thread:$0]  %s7609_s3, 256, %s244_s11, [#allocation33], %s6704_s29, %s6704_s29, %s6705_s18  }
 0x139   :  { %p6464_p10 = por %p6463_p9, %p6462_p8 }
 0x13b   :  { %p6465_p11 = pnand %p6464_p10, %p6458_p7 }
 0x13d   :  { %6468 = shalt.err (!%p6465_p11)
}
 0x13e   :  { %s7610_s17 = sld [smem:[#allocation87_spill]]  ;;  %s6477_s23 = scalar_lea.vmem %s293_s19, 16 }
 0x13f   :  { %p6478_p12 = scmp.ne.s32.totalorder %s293_s19, %s6477_s23  ;;  %s6481_s9 = scalar_lea.vmem %s293_s19, 32 }
 0x140   :  { %p6482_p13 = scmp.lt.s32.totalorder %s293_s19, %s293_s19  ;;  %p6483_p0 = scmp.lt.s32.totalorder %s6481_s9, %s6477_s23 }
 0x142   :  { %p6484_p1 = por %p6483_p0, %p6482_p13 }
 0x144   :  { %273 = dma.hbm_to_vmem [thread:$0]  %s7610_s17, 512, %s268_s0, [#allocation36], %s6704_s29, %s6704_s29, %s6705_s18  }
 0x145   :  { %p6485_p2 = pnand %p6484_p1, %p6478_p12 }
 0x147   :  { %6488 = shalt.err (!%p6485_p2)
}
 0x148   :  { %s7611_s26 = sld [smem:[#allocation88_spill]]  ;;  %s6726_s5 = smov [#allocation43]  }
 0x149   :  { %s313_s28 = sshll.u32 %s6726_s5, 4  ;;  %s6727_s1 = smov [#allocation46]   ;;  %s314_s28 = int_to_ptr.vmem [resolvable:$true] %s313_s28 }
 0x14a   :  { %s335_s24 = sshll.u32 %s6727_s1, 4  ;;  %s6497_s2 = scalar_lea.vmem %s314_s28, 512  ;;  %s336_s24 = int_to_ptr.vmem [resolvable:$true] %s335_s24 }
 0x14b   :  { %p6498_p3 = scmp.ne.s32.totalorder %s314_s28, %s6497_s2  ;;  %p6502_p4 = scmp.lt.s32.totalorder %s314_s28, %s314_s28 }
 0x14c   :  { %p6503_p5 = scmp.lt.s32.totalorder %s6497_s2, %s6497_s2 }
 0x14e   :  { %295 = dma.hbm_to_vmem [thread:$0]  %s7611_s26, 16, %s293_s19, [#allocation39]  }
 0x14f   :  { %p6504_p6 = por %p6503_p5, %p6502_p4 }
 0x151   :  { %p6505_p7 = pnand %p6504_p6, %p6498_p3 }
 0x153   :  { %6508 = shalt.err (!%p6505_p7)
}
 0x154   :  { %s7612_s7 = sld [smem:[#allocation89_spill]]  ;;  %s6517_s27 = scalar_lea.vmem %s336_s24, 512 }
 0x155   :  { %p6518_p8 = scmp.ne.s32.totalorder %s336_s24, %s6517_s27  ;;  %p6522_p9 = scmp.lt.s32.totalorder %s336_s24, %s336_s24 }
 0x156   :  { %p6523_p10 = scmp.lt.s32.totalorder %s6517_s27, %s6517_s27 }
 0x158   :  { %p6524_p11 = por %p6523_p10, %p6522_p9 }
 0x15a   :  { %319 = dma.hbm_to_vmem [thread:$0]  %s7612_s7, 512, %s314_s28, [#allocation42], %s6704_s29, %s6704_s29, %s6705_s18  }
 0x15b   :  { %p6525_p12 = pnand %p6524_p11, %p6518_p8 }
 0x15d   :  { %6528 = shalt.err (!%p6525_p12)
}
 0x15e   :  { %s7613_s25 = sld [smem:[#allocation90_spill]]  ;;  %s6728_s6 = smov [#allocation49]  }
 0x15f   :  { %s361_s10 = sshll.u32 %s6728_s6, 4  ;;  %s6729_s13 = smov [#allocation52]   ;;  %s362_s10 = int_to_ptr.vmem [resolvable:$true] %s361_s10 }
 0x160   :  { %s383_s11 = sshll.u32 %s6729_s13, 4  ;;  %s6537_s12 = scalar_lea.vmem %s362_s10, 256  ;;  %s384_s11 = int_to_ptr.vmem [resolvable:$true] %s383_s11 }
 0x161   :  { %p6538_p13 = scmp.ne.s32.totalorder %s362_s10, %s6537_s12  ;;  %p6542_p0 = scmp.lt.s32.totalorder %s362_s10, %s362_s10 }
 0x162   :  { %p6543_p1 = scmp.lt.s32.totalorder %s6537_s12, %s6537_s12 }
 0x164   :  { %341 = dma.hbm_to_vmem [thread:$0]  %s7613_s25, 512, %s336_s24, [#allocation45], %s6704_s29, %s6704_s29, %s6705_s18  }
 0x165   :  { %p6544_p2 = por %p6543_p1, %p6542_p0 }
 0x167   :  { %p6545_p3 = pnand %p6544_p2, %p6538_p13 }
 0x169   :  { %6548 = shalt.err (!%p6545_p3)
}
 0x16a   :  { %s7614_s15 = sld [smem:[#allocation93_spill]]  ;;  %s6557_s20 = scalar_lea.vmem %s384_s11, 256 }
 0x16b   :  { %p6558_p4 = scmp.ne.s32.totalorder %s384_s11, %s6557_s20  ;;  %p6562_p5 = scmp.lt.s32.totalorder %s384_s11, %s384_s11 }
 0x16c   :  { %p6563_p6 = scmp.lt.s32.totalorder %s6557_s20, %s6557_s20 }
 0x16e   :  { %p6564_p7 = por %p6563_p6, %p6562_p5 }
 0x170   :  { %367 = dma.hbm_to_vmem [thread:$0]  %s7614_s15, 256, %s362_s10, [#allocation48], %s6704_s29, %s6704_s29, %s6705_s18  }
 0x171   :  { %p6565_p8 = pnand %p6564_p7, %p6558_p4 }
 0x173   :  { %6568 = shalt.err (!%p6565_p8)
}
 0x174   :  { %s7615_s3 = sld [smem:[#allocation94_spill]]  ;;  %s6730_s16 = smov [#allocation55]  }
 0x175   :  { %s409_s0 = sshll.u32 %s6730_s16, 4  ;;  %s6731_s14 = smov [#allocation58]   ;;  %s410_s0 = int_to_ptr.vmem [resolvable:$true] %s409_s0 }
 0x176   :  { %s434_s19 = sshll.u32 %s6731_s14, 4  ;;  %s6577_s22 = scalar_lea.vmem %s410_s0, 256  ;;  %s435_s19 = int_to_ptr.vmem [resolvable:$true] %s434_s19 }
 0x177   :  { %p6578_p9 = scmp.ne.s32.totalorder %s410_s0, %s6577_s22  ;;  %p6582_p10 = scmp.lt.s32.totalorder %s410_s0, %s410_s0 }
 0x178   :  { %p6583_p11 = scmp.lt.s32.totalorder %s6577_s22, %s6577_s22 }
 0x17a   :  { %389 = dma.hbm_to_vmem [thread:$0]  %s7615_s3, 256, %s384_s11, [#allocation51], %s6704_s29, %s6704_s29, %s6705_s18  }
 0x17b   :  { %p6584_p12 = por %p6583_p11, %p6582_p10 }
 0x17d   :  { %p6585_p13 = pnand %p6584_p12, %p6578_p9 }
 0x17f   :  { %6588 = shalt.err (!%p6585_p13)
}
 0x180   :  { %s7616_s17 = sld [smem:[#allocation96_spill]]  ;;  %s6597_s23 = scalar_lea.vmem %s435_s19, 16 }
 0x181   :  { %p6598_p0 = scmp.ne.s32.totalorder %s435_s19, %s6597_s23  ;;  %s6601_s9 = scalar_lea.vmem %s435_s19, 32 }
 0x182   :  { %p6602_p1 = scmp.lt.s32.totalorder %s435_s19, %s435_s19  ;;  %p6603_p2 = scmp.lt.s32.totalorder %s6601_s9, %s6597_s23 }
 0x184   :  { %p6604_p3 = por %p6603_p2, %p6602_p1 }
 0x186   :  { %415 = dma.hbm_to_vmem [thread:$0]  %s7616_s17, 256, %s410_s0, [#allocation54], %s6704_s29, %s6704_s29, %s6705_s18  }
 0x187   :  { %p6605_p4 = pnand %p6604_p3, %p6598_p0 }
 0x189   :  { %6608 = shalt.err (!%p6605_p4)
}
 0x18a   :  { %437 = dma.hbm_to_vmem [thread:$0]  %s6933_s4, 16, %s435_s19, [#allocation57]  }
 0x18b   :  { %6629 = dma.done.wait [#allocation15], 192  }
 0x18c   :  { %6630 = vsyncadd [#allocation15], 4294967104 }
 0x18d   :  { %6631 = dma.done.wait [#allocation18], 32  }
 0x18e   :  { %6632 = vsyncadd [#allocation18], 4294967264 }
 0x18f   :  { %6633 = dma.done.wait [#allocation21], 272  }
 0x190   :  { %6634 = vsyncadd [#allocation21], 4294967024 }
 0x191   :  { %6635 = dma.done.wait [#allocation24], 272  }
 0x192   :  { %6636 = vsyncadd [#allocation24], 4294967024 }
 0x193   :  { %6637 = dma.done.wait [#allocation27], 272  }
 0x194   :  { %6638 = vsyncadd [#allocation27], 4294967024 }
 0x195   :  { %6639 = dma.done.wait [#allocation30], 512  }
 0x196   :  { %6640 = vsyncadd [#allocation30], 4294966784 }
 0x197   :  { %6641 = dma.done.wait [#allocation33], 272  }
 0x198   :  { %6642 = vsyncadd [#allocation33], 4294967024 }
 0x199   :  { %6643 = dma.done.wait [#allocation36], 528  }
 0x19a   :  { %6644 = vsyncadd [#allocation36], 4294966768 }
 0x19b   :  { %6645 = dma.done.wait [#allocation39], 528  }
 0x19c   :  { %6646 = vsyncadd [#allocation39], 4294966768 }
 0x19d   :  { %6647 = dma.done.wait [#allocation42], 1024  }
 0x19e   :  { %6648 = vsyncadd [#allocation42], 4294966272 }
 0x19f   :  { %6649 = dma.done.wait [#allocation45], 528  }
 0x1a0   :  { %6650 = vsyncadd [#allocation45], 4294966768 }
 0x1a1   :  { %6651 = dma.done.wait [#allocation48], 272  }
 0x1a2   :  { %6652 = vsyncadd [#allocation48], 4294967024 }
 0x1a3   :  { %6653 = dma.done.wait [#allocation51], 272  }
 0x1a4   :  { %6654 = vsyncadd [#allocation51], 4294967024 }
 0x1a5   :  { %6655 = dma.done.wait [#allocation54], 512  }
 0x1a6   :  { %6656 = vsyncadd [#allocation54], 4294966784 }
 0x1a7   :  { %6657 = dma.done.wait [#allocation57], 32  }
 0x1a8   :  { %6658 = vsyncadd [#allocation57], 4294967264  ;;  %s7617_s4 = sld [smem:[#allocation76_spill]]  ;;  %vm525_vm0 = vcmask 25600   ;;  %v6732_v0 = vmov 0.0   ;;  %vm802_vm1 = vcmask 1043456   ;;  %v730_v16 = vlaneseq }
 0x1a9   :  { %526 = vst.msk [vmem:[#allocation2] sm:$0x3] %vm525_vm0, %v6732_v0  ;;  %528 = vst.msk [vmem:[#allocation2 + $0x22] sm:$0x3] %vm525_vm0, %v6732_v0  ;;  %vm534_vm2 = vcmask 1041409   ;;  %vm793_vm3 = vcmask 31744  }
 0x1aa   :  { %v708_v1 = vld [vmem:[#allocation14 + $0x4] sm:$0xf]  ;;  %v690_v2 = vld [vmem:[#allocation14] sm:$0xf]  ;;  %v6733_v14 = vmov 1983009808  }
 0x1ab   :  { %5397 = vmatprep.subr.msk.mxu0 %vm802_vm1, %v708_v1  ;;  %5405 = vmatprep.subr.msk.mxu1 %vm802_vm1, %v690_v2  ;;  %v728_v15 = vunpack.c.l.s4 %v6733_v14  ;;  %v7034_v20 = vld [vmem:[#allocation14 + $0x8] sm:$0xf]  ;;  %v731_v29 = vshrl.u32 %v730_v16, 7  ;;  %s7618_s29 = sld [smem:[#allocation77_spill]]  ;;  %vm1288_vm4 = vcmask 254976   ;;  %vm1299_vm5 = vcmask 259076  }
 0x1ac   :  { %5398 = vmatpush3.msk.msra.mxu0 %vm802_vm1, %v708_v1  ;;  %5406 = vmatpush3.msk.msra.mxu1 %vm802_vm1, %v690_v2  ;;  %1289 = vst.msk [vmem:[#allocation3] sm:$0x3] %vm1288_vm4, %v6732_v0  ;;  %1291 = vst.msk [vmem:[#allocation3 + $0x12] sm:$0x3] %vm1288_vm4, %v6732_v0  ;;  %vm1392_vm6 = vcmask 261120   ;;  %s7619_s18 = sld [smem:[#allocation79_spill]] }
 0x1ad   :  { %5413 = vmatprep.subr.msk.mxu0 %vm802_vm1, %v7034_v20  ;;  %v729_v28 = vunpack.c.0.s8 %v728_v15  ;;  %vm1740_vm7 = vcmask 517120   ;;  %vm6734_vm8 = vmmov 0   ;;  %vm1751_vm9 = vcmask 521220   ;;  %s7620_s26 = sld [smem:[#allocation80_spill]]  ;;  %s6735_s5 = smov 96  }
 0x1ae   :  { %v529_v3 = vld [vmem:[%s7617_s4] sm:$0x1]  ;;  %v530_v4 = vld [vmem:[%s7617_s4 + $0x10] sm:$0x1]  ;;  %v539_v5 = vld [vmem:[%s7617_s4 + $0x1] sm:$0x1] }
 0x1af   :  { %v540_v6 = vld [vmem:[%s7617_s4 + $0x11] sm:$0x1]  ;;  %v533_v7 = vrot.slane %v530_v4, 7  ;;  %v548_v9 = vld [vmem:[%s7617_s4 + $0x2] sm:$0x1]  ;;  %v7061_v46 = vsub.s32 %v729_v28, %v731_v29  ;;  %vm1807_vm10 = vcmask 523264  }
 0x1b0   :  { %v543_v8 = vrot.slane %v540_v6, 7  ;;  %v549_v10 = vld [vmem:[%s7617_s4 + $0x12] sm:$0x1]  ;;  %v557_v12 = vld [vmem:[%s7617_s4 + $0x3] sm:$0x1]  ;;  %s6736_s28 = smov 16  }
 0x1b1   :  { %v552_v11 = vrot.slane %v549_v10, 7  ;;  %v558_v13 = vld [vmem:[%s7617_s4 + $0x13] sm:$0x1]  ;;  %v535_v17 = vsel %vm534_vm2, %v533_v7, %v529_v3  ;;  %v566_v22 = vld [vmem:[%s7617_s4 + $0x4] sm:$0x1]  ;;  %s6737_s1 = smov 32  }
 0x1b2   :  { %v544_v18 = vsel %vm534_vm2, %v543_v8, %v539_v5  ;;  %v561_v19 = vrot.slane %v558_v13, 7  ;;  %538 = vst.msk [vmem:[#allocation2 + $0x2] sm:$0x3] %vm525_vm0, %v535_v17  ;;  %v567_v23 = vld [vmem:[%s7617_s4 + $0x14] sm:$0x1]  ;;  %s6738_s24 = smov 80  }
 0x1b3   :  { %547 = vst.msk [vmem:[#allocation2 + $0x4] sm:$0x3] %vm525_vm0, %v544_v18  ;;  %v553_v21 = vsel %vm534_vm2, %v552_v11, %v548_v9  ;;  %v570_v25 = vrot.slane %v567_v23, 7  ;;  %v575_v26 = vld [vmem:[%s7617_s4 + $0x5] sm:$0x1]  ;;  %vm2307_vm11 = vcmask 123904  }
 0x1b4   :  { %556 = vst.msk [vmem:[#allocation2 + $0x6] sm:$0x3] %vm525_vm0, %v553_v21  ;;  %v562_v24 = vsel %vm534_vm2, %v561_v19, %v557_v12  ;;  %v576_v27 = vld [vmem:[%s7617_s4 + $0x15] sm:$0x1]  ;;  %v584_v31 = vld [vmem:[%s7617_s4 + $0x6] sm:$0x1] }
 0x1b5   :  { %565 = vst.msk [vmem:[#allocation2 + $0x8] sm:$0x3] %vm525_vm0, %v562_v24  ;;  %v579_v30 = vrot.slane %v576_v27, 7  ;;  %v585_v32 = vld [vmem:[%s7617_s4 + $0x16] sm:$0x1]  ;;  %v571_v34 = vsel %vm534_vm2, %v570_v25, %v566_v22  ;;  %vm2204_vm12 = vcmask 130048  }
 0x1b6   :  { %v674_v33 = vld [vmem:[#allocation2] sm:$0x3]  ;;  %v588_v35 = vrot.slane %v585_v32, 7  ;;  %v593_v36 = vld [vmem:[%s7617_s4 + $0x7] sm:$0x1]  ;;  %vm2417_vm13 = vcmask 125954  }
 0x1b7   :  { %v594_v37 = vld [vmem:[%s7617_s4 + $0x17] sm:$0x1]  ;;  %574 = vst.msk [vmem:[#allocation2 + $0xa] sm:$0x3] %vm525_vm0, %v571_v34  ;;  %v580_v38 = vsel %vm534_vm2, %v579_v30, %v575_v26  ;;  %v602_v40 = vld [vmem:[%s7617_s4 + $0x8] sm:$0x1] }
 0x1b8   :  { %v597_v39 = vrot.slane %v594_v37, 7  ;;  %v603_v41 = vld [vmem:[%s7617_s4 + $0x18] sm:$0x1]  ;;  %583 = vst.msk [vmem:[#allocation2 + $0xc] sm:$0x3] %vm525_vm0, %v580_v38  ;;  %v589_v42 = vsel %vm534_vm2, %v588_v35, %v584_v31  ;;  %s7621_s2 = sld [smem:[#allocation86_spill]] }
 0x1b9   :  { %v606_v43 = vrot.slane %v603_v41, 7  ;;  %v611_v44 = vld [vmem:[%s7617_s4 + $0x9] sm:$0x1]  ;;  %v612_v45 = vld [vmem:[%s7617_s4 + $0x19] sm:$0x1]  ;;  %vm3334_vm14 = vcmask 257026  }
 0x1ba   :  { %592 = vst.msk [vmem:[#allocation2 + $0xe] sm:$0x3] %vm525_vm0, %v589_v42  ;;  %v598_v47 = vsel %vm534_vm2, %v597_v39, %v593_v36  ;;  %v615_v48 = vrot.slane %v612_v45, 7  ;;  %v620_v49 = vld [vmem:[%s7617_s4 + $0xa] sm:$0x1]  ;;  %s7622_s7 = sld [smem:[#allocation91_spill]] }
 0x1bb   :  { %v621_v50 = vld [vmem:[%s7617_s4 + $0x1a] sm:$0x1]  ;;  %v691_v51 = vld [vmem:[#allocation2 + $0x2] sm:$0x3]  ;;  %v692_v52 = vld [vmem:[#allocation2 + $0x4] sm:$0x3]  ;;  %v607_v54 = vsel %vm534_vm2, %v606_v43, %v602_v40 }
 0x1bc   :  { %v675_v53 = vld [vmem:[#allocation2 + $0x2] sm:$0x3]  ;;  %601 = vst.msk [vmem:[#allocation2 + $0x10] sm:$0x3] %vm525_vm0, %v598_v47  ;;  %v693_v55 = vld [vmem:[#allocation2 + $0x6] sm:$0x3]  ;;  %v725_v56 = vcombine.low %v691_v51, %v692_v52  ;;  %v616_v60 = vsel %vm534_vm2, %v615_v48, %v611_v44 }
 0x1bd   :  { %v676_v57 = vld [vmem:[#allocation2 + $0x4] sm:$0x3]  ;;  %v677_v58 = vld [vmem:[#allocation2 + $0x6] sm:$0x3]  ;;  %v907_v59 = vcombine.low %v674_v33, %v675_v53  ;;  %610 = vst.msk [vmem:[#allocation2 + $0x12] sm:$0x3] %vm525_vm0, %v607_v54 }
 0x1be   :  { %v629_v61 = vld [vmem:[%s7617_s4 + $0xb] sm:$0x1]  ;;  %v694_v62 = vld [vmem:[#allocation2 + $0x8] sm:$0x3]  ;;  %v908_v63 = vcombine.low %v676_v57, %v677_v58  ;;  %619 = vst.msk [vmem:[#allocation2 + $0x14] sm:$0x3] %vm525_vm0, %v616_v60  ;;  %v733_v4 = vrot.slane %v725_v56, %v7061_v46 }
 0x1bf   :  { %v678_v1 = vld [vmem:[#allocation2 + $0x8] sm:$0x3]  ;;  %v624_v2 = vrot.slane %v621_v50, 7  ;;  %v726_v3 = vcombine.low %v693_v55, %v694_v62  ;;  %v915_v5 = vrot.slane %v907_v59, %v7061_v46  ;;  %v630_v6 = vld [vmem:[%s7617_s4 + $0x1b] sm:$0x1]  ;;  %s7624_s27 = sld [smem:[#allocation95_spill]] }
 0x1c0   :  { %v638_v7 = vld [vmem:[%s7617_s4 + $0xc] sm:$0x1]  ;;  %v639_v8 = vld [vmem:[%s7617_s4 + $0x1c] sm:$0x1]  ;;  %v922_v9 = vrot.slane %v908_v63, %v7061_v46  ;;  %v695_v10 = vld [vmem:[#allocation2 + $0xa] sm:$0x3] }
 0x1c1   :  { %v679_v11 = vld [vmem:[#allocation2 + $0xa] sm:$0x3]  ;;  %v625_v12 = vsel %vm534_vm2, %v624_v2, %v620_v49  ;;  %v633_v13 = vrot.slane %v630_v6, 7  ;;  %v642_v14 = vrot.slane %v639_v8, 7  ;;  %v740_v15 = vrot.slane %v726_v3, %v7061_v46  ;;  %v696_v16 = vld [vmem:[#allocation2 + $0xc] sm:$0x3] }
 0x1c2   :  { %v680_v17 = vld [vmem:[#allocation2 + $0xc] sm:$0x3]  ;;  %v924_v18 = vcombine.low %v678_v1, %v679_v11  ;;  %628 = vst.msk [vmem:[#allocation2 + $0x16] sm:$0x3] %vm525_vm0, %v625_v12  ;;  %v923_v21 = vcombine.low %v915_v5, %v922_v9  ;;  %v697_v22 = vld [vmem:[#allocation2 + $0xe] sm:$0x3]  ;;  %v742_v23 = vcombine.low %v695_v10, %v696_v16 }
 0x1c3   :  { %v647_v19 = vld [vmem:[%s7617_s4 + $0xd] sm:$0x1]  ;;  %v681_v24 = vld [vmem:[#allocation2 + $0xe] sm:$0x3]  ;;  %v634_v25 = vsel %vm534_vm2, %v633_v13, %v629_v61  ;;  %v643_v26 = vsel %vm534_vm2, %v642_v14, %v638_v7  ;;  %v648_v27 = vld [vmem:[%s7617_s4 + $0x1d] sm:$0x1]  ;;  %v741_v28 = vcombine.low %v733_v4, %v740_v15 }
 0x1c4   :  { %v698_v29 = vld [vmem:[#allocation2 + $0x10] sm:$0x3]  ;;  %v925_v30 = vcombine.low %v680_v17, %v681_v24  ;;  %v932_v31 = vrot.slane %v924_v18, %v7061_v46  ;;  %637 = vst.msk [vmem:[#allocation2 + $0x18] sm:$0x3] %vm525_vm0, %v634_v25  ;;  %646 = vst.msk [vmem:[#allocation2 + $0x1a] sm:$0x3] %vm525_vm0, %v643_v26  ;;  %5407 = vmatprep.mubr.msk.f32.mxu1 %vm793_vm3, %v923_v21  ;;  %v750_v35 = vrot.slane %v742_v23, %v7061_v46 }
 0x1c5   :  { %v682_v32 = vld [vmem:[#allocation2 + $0x10] sm:$0x3]  ;;  %v651_v33 = vrot.slane %v648_v27, 7  ;;  %v743_v34 = vcombine.low %v697_v22, %v698_v29  ;;  %v699_v36 = vld [vmem:[#allocation2 + $0x12] sm:$0x3]  ;;  %5399 = vmatprep.mubr.msk.f32.mxu0 %vm793_vm3, %v741_v28  ;;  %s6739_s25 = smov [#allocation59]  }
 0x1c6   :  { %v683_v37 = vld [vmem:[#allocation2 + $0x12] sm:$0x3]  ;;  %v656_v38 = vld [vmem:[%s7617_s4 + $0xe] sm:$0x1]  ;;  %v939_v39 = vrot.slane %v925_v30, %v7061_v46  ;;  %v700_v40 = vld [vmem:[#allocation2 + $0x14] sm:$0x3] }
 0x1c7   :  { %v684_v41 = vld [vmem:[#allocation2 + $0x14] sm:$0x3]  ;;  %v941_v42 = vcombine.low %v682_v32, %v683_v37  ;;  %v652_v43 = vsel %vm534_vm2, %v651_v33, %v647_v19  ;;  %v657_v44 = vld [vmem:[%s7617_s4 + $0x1e] sm:$0x1]  ;;  %v757_v45 = vrot.slane %v743_v34, %v7061_v46  ;;  %v665_v48 = vld [vmem:[%s7617_s4 + $0xf] sm:$0x1]  ;;  %v759_v51 = vcombine.low %v699_v36, %v700_v40 }
 0x1c8   :  { %655 = vst.msk [vmem:[#allocation2 + $0x1c] sm:$0x3] %vm525_vm0, %v652_v43  ;;  %v660_v47 = vrot.slane %v657_v44, 7  ;;  %v666_v49 = vld [vmem:[%s7617_s4 + $0x1f] sm:$0x1]  ;;  %v940_v50 = vcombine.low %v932_v31, %v939_v39  ;;  %s5045_s6 = sshll.u32 %s6739_s25, 4  ;;  %s5046_s6 = int_to_ptr.vmem [resolvable:$true] %s5045_s6 }
 0x1c9   :  { %v669_v52 = vrot.slane %v666_v49, 7  ;;  %v758_v53 = vcombine.low %v750_v35, %v757_v45  ;;  %v701_v54 = vld [vmem:[#allocation2 + $0x16] sm:$0x3]  ;;  %v1071_v57 = vld [vmem:[#allocation2 + $0x4] sm:$0x3]  ;;  %v949_v59 = vrot.slane %v941_v42, %v7061_v46  ;;  %v767_v4 = vrot.slane %v759_v51, %v7061_v46  ;;  %s6609_s10 = scalar_lea.vmem %s5046_s6, 32  ;;  %p6614_p6 = scmp.lt.s32.totalorder %s5046_s6, %s5046_s6 }
 0x1ca   :  { %v685_v55 = vld [vmem:[#allocation2 + $0x16] sm:$0x3]  ;;  %v661_v56 = vsel %vm534_vm2, %v660_v47, %v656_v38  ;;  %5408 = vmatmul.mubr.msk.f32.vlgmr.msra.gmra.mxu1 %vm793_vm3, %v940_v50  ;;  %v1072_v61 = vld [vmem:[#allocation2 + $0x6] sm:$0x3]  ;;  %v1073_v62 = vld [vmem:[#allocation2 + $0x8] sm:$0x3]  ;;  %p6610_p5 = scmp.ne.s32.totalorder %s5046_s6, %s6609_s10  ;;  %p6615_p7 = scmp.lt.s32.totalorder %s6609_s10, %s6609_s10 }
 0x1cb   :  { %v942_v58 = vcombine.low %v684_v41, %v685_v55  ;;  %664 = vst.msk [vmem:[#allocation2 + $0x1e] sm:$0x3] %vm525_vm0, %v661_v56  ;;  %v670_v60 = vsel %vm534_vm2, %v669_v52, %v665_v48  ;;  %v1074_v63 = vld [vmem:[#allocation2 + $0xa] sm:$0x3]  ;;  %5400 = vmatmul.mubr.msk.f32.vlgmr.msra.gmra.mxu0 %vm793_vm3, %v758_v53  ;;  %v702_v1 = vld [vmem:[#allocation2 + $0x18] sm:$0x3]  ;;  %v1105_v9 = vcombine.low %v1071_v57, %v1072_v61 }
 0x1cc   :  { %673 = vst.msk [vmem:[#allocation2 + $0x20] sm:$0x3] %vm525_vm0, %v670_v60  ;;  %v686_v2 = vld [vmem:[#allocation2 + $0x18] sm:$0x3]  ;;  %5414 = vmatpush3.msk.msra.mxu0 %vm802_vm1, %v7034_v20  ;;  %v760_v3 = vcombine.low %v701_v54, %v702_v1  ;;  %v703_v6 = vld [vmem:[#allocation2 + $0x1a] sm:$0x3]  ;;  %v1106_v10 = vcombine.low %v1073_v62, %v1074_v63  ;;  %p6616_p8 = por %p6615_p7, %p6614_p6 }
 0x1cd   :  { %v956_v5 = vrot.slane %v942_v58, %v7061_v46  ;;  %v687_v7 = vld [vmem:[#allocation2 + $0x1a] sm:$0x3]  ;;  %v1075_v8 = vld [vmem:[#allocation2 + $0xc] sm:$0x3]  ;;  %v1076_v11 = vld [vmem:[#allocation2 + $0xe] sm:$0x3]  ;;  %v1113_v29 = vrot.slane %v1105_v9, %v7061_v46 }
 0x1ce   :  { %v1077_v12 = vld [vmem:[#allocation2 + $0x10] sm:$0x3]  ;;  %v1078_v13 = vld [vmem:[#allocation2 + $0x12] sm:$0x3]  ;;  %v774_v14 = vrot.slane %v760_v3, %v7061_v46  ;;  %v958_v17 = vcombine.low %v686_v2, %v687_v7  ;;  %v1079_v18 = vld [vmem:[#allocation2 + $0x14] sm:$0x3]  ;;  %v1122_v25 = vcombine.low %v1075_v8, %v1076_v11  ;;  %v1120_v30 = vrot.slane %v1106_v10, %v7061_v46  ;;  %p6617_p9 = pnand %p6616_p8, %p6610_p5 }
 0x1cf   :  { %v957_v15 = vcombine.low %v949_v59, %v956_v5  ;;  %v704_v16 = vld [vmem:[#allocation2 + $0x1c] sm:$0x3]  ;;  %v1080_v20 = vld [vmem:[#allocation2 + $0x16] sm:$0x3]  ;;  %v1081_v22 = vld [vmem:[#allocation2 + $0x18] sm:$0x3]  ;;  %v1123_v31 = vcombine.low %v1077_v12, %v1078_v13 }
 0x1d0   :  { %v776_v19 = vcombine.low %v703_v6, %v704_v16  ;;  %v688_v21 = vld [vmem:[#allocation2 + $0x1c] sm:$0x3]  ;;  %v1082_v23 = vld [vmem:[#allocation2 + $0x1a] sm:$0x3]  ;;  %v775_v24 = vcombine.low %v767_v4, %v774_v14  ;;  %v1086_v32 = vld [vmem:[#allocation2 + $0x22] sm:$0x3]  ;;  %v966_v35 = vrot.slane %v958_v17, %v7061_v46  ;;  %v1139_v36 = vcombine.low %v1079_v18, %v1080_v20 }
 0x1d1   :  { %5410 = vmatprep.mubr.msk.f32.mxu1 %vm793_vm3, %v957_v15  ;;  %v1083_v26 = vld [vmem:[#allocation2 + $0x1c] sm:$0x3]  ;;  %v1140_v37 = vcombine.low %v1081_v22, %v1082_v23  ;;  %v1130_v43 = vrot.slane %v1122_v25, %v7061_v46  ;;  %v1137_v45 = vrot.slane %v1123_v31, %v7061_v46  ;;  %v1121_v50 = vcombine.low %v1113_v29, %v1120_v30  ;;  %v5124_v61 = vld [vmem:[%s7618_s29 + $0x30] sm:$0xff]  ;;  %v5123_v63 = vld [vmem:[%s7618_s29 + $0x28] sm:$0xff] }
 0x1d2   :  { %v705_v27 = vld [vmem:[#allocation2 + $0x1e] sm:$0x3]  ;;  %5402 = vmatprep.mubr.msk.f32.mxu0 %vm793_vm3, %v775_v24  ;;  %v784_v41 = vrot.slane %v776_v19, %v7061_v46  ;;  %v1147_v51 = vrot.slane %v1139_v36, %v7061_v46  ;;  %v1335_v62 = vld [vmem:[%s7618_s29 + $0x10] sm:$0xff]  ;;  %v1334_v1 = vld [vmem:[%s7618_s29 + $0x8] sm:$0xff]  ;;  %1741 = vst.msk [vmem:[#allocation4] sm:$0x3] %vm1740_vm7, %v6732_v0 }
 0x1d3   :  { %v689_v28 = vld [vmem:[#allocation2 + $0x1e] sm:$0x3]  ;;  %v706_v33 = vld [vmem:[#allocation2 + $0x20] sm:$0x3]  ;;  %v1154_v52 = vrot.slane %v1140_v37, %v7061_v46  ;;  %v1138_v54 = vcombine.low %v1130_v43, %v1137_v45  ;;  %v5121_v14 = vld [vmem:[#allocation17] ss:$0 sm:$0xff] }
 0x1d4   :  { %v959_v34 = vcombine.low %v688_v21, %v689_v28  ;;  %v1084_v38 = vld [vmem:[#allocation2 + $0x1e] sm:$0x3]  ;;  %v1085_v39 = vld [vmem:[#allocation2 + $0x20] sm:$0x3]  ;;  %v777_v40 = vcombine.low %v705_v27, %v706_v33  ;;  %1743 = vst.msk [vmem:[#allocation4 + $0xa] sm:$0x3] %vm1740_vm7, %v6732_v0 }
 0x1d5   :  { %v1156_v47 = vcombine.low %v1083_v26, %v1084_v38  ;;  %v1157_v48 = vcombine.low %v1085_v39, %v1086_v32  ;;  %v1155_v57 = vcombine.low %v1147_v51, %v1154_v52  ;;  %v5125_v59 = vld [vmem:[%s7618_s29 + $0x38] sm:$0xff]  ;;  %v5122_v2 = vld [vmem:[%s7618_s29 + $0x20] sm:$0xff]  ;;  %vm5037_vm15 = vcmask 17408  }
 0x1d6   :  { %v973_v42 = vrot.slane %v959_v34, %v7061_v46  ;;  %v791_v44 = vrot.slane %v777_v40, %v7061_v46  ;;  %v1336_v60 = vld [vmem:[%s7618_s29 + $0x18] sm:$0xff]  ;;  %5421 = vmatprep.subr.mxu1 %v5125_v59  ;;  %v1333_v3 = vld [vmem:[%s7618_s29] sm:$0xff] }
 0x1d7   :  { %v1164_v55 = vrot.slane %v1156_v47, %v7061_v46  ;;  %v1171_v56 = vrot.slane %v1157_v48, %v7061_v46  ;;  %5432 = vmatprep.subr.mxu0 %v1336_v60  ;;  %5422 = vmatpush3.msra.mxu1 %v5125_v59  ;;  %v7145_v4 = vld [vmem:[%s7618_s29 + $0x58] sm:$0xff] }
 0x1d8   :  { %v974_v49 = vcombine.low %v966_v35, %v973_v42  ;;  %v792_v53 = vcombine.low %v784_v41, %v791_v44  ;;  %5423 = vmatprep.subr.mxu1 %v5124_v61  ;;  %v1325_v44 = vld [vmem:[#allocation3] sm:$0x3] }
 0x1d9   :  { %v1172_v58 = vcombine.low %v1164_v55, %v1171_v56  ;;  %5424 = vmatpush3.msra.mxu1 %v5124_v61 }
 0x1da   :  { %5411 = vmatmul.mubr.msk.f32.gmra.mxu1 %vm793_vm3, %v974_v49  ;;  %5403 = vmatmul.mubr.msk.f32.gmra.mxu0 %vm793_vm3, %v792_v53 }
 0x1db   :  { %5415 = vmatprep.mubr.msk.f32.mxu0 %vm793_vm3, %v1121_v50  ;;  %5425 = vmatprep.subr.mxu1 %v5123_v63 }
 0x1dc   :  { %5426 = vmatpush3.msra.mxu1 %v5123_v63 }
 0x1dd   :  { %5427 = vmatprep.subr.mxu1 %v5122_v2 }
 0x1de   :  { %5416 = vmatmul.mubr.msk.f32.vlgmr.msra.gmra.mxu0 %vm793_vm3, %v1138_v54  ;;  %5428 = vmatpush3.msra.mxu1 %v5122_v2 }
 0x1df   :  { %5418 = vmatprep.mubr.msk.f32.mxu0 %vm793_vm3, %v1155_v57  ;;  %5433 = vmatpush3.msra.mxu0 %v1336_v60 }
 0x1e0   :  { %5434 = vmatprep.subr.mxu0 %v1335_v62  ;;  %5443 = vmatprep.subr.mxu1 %v7145_v4 }
 0x1e1   :  { %5435 = vmatpush3.msra.mxu0 %v1335_v62 }
 0x1e2   :  { %5419 = vmatmul.mubr.msk.f32.gmra.mxu0 %vm793_vm3, %v1172_v58  ;;  %5436 = vmatprep.subr.mxu0 %v1334_v1 }
 0x1e3   :  { %5437 = vmatpush3.msra.mxu0 %v1334_v1 }
 0x1e4   :  { %5438 = vmatprep.subr.mxu0 %v1333_v3 }
 0x1e5   :  { %5439 = vmatpush3.msra.mxu0 %v1333_v3 }
 0x1e6   :  { %5492 = vmatprep.subr.mxu0 %v6732_v0 }
 0x28a   :  { %v5409_v6 = vpop.f32.mrf.mxu1 }
 0x28b   :  { %v5401_v5 = vpop.f32.mrf.mxu0 }
 0x28c   :  { %v1052_v8 = vpop.f32.mrf.mxu1  ;;  %v1058_v12 = vadd.f32 %v5409_v6, %v5401_v5 }
 0x28d   :  { %v872_v7 = vpop.f32.mrf.mxu0 }
 0x28e   :  { %v1053_v15 = vadd.f32 %v1052_v8, %v872_v7 }
 0x29a   :  { %v5404_v9 = vpop.f32.mrf.mxu0  ;;  %v5412_v10 = vpop.f32.mrf.mxu1 }
 0x29b   :  { %v1068_v20 = vadd.f32 %v5412_v10, %v5404_v9 }
 0x29c   :  { %v882_v11 = vpop.f32.mrf.mxu0  ;;  %v1062_v17 = vpop.f32.mrf.mxu1 }
 0x29d   :  { %v1063_v23 = vadd.f32 %v1062_v17, %v882_v11 }
 0x29e   :  { %v5417_v13 = vpop.f32.mrf.mxu0 }
 0x29f   :  { %v1270_v16 = vadd.f32 %v5417_v13, %v1058_v12 }
 0x2a0   :  { %v1250_v18 = vpop.f32.mrf.mxu0 }
 0x2a1   :  { %v1281_v19 = vadd.f32 %v5121_v14, %v1270_v16  ;;  %v1269_v21 = vadd.f32 %v1250_v18, %v1053_v15 }
 0x2a2   :  { %v5420_v22 = vpop.f32.mrf.mxu0 }
 0x2a3   :  { %v1285_v24 = vmax.f32 %v1281_v19, 0.0  ;;  %v1280_v25 = vadd.f32 %v5121_v14, %v1269_v21  ;;  %v1272_v26 = vadd.f32 %v5420_v22, %v1068_v20 }
 0x2a4   :  { %v1260_v27 = vpop.f32.mrf.mxu0 }
 0x2a5   :  { %v1302_v28 = vrot.slane %v1285_v24, 2  ;;  %v1284_v29 = vmax.f32 %v1280_v25, 0.0  ;;  %v1283_v30 = vadd.f32 %v5121_v14, %v1272_v26  ;;  %v1271_v31 = vadd.f32 %v1260_v27, %v1063_v23  ;;  %v1600_v26 = vld [vmem:[#allocation3 + $0x12] sm:$0x3] }
 0x2a7   :  { %v1304_v32 = vmax.f32 %v1285_v24, %v1302_v28  ;;  %v1293_v33 = vrot.slane %v1284_v29, 2  ;;  %v1287_v34 = vmax.f32 %v1283_v30, 0.0  ;;  %v1282_v35 = vadd.f32 %v5121_v14, %v1271_v31  ;;  %v5132_v30 = vld [vmem:[%s7618_s29 + $0x50] sm:$0xff] }
 0x2a9   :  { %1306 = vst.msk [vmem:[#allocation3 + $0x6] sm:$0x3] %vm1288_vm4, %v1304_v32  ;;  %v1295_v36 = vmax.f32 %v1284_v29, %v1293_v33  ;;  %v1318_v37 = vrot.slane %v1287_v34, 2  ;;  %v1286_v38 = vmax.f32 %v1282_v35, 0.0  ;;  %v5131_v33 = vld [vmem:[%s7618_s29 + $0x48] sm:$0xff]  ;;  %v5130_v35 = vld [vmem:[%s7618_s29 + $0x40] sm:$0xff] }
 0x2aa   :  { %1308 = vst.msk [vmem:[#allocation3 + $0x4] sm:$0x30] %vm1299_vm5, %v1304_v32 }
 0x2ab   :  { %1297 = vst.msk [vmem:[#allocation3 + $0x2] sm:$0x3] %vm1288_vm4, %v1295_v36  ;;  %v1320_v39 = vmax.f32 %v1287_v34, %v1318_v37  ;;  %v1310_v40 = vrot.slane %v1286_v38, 2 }
 0x2ac   :  { %1300 = vst.msk [vmem:[#allocation3] sm:$0x30] %vm1299_vm5, %v1295_v36 }
 0x2ad   :  { %1322 = vst.msk [vmem:[#allocation3 + $0xe] sm:$0x3] %vm1288_vm4, %v1320_v39  ;;  %v1312_v41 = vmax.f32 %v1286_v38, %v1310_v40  ;;  %v5154_v38 = vld [vmem:[%s7619_s18 + $0xb8] sm:$0xff]  ;;  %v5153_v40 = vld [vmem:[%s7619_s18 + $0xb0] sm:$0xff] }
 0x2ae   :  { %1324 = vst.msk [vmem:[#allocation3 + $0xc] sm:$0x30] %vm1299_vm5, %v1320_v39  ;;  %v5143_v39 = vld [vmem:[%s7619_s18 + $0x70] sm:$0xff] }
 0x2af   :  { %1314 = vst.msk [vmem:[#allocation3 + $0xa] sm:$0x3] %vm1288_vm4, %v1312_v41 }
 0x2b0   :  { %1316 = vst.msk [vmem:[#allocation3 + $0x8] sm:$0x30] %vm1299_vm5, %v1312_v41  ;;  %v1339_v42 = vld [vmem:[#allocation3 + $0x6] sm:$0x3] }
 0x2b1   :  { %v1340_v43 = vld [vmem:[#allocation3 + $0x8] sm:$0x3]  ;;  %v1328_v52 = vld [vmem:[#allocation3 + $0x6] sm:$0x3] }
 0x2b2   :  { %v1359_v45 = vcombine.low %v1339_v42, %v1340_v43  ;;  %v1337_v47 = vld [vmem:[#allocation3 + $0x2] sm:$0x3]  ;;  %v1329_v62 = vld [vmem:[#allocation3 + $0x8] sm:$0x3]  ;;  %v1594_v63 = vld [vmem:[#allocation3 + $0x6] sm:$0x3] }
 0x2b3   :  { %v1338_v48 = vld [vmem:[#allocation3 + $0x4] sm:$0x3]  ;;  %v1326_v49 = vld [vmem:[#allocation3 + $0x2] sm:$0x3]  ;;  %v1595_v1 = vld [vmem:[#allocation3 + $0x8] sm:$0x3] }
 0x2b4   :  { %v1358_v50 = vcombine.low %v1337_v47, %v1338_v48  ;;  %v1327_v51 = vld [vmem:[#allocation3 + $0x4] sm:$0x3]  ;;  %v1480_v53 = vcombine.low %v1325_v44, %v1326_v49  ;;  %v1343_v56 = vld [vmem:[#allocation3 + $0xe] sm:$0x3]  ;;  %v1373_v59 = vrot.slane %v1359_v45, %v7061_v46  ;;  %v5141_v43 = vld [vmem:[%s7619_s18 + $0x60] sm:$0xff] }
 0x2b5   :  { %v1593_v54 = vld [vmem:[#allocation3 + $0x4] sm:$0x3]  ;;  %v1481_v55 = vcombine.low %v1327_v51, %v1328_v52  ;;  %v1344_v57 = vld [vmem:[#allocation3 + $0x10] sm:$0x3]  ;;  %v1332_v11 = vld [vmem:[#allocation3 + $0xe] sm:$0x3] }
 0x2b6   :  { %v1366_v58 = vrot.slane %v1358_v50, %v7061_v46  ;;  %v1488_v60 = vrot.slane %v1480_v53, %v7061_v46  ;;  %v1376_v61 = vcombine.low %v1343_v56, %v1344_v57  ;;  %v1341_v3 = vld [vmem:[#allocation3 + $0xa] sm:$0x3]  ;;  %v1614_v7 = vcombine.low %v1593_v54, %v1594_v63  ;;  %v1598_v24 = vld [vmem:[#allocation3 + $0xe] sm:$0x3]  ;;  %v1599_v25 = vld [vmem:[#allocation3 + $0x10] sm:$0x3] }
 0x2b7   :  { %v1495_v2 = vrot.slane %v1481_v55, %v7061_v46  ;;  %v1342_v5 = vld [vmem:[#allocation3 + $0xc] sm:$0x3]  ;;  %v1330_v6 = vld [vmem:[#allocation3 + $0xa] sm:$0x3]  ;;  %v1632_v32 = vcombine.low %v1599_v25, %v1600_v26  ;;  %v5151_v44 = vld [vmem:[%s7619_s18 + $0xa0] sm:$0xff] }
 0x2b8   :  { %v1374_v8 = vcombine.low %v1366_v58, %v1373_v59  ;;  %v1375_v9 = vcombine.low %v1341_v3, %v1342_v5  ;;  %v1331_v10 = vld [vmem:[#allocation3 + $0xc] sm:$0x3]  ;;  %v1497_v12 = vcombine.low %v1329_v62, %v1330_v6  ;;  %v1596_v13 = vld [vmem:[#allocation3 + $0xa] sm:$0x3]  ;;  %v1390_v20 = vrot.slane %v1376_v61, %v7061_v46  ;;  %v5140_v45 = vld [vmem:[%s7619_s18 + $0x58] sm:$0xff] }
 0x2b9   :  { %v1496_v14 = vcombine.low %v1488_v60, %v1495_v2  ;;  %v1498_v15 = vcombine.low %v1331_v10, %v1332_v11  ;;  %v1615_v16 = vcombine.low %v1595_v1, %v1596_v13  ;;  %v1597_v17 = vld [vmem:[#allocation3 + $0xc] sm:$0x3]  ;;  %v1622_v22 = vrot.slane %v1614_v7, %v7061_v46  ;;  %v5142_v41 = vld [vmem:[%s7619_s18 + $0x68] sm:$0xff]  ;;  %v5150_v47 = vld [vmem:[%s7619_s18 + $0x98] sm:$0xff] }
 0x2ba   :  { %5429 = vmatprep.mubr.msk.f32.mxu1 %vm1392_vm6, %v1374_v8  ;;  %v1383_v18 = vrot.slane %v1375_v9, %v7061_v46  ;;  %v1505_v19 = vrot.slane %v1497_v12, %v7061_v46  ;;  %v1631_v28 = vcombine.low %v1597_v17, %v1598_v24  ;;  %v1646_v36 = vrot.slane %v1632_v32, %v7061_v46  ;;  %v5152_v42 = vld [vmem:[%s7619_s18 + $0xa8] sm:$0xff]  ;;  %v5139_v48 = vld [vmem:[%s7619_s18 + $0x50] sm:$0xff]  ;;  %v5137_v52 = vld [vmem:[%s7619_s18 + $0x40] sm:$0xff] }
 0x2bb   :  { %5440 = vmatprep.mubr.msk.f32.mxu0 %vm1392_vm6, %v1496_v14  ;;  %v1512_v21 = vrot.slane %v1498_v15, %v7061_v46  ;;  %v1629_v23 = vrot.slane %v1615_v16, %v7061_v46  ;;  %v5149_v49 = vld [vmem:[%s7619_s18 + $0x90] sm:$0xff]  ;;  %v5138_v50 = vld [vmem:[%s7619_s18 + $0x48] sm:$0xff]  ;;  %v5147_v53 = vld [vmem:[%s7619_s18 + $0x80] sm:$0xff] }
 0x2bc   :  { %v1391_v27 = vcombine.low %v1383_v18, %v1390_v20  ;;  %v1639_v34 = vrot.slane %v1631_v28, %v7061_v46  ;;  %v5148_v51 = vld [vmem:[%s7619_s18 + $0x88] sm:$0xff]  ;;  %v5136_v60 = vld [vmem:[#allocation19] ss:$0 sm:$0xff]  ;;  %v1976_v11 = vld [vmem:[#allocation4 + $0xa] sm:$0x3] }
 0x2bd   :  { %v1513_v29 = vcombine.low %v1505_v19, %v1512_v21  ;;  %v1630_v31 = vcombine.low %v1622_v22, %v1629_v23  ;;  %v1772_v28 = vld [vmem:[%s7619_s18 + $0x38] sm:$0xff] }
 0x2be   :  { %5430 = vmatmul.mubr.msk.f32.vlgmr.msra.gmra.mxu1 %vm1392_vm6, %v1391_v27  ;;  %v1647_v37 = vcombine.low %v1639_v34, %v1646_v36  ;;  %v1761_v32 = vld [vmem:[#allocation4] sm:$0x3] }
 0x2bf   :  { %5441 = vmatmul.mubr.msk.f32.vlgmr.msra.gmra.mxu0 %vm1392_vm6, %v1513_v29  ;;  %5444 = vmatpush3.msra.mxu1 %v7145_v4  ;;  %v5144_v4 = vld [vmem:[%s7619_s18 + $0x78] sm:$0xff] }
 0x2c0   :  { %5445 = vmatprep.subr.mxu1 %v5132_v30  ;;  %5451 = vmatprep.mubr.msk.f32.mxu1 %vm1392_vm6, %v1630_v31  ;;  %v1770_v31 = vld [vmem:[%s7619_s18 + $0x28] sm:$0xff] }
 0x2c1   :  { %5446 = vmatpush3.msra.mxu1 %v5132_v30  ;;  %5493 = vmatpush3.msra.mxu0 %v5154_v38  ;;  %v1771_v30 = vld [vmem:[%s7619_s18 + $0x30] sm:$0xff] }
 0x2c2   :  { %5447 = vmatprep.subr.mxu1 %v5131_v33  ;;  %5494 = vmatprep.subr.mxu0 %v6732_v0 }
 0x2c3   :  { %5448 = vmatpush3.msra.mxu1 %v5131_v33  ;;  %5495 = vmatpush3.msra.mxu0 %v5153_v40  ;;  %v1766_v40 = vld [vmem:[%s7619_s18 + $0x8] sm:$0xff] }
 0x2c4   :  { %5449 = vmatprep.subr.mxu1 %v5130_v35  ;;  %5496 = vmatprep.subr.mxu0 %v6732_v0 }
 0x2c5   :  { %5450 = vmatpush3.msra.mxu1 %v5130_v35  ;;  %5497 = vmatpush3.msra.mxu0 %v5152_v42  ;;  %v1769_v35 = vld [vmem:[%s7619_s18 + $0x20] sm:$0xff] }
 0x2c6   :  { %5452 = vmatmul.mubr.msk.f32.vlgmr.msra.gmra.mxu1 %vm1392_vm6, %v1647_v37  ;;  %5454 = vmatprep.subr.mxu1 %v6732_v0  ;;  %v1768_v37 = vld [vmem:[%s7619_s18 + $0x18] sm:$0xff] }
 0x2c7   :  { %5455 = vmatpush3.msra.mxu1 %v5144_v4  ;;  %5498 = vmatprep.subr.mxu0 %v6732_v0 }
 0x2c8   :  { %5456 = vmatprep.subr.mxu1 %v6732_v0  ;;  %5499 = vmatpush3.msra.mxu0 %v5151_v44 }
 0x2c9   :  { %5457 = vmatpush3.msra.mxu1 %v5143_v39  ;;  %5500 = vmatprep.subr.mxu0 %v6732_v0  ;;  %v1767_v39 = vld [vmem:[%s7619_s18 + $0x10] sm:$0xff] }
 0x2ca   :  { %5458 = vmatprep.subr.mxu1 %v6732_v0  ;;  %5501 = vmatpush3.msra.mxu0 %v5150_v47  ;;  %v2112_v47 = vld [vmem:[%s7620_s26 + $0x70] sm:$0xff] }
 0x2cb   :  { %5459 = vmatpush3.msra.mxu1 %v5142_v41  ;;  %5502 = vmatprep.subr.mxu0 %v6732_v0 }
 0x2cc   :  { %5460 = vmatprep.subr.mxu1 %v6732_v0  ;;  %5503 = vmatpush3.msra.mxu0 %v5149_v49  ;;  %v2110_v49 = vld [vmem:[%s7620_s26 + $0x60] sm:$0xff] }
 0x2cd   :  { %5461 = vmatpush3.msra.mxu1 %v5141_v43  ;;  %5504 = vmatprep.subr.mxu0 %v6732_v0  ;;  %v1765_v43 = vld [vmem:[%s7619_s18] sm:$0xff] }
 0x2ce   :  { %5462 = vmatprep.subr.mxu1 %v6732_v0  ;;  %5505 = vmatpush3.msra.mxu0 %v5148_v51  ;;  %v2108_v51 = vld [vmem:[%s7620_s26 + $0x50] sm:$0xff] }
 0x2cf   :  { %5463 = vmatpush3.msra.mxu1 %v5140_v45  ;;  %5506 = vmatprep.subr.mxu0 %v6732_v0  ;;  %v2113_v45 = vld [vmem:[%s7620_s26 + $0x78] sm:$0xff] }
 0x2d0   :  { %5464 = vmatprep.subr.mxu1 %v6732_v0  ;;  %5470 = vmatprep.mubr.msk.f32.mxu1 %vm6734_vm8, %v6732_v0 }
 0x2d1   :  { %5465 = vmatpush3.msra.mxu1 %v5139_v48  ;;  %5507 = vmatpush3.msra.mxu0 %v5147_v53  ;;  %v2111_v48 = vld [vmem:[%s7620_s26 + $0x68] sm:$0xff]  ;;  %v2106_v53 = vld [vmem:[%s7620_s26 + $0x40] sm:$0xff] }
 0x2d2   :  { %5466 = vmatprep.subr.mxu1 %v6732_v0  ;;  %5508 = vmatprep.mubr.msk.f32.mxu0 %vm6734_vm8, %v6732_v0 }
 0x2d3   :  { %5467 = vmatpush3.msra.mxu1 %v5138_v50  ;;  %5546 = vmatprep.subr.mxu0 %v6732_v0  ;;  %v2109_v50 = vld [vmem:[%s7620_s26 + $0x58] sm:$0xff] }
 0x2d4   :  { %5468 = vmatprep.subr.mxu1 %v6732_v0 }
 0x2d5   :  { %5469 = vmatpush3.msra.mxu1 %v5137_v52  ;;  %v2107_v52 = vld [vmem:[%s7620_s26 + $0x48] sm:$0xff] }
 0x2d6   :  { %5473 = vmatprep.subr.mxu1 %v6732_v0 }
 0x37e   :  { %v5431_v54 = vpop.f32.mrf.mxu1 }
 0x37f   :  { %v5442_v55 = vpop.f32.mrf.mxu0 }
 0x380   :  { %v1463_v56 = vpop.f32.mrf.mxu1  ;;  %v1590_v58 = vadd.f32 %v5442_v55, %v5431_v54  ;;  %v2105_v54 = vld [vmem:[%s7620_s26 + $0x38] sm:$0xff]  ;;  %v2104_v55 = vld [vmem:[%s7620_s26 + $0x30] sm:$0xff] }
 0x381   :  { %v1584_v57 = vpop.f32.mrf.mxu0 }
 0x382   :  { %v1585_v61 = vadd.f32 %v1584_v57, %v1463_v56  ;;  %v2103_v56 = vld [vmem:[%s7620_s26 + $0x28] sm:$0xff]  ;;  %v2102_v57 = vld [vmem:[%s7620_s26 + $0x20] sm:$0xff] }
 0x386   :  { %v5453_v59 = vpop.f32.mrf.mxu1 }
 0x387   :  { %v1728_v62 = vadd.f32 %v5453_v59, %v1590_v58  ;;  %v2203_v58 = vld [vmem:[#allocation22 + $0x8] sm:$0xff]  ;;  %v2101_v59 = vld [vmem:[%s7620_s26 + $0x18] sm:$0xff] }
 0x388   :  { %v1718_v63 = vpop.f32.mrf.mxu1 }
 0x389   :  { %v1737_v1 = vadd.f32 %v5136_v60, %v1728_v62  ;;  %v1727_v2 = vadd.f32 %v1718_v63, %v1585_v61  ;;  %v2100_v61 = vld [vmem:[%s7620_s26 + $0x10] sm:$0xff]  ;;  %v2099_v62 = vld [vmem:[%s7620_s26 + $0x8] sm:$0xff]  ;;  %v2098_v63 = vld [vmem:[%s7620_s26] sm:$0xff] }
 0x38b   :  { %v1739_v3 = vmax.f32 %v1737_v1, 0.0  ;;  %v1736_v5 = vadd.f32 %v5136_v60, %v1727_v2  ;;  %v2202_v60 = vld [vmem:[#allocation22] sm:$0xff] }
 0x38d   :  { %v1754_v6 = vrot.slane %v1739_v3, 2  ;;  %v1738_v7 = vmax.f32 %v1736_v5, 0.0 }
 0x38f   :  { %v1756_v8 = vmax.f32 %v1739_v3, %v1754_v6  ;;  %v1745_v9 = vrot.slane %v1738_v7, 2 }
 0x391   :  { %1758 = vst.msk [vmem:[#allocation4 + $0x6] sm:$0x3] %vm1740_vm7, %v1756_v8  ;;  %v1747_v10 = vmax.f32 %v1738_v7, %v1745_v9 }
 0x392   :  { %1760 = vst.msk [vmem:[#allocation4 + $0x4] sm:$0x30] %vm1751_vm9, %v1756_v8  ;;  %v5156_v8 = vld [vmem:[#allocation20] ss:$0 sm:$0xff] }
 0x393   :  { %1749 = vst.msk [vmem:[#allocation4 + $0x2] sm:$0x3] %vm1740_vm7, %v1747_v10 }
 0x394   :  { %1752 = vst.msk [vmem:[#allocation4] sm:$0x30] %vm1751_vm9, %v1747_v10 }
 0x398   :  { %v1775_v12 = vld [vmem:[#allocation4 + $0x6] sm:$0x3] }
 0x399   :  { %v1776_v13 = vld [vmem:[#allocation4 + $0x8] sm:$0x3]  ;;  %v1974_v15 = vld [vmem:[#allocation4 + $0x6] sm:$0x3] }
 0x39a   :  { %v1791_v14 = vcombine.low %v1775_v12, %v1776_v13  ;;  %v1975_v16 = vld [vmem:[#allocation4 + $0x8] sm:$0x3]  ;;  %v1773_v17 = vld [vmem:[#allocation4 + $0x2] sm:$0x3]  ;;  %v1764_v36 = vld [vmem:[#allocation4 + $0x6] sm:$0x3] }
 0x39b   :  { %v1774_v18 = vld [vmem:[#allocation4 + $0x4] sm:$0x3]  ;;  %v1991_v19 = vcombine.low %v1975_v16, %v1976_v11  ;;  %v1762_v33 = vld [vmem:[#allocation4 + $0x2] sm:$0x3] }
 0x39c   :  { %v1973_v20 = vld [vmem:[#allocation4 + $0x4] sm:$0x3]  ;;  %v1790_v21 = vcombine.low %v1773_v17, %v1774_v18  ;;  %v1805_v24 = vrot.slane %v1791_v14, %v7061_v46  ;;  %v1884_v4 = vcombine.low %v1761_v32, %v1762_v33 }
 0x39d   :  { %v1990_v22 = vcombine.low %v1973_v20, %v1974_v15  ;;  %v2005_v26 = vrot.slane %v1991_v19, %v7061_v46  ;;  %v1763_v34 = vld [vmem:[#allocation4 + $0x4] sm:$0x3] }
 0x39e   :  { %v1798_v23 = vrot.slane %v1790_v21, %v7061_v46  ;;  %v1885_v38 = vcombine.low %v1763_v34, %v1764_v36  ;;  %v1892_v41 = vrot.slane %v1884_v4, %v7061_v46  ;;  %v5157_v21 = vld [vmem:[#allocation23] ss:$0 sm:$0xff] }
 0x39f   :  { %v1998_v25 = vrot.slane %v1990_v22, %v7061_v46 }
 0x3a0   :  { %v1806_v27 = vcombine.low %v1798_v23, %v1805_v24  ;;  %v1899_v42 = vrot.slane %v1885_v38, %v7061_v46 }
 0x3a1   :  { %v2006_v29 = vcombine.low %v1998_v25, %v2005_v26 }
 0x3a2   :  { %5471 = vmatmul.mubr.msk.f32.vlgmr.msra.gmra.mxu1 %vm1807_vm10, %v1806_v27  ;;  %v1900_v44 = vcombine.low %v1892_v41, %v1899_v42 }
 0x3a3   :  { %5509 = vmatmul.mubr.msk.f32.vlgmr.msra.gmra.mxu0 %vm1807_vm10, %v2006_v29  ;;  %5474 = vmatpush3.msra.mxu1 %v1772_v28 }
 0x3a4   :  { %5489 = vmatprep.mubr.msk.f32.mxu1 %vm6734_vm8, %v6732_v0  ;;  %5475 = vmatprep.subr.mxu1 %v6732_v0 }
 0x3a5   :  { %5550 = vmatprep.mubr.msk.f32.mxu0 %vm6734_vm8, %v6732_v0  ;;  %5476 = vmatpush3.msra.mxu1 %v1771_v30 }
 0x3a6   :  { %5477 = vmatprep.subr.mxu1 %v6732_v0  ;;  %5547 = vmatpush3.msra.mxu0 %v2203_v58 }
 0x3a7   :  { %5478 = vmatpush3.msra.mxu1 %v1770_v31  ;;  %5548 = vmatprep.subr.mxu0 %v6732_v0 }
 0x3a8   :  { %5479 = vmatprep.subr.mxu1 %v6732_v0  ;;  %5549 = vmatpush3.msra.mxu0 %v2202_v60 }
 0x3a9   :  { %5480 = vmatpush3.msra.mxu1 %v1769_v35  ;;  %5551 = vmatmul.mubr.f32.vlgmr.msra.gmra.mxu0 %v6732_v0 }
 0x3aa   :  { %5481 = vmatprep.subr.mxu1 %v6732_v0  ;;  %5553 = vmatprep.subr.mxu0 %v6732_v0 }
 0x3ab   :  { %5482 = vmatpush3.msra.mxu1 %v1768_v37  ;;  %5554 = vmatpush3.msra.mxu0 %v2203_v58 }
 0x3ac   :  { %5483 = vmatprep.subr.mxu1 %v6732_v0  ;;  %5555 = vmatprep.subr.mxu0 %v6732_v0 }
 0x3ad   :  { %5484 = vmatpush3.msra.mxu1 %v1767_v39  ;;  %5556 = vmatpush3.msra.mxu0 %v2202_v60 }
 0x3ae   :  { %5485 = vmatprep.subr.mxu1 %v6732_v0  ;;  %5557 = vmatprep.mubr.msk.f32.mxu0 %vm6734_vm8, %v6732_v0 }
 0x3af   :  { %5486 = vmatpush3.msra.mxu1 %v1766_v40  ;;  %5560 = vmatprep.subr.mxu0 %v6732_v0 }
 0x3b0   :  { %5487 = vmatprep.subr.mxu1 %v6732_v0 }
 0x3b1   :  { %5488 = vmatpush3.msra.mxu1 %v1765_v43 }
 0x3b2   :  { %5490 = vmatmul.mubr.msk.f32.vlgmr.msra.gmra.mxu1 %vm1807_vm10, %v1900_v44  ;;  %5511 = vmatprep.subr.mxu1 %v6732_v0 }
 0x3b3   :  { %5543 = vmatprep.mubr.msk.f32.mxu1 %vm6734_vm8, %v6732_v0  ;;  %5512 = vmatpush3.msra.mxu1 %v2113_v45 }
 0x3b4   :  { %5513 = vmatprep.subr.mxu1 %v6732_v0 }
 0x3b5   :  { %5514 = vmatpush3.msra.mxu1 %v2112_v47 }
 0x3b6   :  { %5515 = vmatprep.subr.mxu1 %v6732_v0 }
 0x3b7   :  { %5516 = vmatpush3.msra.mxu1 %v2111_v48 }
 0x3b8   :  { %5517 = vmatprep.subr.mxu1 %v6732_v0 }
 0x3b9   :  { %5518 = vmatpush3.msra.mxu1 %v2110_v49 }
 0x3ba   :  { %5519 = vmatprep.subr.mxu1 %v6732_v0 }
 0x3bb   :  { %5520 = vmatpush3.msra.mxu1 %v2109_v50 }
 0x3bc   :  { %5521 = vmatprep.subr.mxu1 %v6732_v0 }
 0x3bd   :  { %5522 = vmatpush3.msra.mxu1 %v2108_v51 }
 0x3be   :  { %5523 = vmatprep.subr.mxu1 %v6732_v0 }
 0x3bf   :  { %5524 = vmatpush3.msra.mxu1 %v2107_v52 }
 0x3c0   :  { %5525 = vmatprep.subr.mxu1 %v6732_v0 }
 0x3c1   :  { %5526 = vmatpush3.msra.mxu1 %v2106_v53 }
 0x3c2   :  { %5527 = vmatprep.subr.mxu1 %v6732_v0 }
 0x3c3   :  { %5528 = vmatpush3.msra.mxu1 %v2105_v54 }
 0x3c4   :  { %5529 = vmatprep.subr.mxu1 %v6732_v0 }
 0x3c5   :  { %5530 = vmatpush3.msra.mxu1 %v2104_v55 }
 0x3c6   :  { %5531 = vmatprep.subr.mxu1 %v6732_v0 }
 0x3c7   :  { %5532 = vmatpush3.msra.mxu1 %v2103_v56  ;;  %v2422_v56 = vld [vmem:[#allocation25 + $0x8] sm:$0xff] }
 0x3c8   :  { %5533 = vmatprep.subr.mxu1 %v6732_v0 }
 0x3c9   :  { %5534 = vmatpush3.msra.mxu1 %v2102_v57  ;;  %v2421_v57 = vld [vmem:[#allocation25] sm:$0xff] }
 0x3ca   :  { %5535 = vmatprep.subr.mxu1 %v6732_v0 }
 0x3cb   :  { %5536 = vmatpush3.msra.mxu1 %v2101_v59 }
 0x3cc   :  { %5537 = vmatprep.subr.mxu1 %v6732_v0 }
 0x3cd   :  { %5538 = vmatpush3.msra.mxu1 %v2100_v61 }
 0x3ce   :  { %5539 = vmatprep.subr.mxu1 %v6732_v0 }
 0x3cf   :  { %5540 = vmatpush3.msra.mxu1 %v2099_v62 }
 0x3d0   :  { %5541 = vmatprep.subr.mxu1 %v6732_v0 }
 0x3d1   :  { %5542 = vmatpush3.msra.mxu1 %v2098_v63 }
 0x3d2   :  { %5581 = vmatprep.subr.mxu1 %v6732_v0 }
 0x462   :  { %v1876_v1 = vpop.f32.mrf.mxu1 }
 0x463   :  { %v2075_v2 = vpop.f32.mrf.mxu0 }
 0x464   :  { %v5472_v3 = vpop.f32.mrf.mxu1 }
 0x465   :  { %v5510_v5 = vpop.f32.mrf.mxu0  ;;  %v2512_v3 = vld [vmem:[#allocation26] sm:$0xff] }
 0x466   :  { %v5161_v5 = vld [vmem:[#allocation28] ss:$0 sm:$0xff] }
 0x469   :  { %v2274_v20 = vpop.f32.mrf.mxu0 }
 0x46b   :  { %v5552_v19 = vpop.f32.mrf.mxu0 }
 0x472   :  { %v1969_v6 = vpop.f32.mrf.mxu1 }
 0x473   :  { %v1970_v7 = vadd.f32 %v1969_v6, %v1876_v1 }
 0x474   :  { %v5491_v9 = vpop.f32.mrf.mxu1 }
 0x475   :  { %v2079_v10 = vadd.f32 %v2075_v2, %v1970_v7  ;;  %v2513_v2 = vld [vmem:[#allocation26 + $0x8] sm:$0xff] }
 0x477   :  { %v2087_v11 = vadd.f32 %v5156_v8, %v2079_v10 }
 0x479   :  { %v2088_v12 = vmax.f32 %v2087_v11, 0.0 }
 0x47b   :  { %v2090_v13 = vrot.slane %v2088_v12, 2 }
 0x47d   :  { %v2092_v14 = vmax.f32 %v2088_v12, %v2090_v13 }
 0x47f   :  { %2093 = vst [vmem:[#allocation5] sm:$0x3] %v2092_v14  ;;  %2095 = vst [vmem:[#allocation5 - $0x2] sm:$0x30] %v2092_v14 }
 0x486   :  { %v2096_v15 = vld [vmem:[#allocation5] sm:$0x3]  ;;  %v2097_v16 = vld [vmem:[#allocation5 + $0x2] sm:$0x3] }
 0x487   :  { %v2123_v17 = vcombine.low %v2096_v15, %v2097_v16 }
 0x489   :  { %v2130_v18 = vrot.slane %v2123_v17, %v7061_v46 }
 0x48b   :  { %5544 = vmatmul.mubr.f32.vlgmr.msra.gmra.mxu1 %v2130_v18 }
 0x48c   :  { %5585 = vmatprep.mubr.msk.f32.mxu1 %vm6734_vm8, %v6732_v0 }
 0x54b   :  { %v2198_v22 = vpop.f32.mrf.mxu1 }
 0x54c   :  { %v2199_v23 = vadd.f32 %v5157_v21, %v2198_v22 }
 0x54d   :  { %v5545_v24 = vpop.f32.mrf.mxu1 }
 0x54e   :  { %v2278_v25 = vadd.f32 %v2274_v20, %v2199_v23 }
 0x550   :  { %5885 = vtanh.f32 %v2278_v25  ;;  %v5158_v27 = vmul.f32 -1.442695, %v2278_v25 }
 0x552   :  { %5887 = vpow2.f32 %v5158_v27 }
 0x55d   :  { %v5886_v26 = vpop.eup %5885 }
 0x55e   :  { %2288 = vrot.lane.b32.xlu0 %v5886_v26, %s6735_s5 }
 0x55f   :  { %v5888_v28 = vpop.eup %5887 }
 0x560   :  { %v2282_v29 = vadd.f32 1.0, %v5888_v28 }
 0x562   :  { %5889 = vrcp.f32 %v2282_v29 }
 0x56f   :  { %v5890_v30 = vpop.eup %5889 }
 0x570   :  { %v2286_v33 = vmul.f32 0.0, %v5890_v30 }
 0x5d0   :  { %v2289_v31 = vpop.permute.xlu0 %2288 }
 0x5d1   :  { %v2291_v32 = vmul.f32 %v5890_v30, %v2289_v31 }
 0x5d3   :  { %2293 = vrot.lane.b32.xlu0 %v2291_v32, %s6736_s28 }
 0x645   :  { %v2294_v34 = vpop.permute.xlu0 %2293 }
 0x646   :  { %v2296_v35 = vadd.f32 %v2294_v34, %v2286_v33 }
 0x648   :  { %5891 = vtanh.f32 %v2296_v35  ;;  %v2393_v51 = vrot.slane %v2296_v35, 6 }
 0x655   :  { %v5892_v36 = vpop.eup %5891 }
 0x656   :  { %2299 = vrot.lane.b32.xlu1 %v5892_v36, %s6737_s1 }
 0x6c8   :  { %v2300_v37 = vpop.permute.xlu1 %2299 }
 0x6c9   :  { %v2302_v4 = vmul.f32 %v5890_v30, %v2300_v37 }
 0x6cb   :  { %2304 = vrot.lane.b32.xlu1 %v2302_v4, %s6738_s24 }
 0x73d   :  { %v2305_v38 = vpop.permute.xlu1 %2304 }
 0x73e   :  { %2308 = vst.msk [vmem:[#allocation6] sm:$0x3] %vm2307_vm11, %v2305_v38  ;;  %5558 = vmatmul.mubr.msk.f32.vlgmr.msra.gmra.mxu0 %vm2204_vm12, %v2305_v38 }
 0x73f   :  { %5564 = vmatprep.mubr.msk.f32.mxu0 %vm6734_vm8, %v6732_v0  ;;  %5561 = vmatpush3.msra.mxu0 %v2422_v56 }
 0x740   :  { %5562 = vmatprep.subr.mxu0 %v6732_v0 }
 0x741   :  { %5563 = vmatpush3.msra.mxu0 %v2421_v57 }
 0x742   :  { %5567 = vmatprep.subr.mxu0 %v6732_v0 }
 0x745   :  { %v2419_v61 = vld [vmem:[#allocation6] sm:$0x3] }
 0x7fe   :  { %v2377_v39 = vpop.f32.mrf.mxu0 }
 0x7ff   :  { %v2382_v40 = vrot.slane %v2377_v39, 6 }
 0x800   :  { %v5559_v41 = vpop.f32.mrf.mxu0 }
 0x801   :  { %v2384_v42 = vadd.f32 %v2382_v40, %v2199_v23  ;;  %v2726_v41 = vld [vmem:[#allocation29 + $0x8] sm:$0xff] }
 0x802   :  { %5582 = vmatpush3.msra.mxu1 %v2726_v41 }
 0x803   :  { %5893 = vtanh.f32 %v2384_v42  ;;  %v5160_v44 = vmul.f32 -1.442695, %v2384_v42  ;;  %v2817_v42 = vld [vmem:[#allocation31 + $0x8] sm:$0xff]  ;;  %5583 = vmatprep.subr.mxu1 %v6732_v0 }
 0x805   :  { %5895 = vpow2.f32 %v5160_v44  ;;  %v2816_v44 = vld [vmem:[#allocation31] sm:$0xff] }
 0x810   :  { %v5894_v43 = vpop.eup %5893 }
 0x811   :  { %2397 = vrot.lane.b32.xlu0 %v5894_v43, %s6735_s5  ;;  %v2725_v43 = vld [vmem:[#allocation29] sm:$0xff] }
 0x812   :  { %v5896_v45 = vpop.eup %5895  ;;  %5584 = vmatpush3.msra.mxu1 %v2725_v43 }
 0x813   :  { %v2388_v47 = vadd.f32 1.0, %v5896_v45  ;;  %5595 = vmatprep.subr.mxu1 %v6732_v0 }
 0x815   :  { %5897 = vrcp.f32 %v2388_v47 }
 0x822   :  { %v5898_v48 = vpop.eup %5897 }
 0x823   :  { %v2395_v52 = vmul.f32 %v5898_v48, %v2393_v51 }
 0x883   :  { %v2398_v49 = vpop.permute.xlu0 %2397 }
 0x884   :  { %v2400_v50 = vmul.f32 %v5898_v48, %v2398_v49 }
 0x886   :  { %2402 = vrot.lane.b32.xlu1 %v2400_v50, %s6736_s28 }
 0x8f8   :  { %v2403_v53 = vpop.permute.xlu1 %2402 }
 0x8f9   :  { %v2405_v54 = vadd.f32 %v2403_v53, %v2395_v52 }
 0x8fb   :  { %5899 = vtanh.f32 %v2405_v54 }
 0x908   :  { %v5900_v55 = vpop.eup %5899 }
 0x909   :  { %2408 = vrot.lane.b32.xlu0 %v5900_v55, %s6737_s1  ;;  %v5166_v55 = vld [vmem:[#allocation32] ss:$0 sm:$0xff] }
 0x97b   :  { %v2409_v58 = vpop.permute.xlu0 %2408 }
 0x97c   :  { %v2411_v59 = vmul.f32 %v5898_v48, %v2409_v58 }
 0x97e   :  { %2413 = vrot.lane.b32.xlu1 %v2411_v59, %s6738_s24 }
 0x9f0   :  { %v2414_v60 = vpop.permute.xlu1 %2413 }
 0x9f1   :  { %2418 = vst.msk [vmem:[#allocation6] sm:$0xc] %vm2417_vm13, %v2414_v60 }
 0x9f8   :  { %v2420_v62 = vld [vmem:[#allocation6 + $0x2] sm:$0x3] }
 0x9f9   :  { %v2432_v63 = vcombine.low %v2419_v61, %v2420_v62 }
 0x9fb   :  { %v2439_v1 = vrot.slane %v2432_v63, %v7061_v46 }
 0x9fd   :  { %5565 = vmatmul.mubr.msk.f32.vlgmr.msra.gmra.mxu0 %vm2204_vm12, %v2439_v1 }
 0x9fe   :  { %5568 = vmatpush3.msra.mxu0 %v2513_v2  ;;  %5571 = vmatprep.mubr.msk.f32.mxu0 %vm6734_vm8, %v6732_v0 }
 0x9ff   :  { %5569 = vmatprep.subr.mxu0 %v6732_v0 }
 0xa00   :  { %5570 = vmatpush3.msra.mxu0 %v2512_v3 }
 0xa01   :  { %5572 = vmatmul.mubr.f32.vlgmr.msra.gmra.mxu0 %v6732_v0  ;;  %5574 = vmatprep.subr.mxu0 %v6732_v0 }
 0xa02   :  { %5575 = vmatpush3.msra.mxu0 %v2513_v2  ;;  %5578 = vmatprep.mubr.msk.f32.mxu0 %vm6734_vm8, %v6732_v0 }
 0xa03   :  { %5576 = vmatprep.subr.mxu0 %v6732_v0 }
 0xa04   :  { %5577 = vmatpush3.msra.mxu0 %v2512_v3 }
 0xa05   :  { %5588 = vmatprep.subr.mxu0 %v6732_v0 }
 0xabd   :  { %v2508_v6 = vpop.f32.mrf.mxu0 }
 0xabe   :  { %v2509_v8 = vadd.f32 %v5161_v5, %v2508_v6 }
 0xabf   :  { %v5566_v7 = vpop.f32.mrf.mxu0 }
 0xac1   :  { %v2580_v9 = vpop.f32.mrf.mxu0 }
 0xac2   :  { %v2584_v10 = vadd.f32 %v2580_v9, %v2509_v8 }
 0xac3   :  { %v5573_v11 = vpop.f32.mrf.mxu0 }
 0xac4   :  { %5901 = vtanh.f32 %v2584_v10  ;;  %v5163_v13 = vmul.f32 -1.442695, %v2584_v10 }
 0xac6   :  { %5903 = vpow2.f32 %v5163_v13 }
 0xad1   :  { %v5902_v12 = vpop.eup %5901 }
 0xad2   :  { %2594 = vrot.lane.b32.xlu0 %v5902_v12, %s6735_s5 }
 0xad3   :  { %v5904_v14 = vpop.eup %5903 }
 0xad4   :  { %v2588_v15 = vadd.f32 1.0, %v5904_v14 }
 0xad6   :  { %5905 = vrcp.f32 %v2588_v15 }
 0xae3   :  { %v5906_v16 = vpop.eup %5905 }
 0xae4   :  { %v2592_v20 = vmul.f32 0.0, %v5906_v16 }
 0xb44   :  { %v2595_v17 = vpop.permute.xlu0 %2594 }
 0xb45   :  { %v2597_v18 = vmul.f32 %v5906_v16, %v2595_v17 }
 0xb47   :  { %2599 = vrot.lane.b32.xlu1 %v2597_v18, %s6736_s28 }
 0xbb9   :  { %v2600_v19 = vpop.permute.xlu1 %2599 }
 0xbba   :  { %v2602_v21 = vadd.f32 %v2600_v19, %v2592_v20 }
 0xbbc   :  { %5907 = vtanh.f32 %v2602_v21  ;;  %v2698_v37 = vrot.slane %v2602_v21, 6 }
 0xbc9   :  { %v5908_v22 = vpop.eup %5907 }
 0xbca   :  { %2605 = vrot.lane.b32.xlu0 %v5908_v22, %s6737_s1 }
 0xc3c   :  { %v2606_v23 = vpop.permute.xlu0 %2605 }
 0xc3d   :  { %v2608_v24 = vmul.f32 %v5906_v16, %v2606_v23 }
 0xc3f   :  { %2610 = vrot.lane.b32.xlu1 %v2608_v24, %s6738_s24 }
 0xcb1   :  { %v2611_v25 = vpop.permute.xlu1 %2610 }
 0xcb2   :  { %2613 = vst.msk [vmem:[#allocation7] sm:$0x3] %vm2307_vm11, %v2611_v25  ;;  %5579 = vmatmul.mubr.msk.f32.vlgmr.msra.gmra.mxu0 %vm2204_vm12, %v2611_v25 }
 0xcb3   :  { %5592 = vmatprep.mubr.msk.f32.mxu0 %vm6734_vm8, %v6732_v0  ;;  %5589 = vmatpush3.msra.mxu0 %v2817_v42 }
 0xcb4   :  { %5590 = vmatprep.subr.mxu0 %v6732_v0 }
 0xcb5   :  { %5591 = vmatpush3.msra.mxu0 %v2816_v44 }
 0xcb6   :  { %5593 = vmatmul.mubr.f32.vlgmr.msra.gmra.mxu0 %v6732_v0  ;;  %5602 = vmatprep.subr.mxu0 %v6732_v0 }
 0xcb7   :  { %5606 = vmatprep.mubr.msk.f32.mxu0 %vm6734_vm8, %v6732_v0 }
 0xcb9   :  { %v2723_v49 = vld [vmem:[#allocation7] sm:$0x3] }
 0xd72   :  { %v2682_v26 = vpop.f32.mrf.mxu0 }
 0xd73   :  { %v2687_v27 = vrot.slane %v2682_v26, 6 }
 0xd74   :  { %v5580_v28 = vpop.f32.mrf.mxu0 }
 0xd75   :  { %v2689_v29 = vadd.f32 %v2687_v27, %v2509_v8  ;;  %v3123_v28 = vld [vmem:[%s7621_s2 + $0x18] sm:$0xff] }
 0xd76   :  { %v2884_v53 = vpop.f32.mrf.mxu0 }
 0xd77   :  { %5909 = vtanh.f32 %v2689_v29  ;;  %v5165_v31 = vmul.f32 -1.442695, %v2689_v29  ;;  %v3122_v29 = vld [vmem:[%s7621_s2 + $0x10] sm:$0xff] }
 0xd78   :  { %v5594_v54 = vpop.f32.mrf.mxu0 }
 0xd79   :  { %5911 = vpow2.f32 %v5165_v31  ;;  %v3029_v31 = vld [vmem:[#allocation34] sm:$0xff] }
 0xd84   :  { %v5910_v30 = vpop.eup %5909 }
 0xd85   :  { %2702 = vrot.lane.b32.xlu0 %v5910_v30, %s6735_s5  ;;  %v3030_v30 = vld [vmem:[#allocation34 + $0x8] sm:$0xff] }
 0xd86   :  { %v5912_v32 = vpop.eup %5911  ;;  %5603 = vmatpush3.msra.mxu0 %v3030_v30 }
 0xd87   :  { %v2693_v33 = vadd.f32 1.0, %v5912_v32  ;;  %5604 = vmatprep.subr.mxu0 %v6732_v0  ;;  %v3121_v32 = vld [vmem:[%s7621_s2 + $0x8] sm:$0xff] }
 0xd88   :  { %5605 = vmatpush3.msra.mxu0 %v3029_v31 }
 0xd89   :  { %5913 = vrcp.f32 %v2693_v33  ;;  %v3120_v33 = vld [vmem:[%s7621_s2] sm:$0xff]  ;;  %5620 = vmatprep.subr.mxu0 %v6732_v0 }
 0xd96   :  { %v5914_v34 = vpop.eup %5913 }
 0xd97   :  { %v2700_v4 = vmul.f32 %v5914_v34, %v2698_v37 }
 0xdf7   :  { %v2703_v35 = vpop.permute.xlu0 %2702 }
 0xdf8   :  { %v2705_v36 = vmul.f32 %v5914_v34, %v2703_v35 }
 0xdfa   :  { %2707 = vrot.lane.b32.xlu1 %v2705_v36, %s6736_s28 }
 0xe6c   :  { %v2708_v38 = vpop.permute.xlu1 %2707 }
 0xe6d   :  { %v2710_v39 = vadd.f32 %v2708_v38, %v2700_v4 }
 0xe6f   :  { %5915 = vtanh.f32 %v2710_v39 }
 0xe7c   :  { %v5916_v40 = vpop.eup %5915 }
 0xe7d   :  { %2713 = vrot.lane.b32.xlu0 %v5916_v40, %s6737_s1 }
 0xeef   :  { %v2714_v45 = vpop.permute.xlu0 %2713 }
 0xef0   :  { %v2716_v47 = vmul.f32 %v5914_v34, %v2714_v45 }
 0xef2   :  { %2718 = vrot.lane.b32.xlu1 %v2716_v47, %s6738_s24 }
 0xf64   :  { %v2719_v48 = vpop.permute.xlu1 %2718 }
 0xf65   :  { %2722 = vst.msk [vmem:[#allocation7] sm:$0xc] %vm2417_vm13, %v2719_v48 }
 0xf6c   :  { %v2724_v50 = vld [vmem:[#allocation7 + $0x2] sm:$0x3] }
 0xf6d   :  { %v2736_v51 = vcombine.low %v2723_v49, %v2724_v50 }
 0xf6f   :  { %v2743_v52 = vrot.slane %v2736_v51, %v7061_v46 }
 0xf71   :  { %5586 = vmatmul.mubr.msk.f32.vlgmr.msra.gmra.mxu1 %vm2204_vm12, %v2743_v52 }
 0xf72   :  { %5596 = vmatpush3.msra.mxu1 %v2817_v42  ;;  %5599 = vmatprep.mubr.msk.f32.mxu1 %vm6734_vm8, %v6732_v0  ;;  %v5171_v42 = vld [vmem:[#allocation35] ss:$0 sm:$0xff] }
 0xf73   :  { %5597 = vmatprep.subr.mxu1 %v6732_v0 }
 0xf74   :  { %5598 = vmatpush3.msra.mxu1 %v2816_v44 }
 0xf75   :  { %5609 = vmatprep.subr.mxu1 %v6732_v0 }
0x1031   :  { %v2812_v56 = vpop.f32.mrf.mxu1 }
0x1032   :  { %v2813_v57 = vadd.f32 %v5166_v55, %v2812_v56 }
0x1033   :  { %v5587_v58 = vpop.f32.mrf.mxu1 }
0x1034   :  { %v2888_v59 = vadd.f32 %v2884_v53, %v2813_v57 }
0x1036   :  { %5917 = vtanh.f32 %v2888_v59  ;;  %v5168_v61 = vmul.f32 -1.442695, %v2888_v59 }
0x1038   :  { %5919 = vpow2.f32 %v5168_v61 }
0x1043   :  { %v5918_v60 = vpop.eup %5917 }
0x1044   :  { %2898 = vrot.lane.b32.xlu0 %v5918_v60, %s6735_s5 }
0x1045   :  { %v5920_v62 = vpop.eup %5919 }
0x1046   :  { %v2892_v63 = vadd.f32 1.0, %v5920_v62 }
0x1048   :  { %5921 = vrcp.f32 %v2892_v63 }
0x1055   :  { %v5922_v1 = vpop.eup %5921 }
0x1056   :  { %v2896_v5 = vmul.f32 0.0, %v5922_v1 }
0x10b6   :  { %v2899_v2 = vpop.permute.xlu0 %2898 }
0x10b7   :  { %v2901_v3 = vmul.f32 %v5922_v1, %v2899_v2 }
0x10b9   :  { %2903 = vrot.lane.b32.xlu1 %v2901_v3, %s6736_s28 }
0x112b   :  { %v2904_v6 = vpop.permute.xlu1 %2903 }
0x112c   :  { %v2906_v7 = vadd.f32 %v2904_v6, %v2896_v5 }
0x112e   :  { %5923 = vtanh.f32 %v2906_v7  ;;  %v3002_v23 = vrot.slane %v2906_v7, 6 }
0x113b   :  { %v5924_v8 = vpop.eup %5923 }
0x113c   :  { %2909 = vrot.lane.b32.xlu0 %v5924_v8, %s6737_s1 }
0x11ae   :  { %v2910_v9 = vpop.permute.xlu0 %2909 }
0x11af   :  { %v2912_v10 = vmul.f32 %v5922_v1, %v2910_v9 }
0x11b1   :  { %2914 = vrot.lane.b32.xlu1 %v2912_v10, %s6738_s24 }
0x1223   :  { %v2915_v11 = vpop.permute.xlu1 %2914 }
0x1224   :  { %2917 = vst.msk [vmem:[#allocation8] sm:$0x3] %vm2307_vm11, %v2915_v11  ;;  %5600 = vmatmul.mubr.msk.f32.vlgmr.msra.gmra.mxu1 %vm2204_vm12, %v2915_v11 }
0x1225   :  { %5617 = vmatprep.mubr.msk.f32.mxu1 %vm6734_vm8, %v6732_v0  ;;  %5610 = vmatpush3.msra.mxu1 %v3123_v28 }
0x1226   :  { %5611 = vmatprep.subr.mxu1 %v6732_v0 }
0x1227   :  { %5612 = vmatpush3.msra.mxu1 %v3122_v29 }
0x1228   :  { %5613 = vmatprep.subr.mxu1 %v6732_v0 }
0x1229   :  { %5614 = vmatpush3.msra.mxu1 %v3121_v32 }
0x122a   :  { %5615 = vmatprep.subr.mxu1 %v6732_v0 }
0x122b   :  { %5616 = vmatpush3.msra.mxu1 %v3120_v33  ;;  %v3027_v37 = vld [vmem:[#allocation8] sm:$0x3] }
0x122c   :  { %5618 = vmatmul.mubr.f32.vlgmr.msra.gmra.mxu1 %v6732_v0  ;;  %5631 = vmatprep.subr.mxu1 %v6732_v0 }
0x122d   :  { %5639 = vmatprep.mubr.msk.f32.mxu1 %vm6734_vm8, %v6732_v0 }
0x12e4   :  { %v2986_v12 = vpop.f32.mrf.mxu1 }
0x12e5   :  { %v2991_v13 = vrot.slane %v2986_v12, 6 }
0x12e6   :  { %v5601_v14 = vpop.f32.mrf.mxu1 }
0x12e7   :  { %v2993_v15 = vadd.f32 %v2991_v13, %v2813_v57 }
0x12e9   :  { %5925 = vtanh.f32 %v2993_v15  ;;  %v5170_v17 = vmul.f32 -1.442695, %v2993_v15 }
0x12eb   :  { %5927 = vpow2.f32 %v5170_v17  ;;  %v3434_v17 = vld [vmem:[#allocation38 + $0x18] sm:$0xff] }
0x12ec   :  { %v3192_v40 = vpop.f32.mrf.mxu1 }
0x12ee   :  { %v5619_v41 = vpop.f32.mrf.mxu1 }
0x12f6   :  { %v5926_v16 = vpop.eup %5925 }
0x12f7   :  { %3006 = vrot.lane.b32.xlu0 %v5926_v16, %s6735_s5  ;;  %v3341_v16 = vld [vmem:[#allocation37 + $0x18] sm:$0xff] }
0x12f8   :  { %v5928_v18 = vpop.eup %5927  ;;  %5632 = vmatpush3.msra.mxu1 %v3341_v16 }
0x12f9   :  { %v2997_v20 = vadd.f32 1.0, %v5928_v18  ;;  %v3340_v18 = vld [vmem:[#allocation37 + $0x10] sm:$0xff]  ;;  %5633 = vmatprep.subr.mxu1 %v6732_v0 }
0x12fa   :  { %5634 = vmatpush3.msra.mxu1 %v3340_v18 }
0x12fb   :  { %5929 = vrcp.f32 %v2997_v20  ;;  %v3433_v20 = vld [vmem:[#allocation38 + $0x10] sm:$0xff]  ;;  %5635 = vmatprep.subr.mxu1 %v6732_v0 }
0x1308   :  { %v5930_v19 = vpop.eup %5929 }
0x1309   :  { %v3004_v24 = vmul.f32 %v5930_v19, %v3002_v23  ;;  %v3431_v23 = vld [vmem:[#allocation38] sm:$0xff] }
0x1369   :  { %v3007_v21 = vpop.permute.xlu0 %3006 }
0x136a   :  { %v3009_v22 = vmul.f32 %v5930_v19, %v3007_v21  ;;  %v3432_v21 = vld [vmem:[#allocation38 + $0x8] sm:$0xff] }
0x136c   :  { %3011 = vrot.lane.b32.xlu1 %v3009_v22, %s6736_s28  ;;  %v3338_v22 = vld [vmem:[#allocation37] sm:$0xff] }
0x13de   :  { %v3012_v25 = vpop.permute.xlu1 %3011 }
0x13df   :  { %v3014_v26 = vadd.f32 %v3012_v25, %v3004_v24 }
0x13e1   :  { %5931 = vtanh.f32 %v3014_v26 }
0x13ee   :  { %v5932_v27 = vpop.eup %5931 }
0x13ef   :  { %3017 = vrot.lane.b32.xlu0 %v5932_v27, %s6737_s1 }
0x1461   :  { %v3018_v34 = vpop.permute.xlu0 %3017 }
0x1462   :  { %v3020_v35 = vmul.f32 %v5930_v19, %v3018_v34  ;;  %v3339_v19 = vld [vmem:[#allocation37 + $0x8] sm:$0xff] }
0x1463   :  { %5636 = vmatpush3.msra.mxu1 %v3339_v19 }
0x1464   :  { %3022 = vrot.lane.b32.xlu1 %v3020_v35, %s6738_s24  ;;  %5637 = vmatprep.subr.mxu1 %v6732_v0 }
0x1465   :  { %5638 = vmatpush3.msra.mxu1 %v3338_v22 }
0x1466   :  { %5653 = vmatprep.subr.mxu1 %v6732_v0 }
0x14d6   :  { %v3023_v36 = vpop.permute.xlu1 %3022 }
0x14d7   :  { %3026 = vst.msk [vmem:[#allocation8] sm:$0xc] %vm2417_vm13, %v3023_v36 }
0x14de   :  { %v3028_v4 = vld [vmem:[#allocation8 + $0x2] sm:$0x3] }
0x14df   :  { %v3040_v38 = vcombine.low %v3027_v37, %v3028_v4 }
0x14e1   :  { %v3047_v39 = vrot.slane %v3040_v38, %v7061_v46 }
0x14e3   :  { %5607 = vmatmul.mubr.msk.f32.vlgmr.msra.gmra.mxu0 %vm2204_vm12, %v3047_v39 }
0x14e4   :  { %5621 = vmatpush3.msra.mxu0 %v3123_v28  ;;  %5628 = vmatprep.mubr.msk.f32.mxu0 %vm6734_vm8, %v6732_v0 }
0x14e5   :  { %5622 = vmatprep.subr.mxu0 %v6732_v0 }
0x14e6   :  { %5623 = vmatpush3.msra.mxu0 %v3122_v29 }
0x14e7   :  { %5624 = vmatprep.subr.mxu0 %v6732_v0 }
0x14e8   :  { %5625 = vmatpush3.msra.mxu0 %v3121_v32 }
0x14e9   :  { %5626 = vmatprep.subr.mxu0 %v6732_v0 }
0x14ea   :  { %5627 = vmatpush3.msra.mxu0 %v3120_v33  ;;  %v5176_v33 = vld [vmem:[#allocation40] ss:$0 sm:$0xff] }
0x14eb   :  { %5642 = vmatprep.subr.mxu0 %v6732_v0 }
0x15a3   :  { %v3116_v43 = vpop.f32.mrf.mxu0 }
0x15a4   :  { %v3117_v44 = vadd.f32 %v5171_v42, %v3116_v43 }
0x15a5   :  { %v5608_v45 = vpop.f32.mrf.mxu0 }
0x15a6   :  { %v3196_v47 = vadd.f32 %v3192_v40, %v3117_v44 }
0x15a8   :  { %5933 = vtanh.f32 %v3196_v47  ;;  %v5173_v49 = vmul.f32 -1.442695, %v3196_v47 }
0x15aa   :  { %5935 = vpow2.f32 %v5173_v49 }
0x15b5   :  { %v5934_v48 = vpop.eup %5933 }
0x15b6   :  { %3206 = vrot.lane.b32.xlu0 %v5934_v48, %s6716_s30 }
0x15b7   :  { %v5936_v50 = vpop.eup %5935 }
0x15b8   :  { %v3200_v51 = vadd.f32 1.0, %v5936_v50 }
0x15ba   :  { %5937 = vrcp.f32 %v3200_v51 }
0x15c7   :  { %v5938_v52 = vpop.eup %5937 }
0x15c8   :  { %v3204_v55 = vmul.f32 0.0, %v5938_v52 }
0x1628   :  { %v3207_v53 = vpop.permute.xlu0 %3206 }
0x1629   :  { %v3209_v54 = vmul.f32 %v5938_v52, %v3207_v53 }
0x162b   :  { %3211 = vrot.lane.b32.xlu1 %v3209_v54, %s6737_s1 }
0x169d   :  { %v3212_v56 = vpop.permute.xlu1 %3211 }
0x169e   :  { %v3214_v57 = vadd.f32 %v3212_v56, %v3204_v55 }
0x16a0   :  { %5939 = vtanh.f32 %v3214_v57  ;;  %v3310_v11 = vrot.slane %v3214_v57, 6 }
0x16ad   :  { %v5940_v58 = vpop.eup %5939 }
0x16ae   :  { %3217 = vrot.lane.b32.xlu0 %v5940_v58, %s6716_s30 }
0x1720   :  { %v3218_v59 = vpop.permute.xlu0 %3217 }
0x1721   :  { %v3220_v60 = vmul.f32 %v5938_v52, %v3218_v59 }
0x1723   :  { %3222 = vrot.lane.b32.xlu1 %v3220_v60, %s6737_s1 }
0x1795   :  { %v3223_v61 = vpop.permute.xlu1 %3222 }
0x1796   :  { %3225 = vst.msk [vmem:[#allocation9] sm:$0x3] %vm1288_vm4, %v3223_v61  ;;  %5629 = vmatmul.mubr.msk.f32.vlgmr.msra.gmra.mxu0 %vm1392_vm6, %v3223_v61 }
0x1797   :  { %5650 = vmatprep.mubr.msk.f32.mxu0 %vm6734_vm8, %v6732_v0  ;;  %5643 = vmatpush3.msra.mxu0 %v3434_v17 }
0x1798   :  { %5644 = vmatprep.subr.mxu0 %v6732_v0 }
0x1799   :  { %5645 = vmatpush3.msra.mxu0 %v3433_v20 }
0x179a   :  { %5646 = vmatprep.subr.mxu0 %v6732_v0 }
0x179b   :  { %5647 = vmatpush3.msra.mxu0 %v3432_v21 }
0x179c   :  { %5648 = vmatprep.subr.mxu0 %v6732_v0 }
0x179d   :  { %5649 = vmatpush3.msra.mxu0 %v3431_v23  ;;  %v3336_v27 = vld [vmem:[#allocation9] sm:$0x3] }
0x179e   :  { %5651 = vmatmul.mubr.f32.vlgmr.msra.gmra.mxu0 %v6732_v0  ;;  %5664 = vmatprep.subr.mxu0 %v6732_v0 }
0x179f   :  { %5672 = vmatprep.mubr.msk.f32.mxu0 %vm6734_vm8, %v6732_v0 }
0x1856   :  { %v3294_v62 = vpop.f32.mrf.mxu0 }
0x1857   :  { %v3299_v63 = vrot.slane %v3294_v62, 6 }
0x1858   :  { %v5630_v1 = vpop.f32.mrf.mxu0 }
0x1859   :  { %v3301_v2 = vadd.f32 %v3299_v63, %v3117_v44 }
0x185b   :  { %5941 = vtanh.f32 %v3301_v2  ;;  %v5175_v5 = vmul.f32 -1.442695, %v3301_v2 }
0x185d   :  { %5943 = vpow2.f32 %v5175_v5 }
0x185e   :  { %v3501_v31 = vpop.f32.mrf.mxu0 }
0x1860   :  { %v5652_v32 = vpop.f32.mrf.mxu0 }
0x1868   :  { %v5942_v3 = vpop.eup %5941 }
0x1869   :  { %3314 = vrot.lane.b32.xlu0 %v5942_v3, %s6716_s30 }
0x186a   :  { %v5944_v6 = vpop.eup %5943 }
0x186b   :  { %v3305_v7 = vadd.f32 1.0, %v5944_v6  ;;  %v3649_v6 = vld [vmem:[#allocation41 + $0x18] sm:$0xff] }
0x186c   :  { %5665 = vmatpush3.msra.mxu0 %v3649_v6 }
0x186d   :  { %5945 = vrcp.f32 %v3305_v7  ;;  %v3742_v7 = vld [vmem:[#allocation43 + $0x18] sm:$0xff]  ;;  %5666 = vmatprep.subr.mxu0 %v6732_v0 }
0x187a   :  { %v5946_v8 = vpop.eup %5945 }
0x187b   :  { %v3312_v12 = vmul.f32 %v5946_v8, %v3310_v11  ;;  %v3740_v11 = vld [vmem:[#allocation43 + $0x8] sm:$0xff] }
0x18db   :  { %v3315_v9 = vpop.permute.xlu0 %3314 }
0x18dc   :  { %v3317_v10 = vmul.f32 %v5946_v8, %v3315_v9  ;;  %v3741_v9 = vld [vmem:[#allocation43 + $0x10] sm:$0xff] }
0x18de   :  { %3319 = vrot.lane.b32.xlu1 %v3317_v10, %s6737_s1  ;;  %v3647_v10 = vld [vmem:[#allocation41 + $0x8] sm:$0xff] }
0x1950   :  { %v3320_v13 = vpop.permute.xlu1 %3319 }
0x1951   :  { %v3322_v14 = vadd.f32 %v3320_v13, %v3312_v12  ;;  %v3646_v12 = vld [vmem:[#allocation41] sm:$0xff] }
0x1952   :  { %v3739_v13 = vld [vmem:[#allocation43] sm:$0xff] }
0x1953   :  { %5947 = vtanh.f32 %v3322_v14 }
0x1960   :  { %v5948_v15 = vpop.eup %5947 }
0x1961   :  { %3325 = vrot.lane.b32.xlu0 %v5948_v15, %s6716_s30 }
0x19d3   :  { %v3326_v24 = vpop.permute.xlu0 %3325 }
0x19d4   :  { %v3328_v25 = vmul.f32 %v5946_v8, %v3326_v24  ;;  %v3648_v8 = vld [vmem:[#allocation41 + $0x10] sm:$0xff] }
0x19d5   :  { %5667 = vmatpush3.msra.mxu0 %v3648_v8 }
0x19d6   :  { %3330 = vrot.lane.b32.xlu1 %v3328_v25, %s6737_s1  ;;  %5668 = vmatprep.subr.mxu0 %v6732_v0 }
0x19d7   :  { %5669 = vmatpush3.msra.mxu0 %v3647_v10 }
0x19d8   :  { %5670 = vmatprep.subr.mxu0 %v6732_v0 }
0x19d9   :  { %5671 = vmatpush3.msra.mxu0 %v3646_v12 }
0x19da   :  { %5686 = vmatprep.subr.mxu0 %v6732_v0 }
0x1a48   :  { %v3331_v26 = vpop.permute.xlu1 %3330 }
0x1a49   :  { %3335 = vst.msk [vmem:[#allocation9] sm:$0xc] %vm3334_vm14, %v3331_v26 }
0x1a50   :  { %v3337_v28 = vld [vmem:[#allocation9 + $0x2] sm:$0x3] }
0x1a51   :  { %v3351_v29 = vcombine.low %v3336_v27, %v3337_v28 }
0x1a53   :  { %v3358_v30 = vrot.slane %v3351_v29, %v7061_v46 }
0x1a55   :  { %5640 = vmatmul.mubr.msk.f32.vlgmr.msra.gmra.mxu1 %vm1392_vm6, %v3358_v30 }
0x1a56   :  { %5654 = vmatpush3.msra.mxu1 %v3434_v17  ;;  %5661 = vmatprep.mubr.msk.f32.mxu1 %vm6734_vm8, %v6732_v0 }
0x1a57   :  { %5655 = vmatprep.subr.mxu1 %v6732_v0 }
0x1a58   :  { %5656 = vmatpush3.msra.mxu1 %v3433_v20 }
0x1a59   :  { %5657 = vmatprep.subr.mxu1 %v6732_v0 }
0x1a5a   :  { %5658 = vmatpush3.msra.mxu1 %v3432_v21 }
0x1a5b   :  { %5659 = vmatprep.subr.mxu1 %v6732_v0 }
0x1a5c   :  { %5660 = vmatpush3.msra.mxu1 %v3431_v23  ;;  %v5181_v23 = vld [vmem:[#allocation44] ss:$0 sm:$0xff] }
0x1a5d   :  { %5675 = vmatprep.subr.mxu1 %v6732_v0 }
0x1b15   :  { %v3427_v34 = vpop.f32.mrf.mxu1 }
0x1b16   :  { %v3428_v35 = vadd.f32 %v5176_v33, %v3427_v34 }
0x1b17   :  { %v5641_v36 = vpop.f32.mrf.mxu1 }
0x1b18   :  { %v3505_v37 = vadd.f32 %v3501_v31, %v3428_v35 }
0x1b1a   :  { %5949 = vtanh.f32 %v3505_v37  ;;  %v5178_v38 = vmul.f32 -1.442695, %v3505_v37 }
0x1b1c   :  { %5951 = vpow2.f32 %v5178_v38 }
0x1b27   :  { %v5950_v4 = vpop.eup %5949 }
0x1b28   :  { %3515 = vrot.lane.b32.xlu0 %v5950_v4, %s6716_s30 }
0x1b29   :  { %v5952_v39 = vpop.eup %5951 }
0x1b2a   :  { %v3509_v40 = vadd.f32 1.0, %v5952_v39 }
0x1b2c   :  { %5953 = vrcp.f32 %v3509_v40 }
0x1b39   :  { %v5954_v41 = vpop.eup %5953 }
0x1b3a   :  { %v3513_v44 = vmul.f32 0.0, %v5954_v41 }
0x1b9a   :  { %v3516_v42 = vpop.permute.xlu0 %3515 }
0x1b9b   :  { %v3518_v43 = vmul.f32 %v5954_v41, %v3516_v42 }
0x1b9d   :  { %3520 = vrot.lane.b32.xlu1 %v3518_v43, %s6737_s1 }
0x1c0f   :  { %v3521_v45 = vpop.permute.xlu1 %3520 }
0x1c10   :  { %v3523_v47 = vadd.f32 %v3521_v45, %v3513_v44 }
0x1c12   :  { %5955 = vtanh.f32 %v3523_v47  ;;  %v3619_v63 = vrot.slane %v3523_v47, 6 }
0x1c1f   :  { %v5956_v48 = vpop.eup %5955 }
0x1c20   :  { %3526 = vrot.lane.b32.xlu0 %v5956_v48, %s6716_s30 }
0x1c92   :  { %v3527_v49 = vpop.permute.xlu0 %3526 }
0x1c93   :  { %v3529_v50 = vmul.f32 %v5954_v41, %v3527_v49 }
0x1c95   :  { %3531 = vrot.lane.b32.xlu1 %v3529_v50, %s6737_s1 }
0x1d07   :  { %v3532_v51 = vpop.permute.xlu1 %3531 }
0x1d08   :  { %3534 = vst.msk [vmem:[#allocation10] sm:$0x3] %vm1288_vm4, %v3532_v51  ;;  %5662 = vmatmul.mubr.msk.f32.vlgmr.msra.gmra.mxu1 %vm1392_vm6, %v3532_v51 }
0x1d09   :  { %5683 = vmatprep.mubr.msk.f32.mxu1 %vm6734_vm8, %v6732_v0  ;;  %5676 = vmatpush3.msra.mxu1 %v3742_v7 }
0x1d0a   :  { %5677 = vmatprep.subr.mxu1 %v6732_v0 }
0x1d0b   :  { %5678 = vmatpush3.msra.mxu1 %v3741_v9 }
0x1d0c   :  { %5679 = vmatprep.subr.mxu1 %v6732_v0 }
0x1d0d   :  { %5680 = vmatpush3.msra.mxu1 %v3740_v11 }
0x1d0e   :  { %5681 = vmatprep.subr.mxu1 %v6732_v0 }
0x1d0f   :  { %5682 = vmatpush3.msra.mxu1 %v3739_v13  ;;  %v3644_v17 = vld [vmem:[#allocation10] sm:$0x3] }
0x1d10   :  { %5684 = vmatmul.mubr.f32.vlgmr.msra.gmra.mxu1 %v6732_v0  ;;  %5697 = vmatprep.subr.mxu1 %v6732_v0 }
0x1d11   :  { %5705 = vmatprep.mubr.msk.f32.mxu1 %vm6734_vm8, %v6732_v0 }
0x1dc8   :  { %v3603_v52 = vpop.f32.mrf.mxu1 }
0x1dc9   :  { %v3608_v53 = vrot.slane %v3603_v52, 6 }
0x1dca   :  { %v5663_v54 = vpop.f32.mrf.mxu1 }
0x1dcb   :  { %v3610_v55 = vadd.f32 %v3608_v53, %v3428_v35 }
0x1dcd   :  { %5957 = vtanh.f32 %v3610_v55  ;;  %v5180_v57 = vmul.f32 -1.442695, %v3610_v55 }
0x1dcf   :  { %5959 = vpow2.f32 %v5180_v57 }
0x1dd0   :  { %v3809_v21 = vpop.f32.mrf.mxu1 }
0x1dd2   :  { %v5685_v22 = vpop.f32.mrf.mxu1 }
0x1dda   :  { %v5958_v56 = vpop.eup %5957 }
0x1ddb   :  { %3623 = vrot.lane.b32.xlu0 %v5958_v56, %s6716_s30 }
0x1ddc   :  { %v5960_v58 = vpop.eup %5959 }
0x1ddd   :  { %v3614_v59 = vadd.f32 1.0, %v5960_v58  ;;  %v3957_v58 = vld [vmem:[#allocation46 + $0x18] sm:$0xff] }
0x1dde   :  { %5698 = vmatpush3.msra.mxu1 %v3957_v58 }
0x1ddf   :  { %5961 = vrcp.f32 %v3614_v59  ;;  %v3956_v59 = vld [vmem:[#allocation46 + $0x10] sm:$0xff]  ;;  %5699 = vmatprep.subr.mxu1 %v6732_v0 }
0x1de0   :  { %5700 = vmatpush3.msra.mxu1 %v3956_v59  ;;  %v5191_v59 = vld [vmem:[#allocation50] ss:$0 sm:$0xff] }
0x1de1   :  { %5701 = vmatprep.subr.mxu1 %v6732_v0 }
0x1dec   :  { %v5962_v60 = vpop.eup %5961 }
0x1ded   :  { %v3621_v1 = vmul.f32 %v5962_v60, %v3619_v63  ;;  %v3954_v63 = vld [vmem:[#allocation46] sm:$0xff] }
0x1e4d   :  { %v3624_v61 = vpop.permute.xlu0 %3623 }
0x1e4e   :  { %v3626_v62 = vmul.f32 %v5962_v60, %v3624_v61  ;;  %v4047_v61 = vld [vmem:[%s7622_s7] sm:$0xff] }
0x1e50   :  { %3628 = vrot.lane.b32.xlu1 %v3626_v62, %s6737_s1  ;;  %v3955_v62 = vld [vmem:[#allocation46 + $0x8] sm:$0xff] }
0x1e51   :  { %5702 = vmatpush3.msra.mxu1 %v3955_v62 }
0x1e52   :  { %5703 = vmatprep.subr.mxu1 %v6732_v0 }
0x1e53   :  { %5704 = vmatpush3.msra.mxu1 %v3954_v63 }
0x1e54   :  { %5722 = vmatprep.subr.mxu1 %v6732_v0 }
0x1ec2   :  { %v3629_v2 = vpop.permute.xlu1 %3628 }
0x1ec3   :  { %v3631_v3 = vadd.f32 %v3629_v2, %v3621_v1 }
0x1ec5   :  { %5963 = vtanh.f32 %v3631_v3 }
0x1ed2   :  { %v5964_v5 = vpop.eup %5963 }
0x1ed3   :  { %3634 = vrot.lane.b32.xlu0 %v5964_v5, %s6716_s30 }
0x1f45   :  { %v3635_v14 = vpop.permute.xlu0 %3634 }
0x1f46   :  { %v3637_v15 = vmul.f32 %v5962_v60, %v3635_v14  ;;  %v4048_v60 = vld [vmem:[%s7622_s7 + $0x8] sm:$0xff] }
0x1f48   :  { %3639 = vrot.lane.b32.xlu1 %v3637_v15, %s6737_s1 }
0x1fba   :  { %v3640_v16 = vpop.permute.xlu1 %3639 }
0x1fbb   :  { %3643 = vst.msk [vmem:[#allocation10] sm:$0xc] %vm3334_vm14, %v3640_v16 }
0x1fc2   :  { %v3645_v18 = vld [vmem:[#allocation10 + $0x2] sm:$0x3] }
0x1fc3   :  { %v3659_v20 = vcombine.low %v3644_v17, %v3645_v18 }
0x1fc5   :  { %v3666_v19 = vrot.slane %v3659_v20, %v7061_v46 }
0x1fc7   :  { %5673 = vmatmul.mubr.msk.f32.vlgmr.msra.gmra.mxu0 %vm1392_vm6, %v3666_v19 }
0x1fc8   :  { %5687 = vmatpush3.msra.mxu0 %v3742_v7  ;;  %5694 = vmatprep.mubr.msk.f32.mxu0 %vm6734_vm8, %v6732_v0 }
0x1fc9   :  { %5688 = vmatprep.subr.mxu0 %v6732_v0 }
0x1fca   :  { %5689 = vmatpush3.msra.mxu0 %v3741_v9 }
0x1fcb   :  { %5690 = vmatprep.subr.mxu0 %v6732_v0 }
0x1fcc   :  { %5691 = vmatpush3.msra.mxu0 %v3740_v11  ;;  %v5186_v11 = vld [vmem:[#allocation47] ss:$0 sm:$0xff] }
0x1fcd   :  { %5692 = vmatprep.subr.mxu0 %v6732_v0 }
0x1fce   :  { %5693 = vmatpush3.msra.mxu0 %v3739_v13 }
0x1fcf   :  { %5708 = vmatprep.subr.mxu0 %v6732_v0 }
0x2087   :  { %v3735_v24 = vpop.f32.mrf.mxu0 }
0x2088   :  { %v3736_v25 = vadd.f32 %v5181_v23, %v3735_v24 }
0x2089   :  { %v5674_v26 = vpop.f32.mrf.mxu0 }
0x208a   :  { %v3813_v27 = vadd.f32 %v3809_v21, %v3736_v25 }
0x208c   :  { %5965 = vtanh.f32 %v3813_v27  ;;  %v5183_v29 = vmul.f32 -1.442695, %v3813_v27 }
0x208e   :  { %5967 = vpow2.f32 %v5183_v29 }
0x2099   :  { %v5966_v28 = vpop.eup %5965 }
0x209a   :  { %3823 = vrot.lane.b32.xlu0 %v5966_v28, %s6716_s30 }
0x209b   :  { %v5968_v30 = vpop.eup %5967 }
0x209c   :  { %v3817_v31 = vadd.f32 1.0, %v5968_v30 }
0x209e   :  { %5969 = vrcp.f32 %v3817_v31 }
0x20ab   :  { %v5970_v32 = vpop.eup %5969 }
0x20ac   :  { %v3821_v35 = vmul.f32 0.0, %v5970_v32 }
0x210c   :  { %v3824_v33 = vpop.permute.xlu0 %3823 }
0x210d   :  { %v3826_v34 = vmul.f32 %v5970_v32, %v3824_v33 }
0x210f   :  { %3828 = vrot.lane.b32.xlu1 %v3826_v34, %s6737_s1 }
0x2181   :  { %v3829_v36 = vpop.permute.xlu1 %3828 }
0x2182   :  { %v3831_v37 = vadd.f32 %v3829_v36, %v3821_v35 }
0x2184   :  { %5971 = vtanh.f32 %v3831_v37  ;;  %v3927_v53 = vrot.slane %v3831_v37, 6 }
0x2191   :  { %v5972_v4 = vpop.eup %5971 }
0x2192   :  { %3834 = vrot.lane.b32.xlu0 %v5972_v4, %s6716_s30 }
0x2204   :  { %v3835_v38 = vpop.permute.xlu0 %3834 }
0x2205   :  { %v3837_v39 = vmul.f32 %v5970_v32, %v3835_v38 }
0x2207   :  { %3839 = vrot.lane.b32.xlu1 %v3837_v39, %s6737_s1 }
0x2279   :  { %v3840_v40 = vpop.permute.xlu1 %3839 }
0x227a   :  { %3842 = vst.msk [vmem:[#allocation11] sm:$0x3] %vm1288_vm4, %v3840_v40  ;;  %5695 = vmatmul.mubr.msk.f32.vlgmr.msra.gmra.mxu0 %vm1392_vm6, %v3840_v40 }
0x227b   :  { %5712 = vmatprep.mubr.msk.f32.mxu0 %vm6734_vm8, %v6732_v0  ;;  %5709 = vmatpush3.msra.mxu0 %v4048_v60 }
0x227c   :  { %5710 = vmatprep.subr.mxu0 %v6732_v0 }
0x227d   :  { %5711 = vmatpush3.msra.mxu0 %v4047_v61 }
0x227e   :  { %5713 = vmatmul.mubr.f32.vlgmr.msra.gmra.mxu0 %v6732_v0  ;;  %5715 = vmatprep.subr.mxu0 %v6732_v0 }
0x227f   :  { %5716 = vmatpush3.msra.mxu0 %v4048_v60  ;;  %5719 = vmatprep.mubr.msk.f32.mxu0 %vm6734_vm8, %v6732_v0 }
0x2280   :  { %5717 = vmatprep.subr.mxu0 %v6732_v0 }
0x2281   :  { %5718 = vmatpush3.msra.mxu0 %v4047_v61  ;;  %v3952_v5 = vld [vmem:[#allocation11] sm:$0x3] }
0x2282   :  { %5729 = vmatprep.subr.mxu0 %v6732_v0 }
0x233a   :  { %v3911_v41 = vpop.f32.mrf.mxu0 }
0x233b   :  { %v3916_v42 = vrot.slane %v3911_v41, 6 }
0x233c   :  { %v5696_v43 = vpop.f32.mrf.mxu0 }
0x233d   :  { %v3918_v44 = vadd.f32 %v3916_v42, %v3736_v25 }
0x233e   :  { %v4115_v9 = vpop.f32.mrf.mxu0 }
0x233f   :  { %5973 = vtanh.f32 %v3918_v44  ;;  %v5185_v47 = vmul.f32 -1.442695, %v3918_v44 }
0x2340   :  { %v5714_v10 = vpop.f32.mrf.mxu0 }
0x2341   :  { %5975 = vpow2.f32 %v5185_v47  ;;  %v4352_v47 = vld [vmem:[#allocation49 + $0x8] sm:$0xff] }
0x234c   :  { %v5974_v45 = vpop.eup %5973 }
0x234d   :  { %3931 = vrot.lane.b32.xlu0 %v5974_v45, %s6716_s30 }
0x234e   :  { %v5976_v48 = vpop.eup %5975 }
0x234f   :  { %v3922_v49 = vadd.f32 1.0, %v5976_v48 }
0x2351   :  { %5977 = vrcp.f32 %v3922_v49  ;;  %v4351_v49 = vld [vmem:[#allocation49] sm:$0xff] }
0x235e   :  { %v5978_v50 = vpop.eup %5977 }
0x235f   :  { %v3929_v54 = vmul.f32 %v5978_v50, %v3927_v53 }
0x23bf   :  { %v3932_v51 = vpop.permute.xlu0 %3931 }
0x23c0   :  { %v3934_v52 = vmul.f32 %v5978_v50, %v3932_v51 }
0x23c2   :  { %3936 = vrot.lane.b32.xlu1 %v3934_v52, %s6737_s1 }
0x2434   :  { %v3937_v55 = vpop.permute.xlu1 %3936 }
0x2435   :  { %v3939_v56 = vadd.f32 %v3937_v55, %v3929_v54 }
0x2437   :  { %5979 = vtanh.f32 %v3939_v56 }
0x2444   :  { %v5980_v57 = vpop.eup %5979 }
0x2445   :  { %3942 = vrot.lane.b32.xlu0 %v5980_v57, %s6716_s30  ;;  %s7623_s30 = sld [smem:[#allocation92_spill]] }
0x244b   :  { %v4261_v45 = vld [vmem:[%s7623_s30 + $0x8] sm:$0xff]  ;;  %v4260_v48 = vld [vmem:[%s7623_s30] sm:$0xff] }
0x24b7   :  { %v3943_v1 = vpop.permute.xlu0 %3942 }
0x24b8   :  { %v3945_v2 = vmul.f32 %v5978_v50, %v3943_v1 }
0x24ba   :  { %3947 = vrot.lane.b32.xlu1 %v3945_v2, %s6737_s1 }
0x252c   :  { %v3948_v3 = vpop.permute.xlu1 %3947 }
0x252d   :  { %3951 = vst.msk [vmem:[#allocation11] sm:$0xc] %vm3334_vm14, %v3948_v3 }
0x2534   :  { %v3953_v6 = vld [vmem:[#allocation11 + $0x2] sm:$0x3] }
0x2535   :  { %v3967_v7 = vcombine.low %v3952_v5, %v3953_v6 }
0x2537   :  { %v3974_v8 = vrot.slane %v3967_v7, %v7061_v46 }
0x2539   :  { %5706 = vmatmul.mubr.msk.f32.vlgmr.msra.gmra.mxu1 %vm1392_vm6, %v3974_v8 }
0x253a   :  { %5726 = vmatprep.mubr.msk.f32.mxu1 %vm6734_vm8, %v6732_v0  ;;  %5723 = vmatpush3.msra.mxu1 %v4261_v45 }
0x253b   :  { %5724 = vmatprep.subr.mxu1 %v6732_v0 }
0x253c   :  { %5725 = vmatpush3.msra.mxu1 %v4260_v48 }
0x253d   :  { %5736 = vmatprep.subr.mxu1 %v6732_v0 }
0x25f9   :  { %v4043_v12 = vpop.f32.mrf.mxu1 }
0x25fa   :  { %v4044_v13 = vadd.f32 %v5186_v11, %v4043_v12 }
0x25fb   :  { %v5707_v14 = vpop.f32.mrf.mxu1 }
0x25fc   :  { %v4119_v15 = vadd.f32 %v4115_v9, %v4044_v13 }
0x25fe   :  { %5981 = vtanh.f32 %v4119_v15  ;;  %v5188_v17 = vmul.f32 -1.442695, %v4119_v15 }
0x2600   :  { %5983 = vpow2.f32 %v5188_v17 }
0x260b   :  { %v5982_v16 = vpop.eup %5981 }
0x260c   :  { %4129 = vrot.lane.b32.xlu0 %v5982_v16, %s6735_s5 }
0x260d   :  { %v5984_v18 = vpop.eup %5983 }
0x260e   :  { %v4123_v20 = vadd.f32 1.0, %v5984_v18 }
0x2610   :  { %5985 = vrcp.f32 %v4123_v20 }
0x261d   :  { %v5986_v19 = vpop.eup %5985 }
0x261e   :  { %v4127_v23 = vmul.f32 0.0, %v5986_v19 }
0x267e   :  { %v4130_v21 = vpop.permute.xlu0 %4129 }
0x267f   :  { %v4132_v22 = vmul.f32 %v5986_v19, %v4130_v21 }
0x2681   :  { %4134 = vrot.lane.b32.xlu1 %v4132_v22, %s6736_s28 }
0x26f3   :  { %v4135_v24 = vpop.permute.xlu1 %4134 }
0x26f4   :  { %v4137_v25 = vadd.f32 %v4135_v24, %v4127_v23 }
0x26f6   :  { %5987 = vtanh.f32 %v4137_v25  ;;  %v4233_v40 = vrot.slane %v4137_v25, 6 }
0x2703   :  { %v5988_v26 = vpop.eup %5987 }
0x2704   :  { %4140 = vrot.lane.b32.xlu0 %v5988_v26, %s6737_s1 }
0x2776   :  { %v4141_v27 = vpop.permute.xlu0 %4140 }
0x2777   :  { %v4143_v28 = vmul.f32 %v5986_v19, %v4141_v27 }
0x2779   :  { %4145 = vrot.lane.b32.xlu1 %v4143_v28, %s6738_s24 }
0x27eb   :  { %v4146_v29 = vpop.permute.xlu1 %4145 }
0x27ec   :  { %4148 = vst.msk [vmem:[#allocation12] sm:$0x3] %vm2307_vm11, %v4146_v29  ;;  %5720 = vmatmul.mubr.msk.f32.vlgmr.msra.gmra.mxu0 %vm2204_vm12, %v4146_v29 }
0x27ed   :  { %5733 = vmatprep.mubr.msk.f32.mxu0 %vm6734_vm8, %v6732_v0  ;;  %5730 = vmatpush3.msra.mxu0 %v4352_v47 }
0x27ee   :  { %5731 = vmatprep.subr.mxu0 %v6732_v0 }
0x27ef   :  { %5732 = vmatpush3.msra.mxu0 %v4351_v49 }
0x27f0   :  { %5734 = vmatmul.mubr.f32.vlgmr.msra.gmra.mxu0 %v6732_v0  ;;  %5743 = vmatprep.subr.mxu0 %v6732_v0 }
0x27f1   :  { %5747 = vmatprep.mubr.msk.f32.mxu0 %vm6734_vm8, %v6732_v0 }
0x27f3   :  { %v4258_v53 = vld [vmem:[#allocation12] sm:$0x3] }
0x28ac   :  { %v4217_v30 = vpop.f32.mrf.mxu0 }
0x28ad   :  { %v4222_v31 = vrot.slane %v4217_v30, 6 }
0x28ae   :  { %v5721_v32 = vpop.f32.mrf.mxu0 }
0x28af   :  { %v4224_v33 = vadd.f32 %v4222_v31, %v4044_v13  ;;  %v4565_v32 = vld [vmem:[#allocation52 + $0x8] sm:$0xff] }
0x28b0   :  { %v4419_v57 = vpop.f32.mrf.mxu0  ;;  %5744 = vmatpush3.msra.mxu0 %v4565_v32  ;;  %v4949_v32 = vld [vmem:[%s6928_s21 + $0x28] sm:$0xff] }
0x28b1   :  { %5989 = vtanh.f32 %v4224_v33  ;;  %v5190_v35 = vmul.f32 -1.442695, %v4224_v33  ;;  %v4656_v33 = vld [vmem:[#allocation53 + $0x8] sm:$0xff]  ;;  %5745 = vmatprep.subr.mxu0 %v6732_v0 }
0x28b2   :  { %v5735_v58 = vpop.f32.mrf.mxu0 }
0x28b3   :  { %5991 = vpow2.f32 %v5190_v35  ;;  %v4655_v35 = vld [vmem:[#allocation53] sm:$0xff] }
0x28be   :  { %v5990_v34 = vpop.eup %5989 }
0x28bf   :  { %4237 = vrot.lane.b32.xlu0 %v5990_v34, %s6735_s5  ;;  %v4564_v34 = vld [vmem:[#allocation52] sm:$0xff] }
0x28c0   :  { %v5992_v36 = vpop.eup %5991  ;;  %5746 = vmatpush3.msra.mxu0 %v4564_v34  ;;  %v4947_v34 = vld [vmem:[%s6928_s21 + $0x18] sm:$0xff] }
0x28c1   :  { %v4228_v37 = vadd.f32 1.0, %v5992_v36  ;;  %5757 = vmatprep.subr.mxu0 %v6732_v0 }
0x28c3   :  { %5993 = vrcp.f32 %v4228_v37 }
0x28d0   :  { %v5994_v4 = vpop.eup %5993 }
0x28d1   :  { %v4235_v41 = vmul.f32 %v5994_v4, %v4233_v40 }
0x2931   :  { %v4238_v38 = vpop.permute.xlu0 %4237 }
0x2932   :  { %v4240_v39 = vmul.f32 %v5994_v4, %v4238_v38 }
0x2934   :  { %4242 = vrot.lane.b32.xlu1 %v4240_v39, %s6736_s28 }
0x29a6   :  { %v4243_v42 = vpop.permute.xlu1 %4242 }
0x29a7   :  { %v4245_v43 = vadd.f32 %v4243_v42, %v4235_v41 }
0x29a9   :  { %5995 = vtanh.f32 %v4245_v43 }
0x29b6   :  { %v5996_v44 = vpop.eup %5995 }
0x29b7   :  { %4248 = vrot.lane.b32.xlu0 %v5996_v44, %s6737_s1  ;;  %v5196_v44 = vld [vmem:[%s7624_s27] ss:$0 sm:$0xff] }
0x2a29   :  { %v4249_v50 = vpop.permute.xlu0 %4248 }
0x2a2a   :  { %v4251_v51 = vmul.f32 %v5994_v4, %v4249_v50 }
0x2a2c   :  { %4253 = vrot.lane.b32.xlu1 %v4251_v51, %s6738_s24 }
0x2a9e   :  { %v4254_v52 = vpop.permute.xlu1 %4253 }
0x2a9f   :  { %4257 = vst.msk [vmem:[#allocation12] sm:$0xc] %vm2417_vm13, %v4254_v52 }
0x2aa6   :  { %v4259_v54 = vld [vmem:[#allocation12 + $0x2] sm:$0x3] }
0x2aa7   :  { %v4271_v55 = vcombine.low %v4258_v53, %v4259_v54 }
0x2aa9   :  { %v4278_v56 = vrot.slane %v4271_v55, %v7061_v46 }
0x2aab   :  { %5727 = vmatmul.mubr.msk.f32.vlgmr.msra.gmra.mxu1 %vm2204_vm12, %v4278_v56 }
0x2aac   :  { %5737 = vmatpush3.msra.mxu1 %v4352_v47  ;;  %5740 = vmatprep.mubr.msk.f32.mxu1 %vm6734_vm8, %v6732_v0 }
0x2aad   :  { %5738 = vmatprep.subr.mxu1 %v6732_v0 }
0x2aae   :  { %5739 = vmatpush3.msra.mxu1 %v4351_v49 }
0x2aaf   :  { %5750 = vmatprep.subr.mxu1 %v6732_v0 }
0x2b6b   :  { %v4347_v60 = vpop.f32.mrf.mxu1 }
0x2b6c   :  { %v4348_v61 = vadd.f32 %v5191_v59, %v4347_v60 }
0x2b6d   :  { %v5728_v62 = vpop.f32.mrf.mxu1 }
0x2b6e   :  { %v4423_v63 = vadd.f32 %v4419_v57, %v4348_v61 }
0x2b70   :  { %5997 = vtanh.f32 %v4423_v63  ;;  %v5193_v2 = vmul.f32 -1.442695, %v4423_v63 }
0x2b72   :  { %5999 = vpow2.f32 %v5193_v2 }
0x2b7d   :  { %v5998_v1 = vpop.eup %5997 }
0x2b7e   :  { %4433 = vrot.lane.b32.xlu0 %v5998_v1, %s6735_s5 }
0x2b7f   :  { %v6000_v3 = vpop.eup %5999 }
0x2b80   :  { %v4427_v5 = vadd.f32 1.0, %v6000_v3 }
0x2b82   :  { %6001 = vrcp.f32 %v4427_v5 }
0x2b8f   :  { %v6002_v6 = vpop.eup %6001 }
0x2b90   :  { %v4431_v9 = vmul.f32 0.0, %v6002_v6 }
0x2bf0   :  { %v4434_v7 = vpop.permute.xlu0 %4433 }
0x2bf1   :  { %v4436_v8 = vmul.f32 %v6002_v6, %v4434_v7 }
0x2bf3   :  { %4438 = vrot.lane.b32.xlu1 %v4436_v8, %s6736_s28 }
0x2c65   :  { %v4439_v10 = vpop.permute.xlu1 %4438 }
0x2c66   :  { %v4441_v11 = vadd.f32 %v4439_v10, %v4431_v9 }
0x2c68   :  { %6003 = vtanh.f32 %v4441_v11  ;;  %v4537_v27 = vrot.slane %v4441_v11, 6 }
0x2c75   :  { %v6004_v12 = vpop.eup %6003 }
0x2c76   :  { %4444 = vrot.lane.b32.xlu0 %v6004_v12, %s6737_s1 }
0x2ce8   :  { %v4445_v13 = vpop.permute.xlu0 %4444 }
0x2ce9   :  { %v4447_v14 = vmul.f32 %v6002_v6, %v4445_v13 }
0x2ceb   :  { %4449 = vrot.lane.b32.xlu1 %v4447_v14, %s6738_s24 }
0x2d5d   :  { %v4450_v15 = vpop.permute.xlu1 %4449 }
0x2d5e   :  { %4452 = vst.msk [vmem:[#allocation13] sm:$0x3] %vm2307_vm11, %v4450_v15  ;;  %5741 = vmatmul.mubr.msk.f32.vlgmr.msra.gmra.mxu1 %vm2204_vm12, %v4450_v15 }
0x2d5f   :  { %5754 = vmatprep.mubr.msk.f32.mxu1 %vm6734_vm8, %v6732_v0  ;;  %5751 = vmatpush3.msra.mxu1 %v4656_v33 }
0x2d60   :  { %5752 = vmatprep.subr.mxu1 %v6732_v0 }
0x2d61   :  { %5753 = vmatpush3.msra.mxu1 %v4655_v35 }
0x2d62   :  { %5755 = vmatmul.mubr.f32.vlgmr.msra.gmra.mxu1 %v6732_v0  ;;  %5764 = vmatprep.subr.mxu1 %v6732_v0 }
0x2d63   :  { %5768 = vmatprep.mubr.msk.f32.mxu1 %vm6734_vm8, %v6732_v0 }
0x2d65   :  { %v4562_v38 = vld [vmem:[#allocation13] sm:$0x3] }
0x2e1e   :  { %v4521_v16 = vpop.f32.mrf.mxu1 }
0x2e1f   :  { %v4526_v17 = vrot.slane %v4521_v16, 6  ;;  %v4859_v16 = vld [vmem:[#allocation55 + $0x8] sm:$0xff] }
0x2e20   :  { %v5742_v18 = vpop.f32.mrf.mxu1  ;;  %5765 = vmatpush3.msra.mxu1 %v4859_v16 }
0x2e21   :  { %v4528_v20 = vadd.f32 %v4526_v17, %v4348_v61  ;;  %v4858_v17 = vld [vmem:[#allocation55] sm:$0xff]  ;;  %5766 = vmatprep.subr.mxu1 %v6732_v0 }
0x2e22   :  { %v4723_v42 = vpop.f32.mrf.mxu1  ;;  %5767 = vmatpush3.msra.mxu1 %v4858_v17 }
0x2e23   :  { %6005 = vtanh.f32 %v4528_v20  ;;  %v5195_v21 = vmul.f32 -1.442695, %v4528_v20  ;;  %v4959_v20 = vld [vmem:[%s6928_s21 + $0x78] sm:$0xff] }
0x2e24   :  { %v5756_v43 = vpop.f32.mrf.mxu1 }
0x2e25   :  { %6007 = vpow2.f32 %v5195_v21  ;;  %v4957_v21 = vld [vmem:[%s6928_s21 + $0x68] sm:$0xff] }
0x2e26   :  { %v5203_v43 = vld [vmem:[#allocation58] ss:$0 sm:$0xff] }
0x2e30   :  { %v6006_v19 = vpop.eup %6005 }
0x2e31   :  { %4541 = vrot.lane.b32.xlu0 %v6006_v19, %s6735_s5  ;;  %v4958_v19 = vld [vmem:[%s6928_s21 + $0x70] sm:$0xff] }
0x2e32   :  { %v6008_v22 = vpop.eup %6007 }
0x2e33   :  { %v4532_v23 = vadd.f32 1.0, %v6008_v22  ;;  %v4956_v22 = vld [vmem:[%s6928_s21 + $0x60] sm:$0xff] }
0x2e35   :  { %6009 = vrcp.f32 %v4532_v23  ;;  %v4955_v23 = vld [vmem:[%s6928_s21 + $0x58] sm:$0xff] }
0x2e42   :  { %v6010_v24 = vpop.eup %6009 }
0x2e43   :  { %v4539_v28 = vmul.f32 %v6010_v24, %v4537_v27  ;;  %v4953_v27 = vld [vmem:[%s6928_s21 + $0x48] sm:$0xff] }
0x2ea3   :  { %v4542_v25 = vpop.permute.xlu0 %4541 }
0x2ea4   :  { %v4544_v26 = vmul.f32 %v6010_v24, %v4542_v25  ;;  %v4954_v25 = vld [vmem:[%s6928_s21 + $0x50] sm:$0xff] }
0x2ea6   :  { %4546 = vrot.lane.b32.xlu1 %v4544_v26, %s6736_s28 }
0x2f18   :  { %v4547_v29 = vpop.permute.xlu1 %4546 }
0x2f19   :  { %v4549_v30 = vadd.f32 %v4547_v29, %v4539_v28  ;;  %v4952_v29 = vld [vmem:[%s6928_s21 + $0x40] sm:$0xff] }
0x2f1b   :  { %6011 = vtanh.f32 %v4549_v30  ;;  %v4951_v30 = vld [vmem:[%s6928_s21 + $0x38] sm:$0xff] }
0x2f28   :  { %v6012_v31 = vpop.eup %6011 }
0x2f29   :  { %4552 = vrot.lane.b32.xlu0 %v6012_v31, %s6737_s1  ;;  %v4950_v31 = vld [vmem:[%s6928_s21 + $0x30] sm:$0xff] }
0x2f9b   :  { %v4553_v36 = vpop.permute.xlu0 %4552 }
0x2f9c   :  { %v4555_v37 = vmul.f32 %v6010_v24, %v4553_v36  ;;  %v4946_v36 = vld [vmem:[%s6928_s21 + $0x10] sm:$0xff] }
0x2f9e   :  { %4557 = vrot.lane.b32.xlu1 %v4555_v37, %s6738_s24  ;;  %v4945_v37 = vld [vmem:[%s6928_s21 + $0x8] sm:$0xff] }
0x3010   :  { %v4558_v4 = vpop.permute.xlu1 %4557 }
0x3011   :  { %4561 = vst.msk [vmem:[#allocation13] sm:$0xc] %vm2417_vm13, %v4558_v4  ;;  %v4944_v4 = vld [vmem:[%s6928_s21] sm:$0xff] }
0x3018   :  { %v4563_v39 = vld [vmem:[#allocation13 + $0x2] sm:$0x3] }
0x3019   :  { %v4575_v40 = vcombine.low %v4562_v38, %v4563_v39  ;;  %v5201_v38 = vld [vmem:[#allocation56] ss:$0 sm:$0xff] }
0x301b   :  { %v4582_v41 = vrot.slane %v4575_v40, %v7061_v46 }
0x301d   :  { %5748 = vmatmul.mubr.msk.f32.vlgmr.msra.gmra.mxu0 %vm2204_vm12, %v4582_v41 }
0x301e   :  { %5758 = vmatpush3.msra.mxu0 %v4656_v33  ;;  %5761 = vmatprep.mubr.msk.f32.mxu0 %vm6734_vm8, %v6732_v0  ;;  %v4948_v33 = vld [vmem:[%s6928_s21 + $0x20] sm:$0xff] }
0x301f   :  { %5759 = vmatprep.subr.mxu0 %v6732_v0 }
0x3020   :  { %5760 = vmatpush3.msra.mxu0 %v4655_v35 }
0x3021   :  { %5771 = vmatprep.subr.mxu0 %v6732_v0 }
0x30dd   :  { %v4651_v45 = vpop.f32.mrf.mxu0 }
0x30de   :  { %v4652_v47 = vadd.f32 %v5196_v44, %v4651_v45 }
0x30df   :  { %v5749_v48 = vpop.f32.mrf.mxu0 }
0x30e0   :  { %v4727_v49 = vadd.f32 %v4723_v42, %v4652_v47 }
0x30e2   :  { %6013 = vtanh.f32 %v4727_v49  ;;  %v5198_v50 = vmul.f32 -1.442695, %v4727_v49 }
0x30e4   :  { %6015 = vpow2.f32 %v5198_v50 }
0x30ef   :  { %v6014_v46 = vpop.eup %6013 }
0x30f0   :  { %4737 = vrot.lane.b32.xlu0 %v6014_v46, %s6735_s5 }
0x30f1   :  { %v6016_v51 = vpop.eup %6015 }
0x30f2   :  { %v4731_v52 = vadd.f32 1.0, %v6016_v51 }
0x30f4   :  { %6017 = vrcp.f32 %v4731_v52 }
0x3101   :  { %v6018_v53 = vpop.eup %6017 }
0x3102   :  { %v4735_v56 = vmul.f32 0.0, %v6018_v53 }
0x3162   :  { %v4738_v54 = vpop.permute.xlu0 %4737 }
0x3163   :  { %v4740_v55 = vmul.f32 %v6018_v53, %v4738_v54 }
0x3165   :  { %4742 = vrot.lane.b32.xlu1 %v4740_v55, %s6736_s28 }
0x31d7   :  { %v4743_v57 = vpop.permute.xlu1 %4742 }
0x31d8   :  { %v4745_v58 = vadd.f32 %v4743_v57, %v4735_v56 }
0x31da   :  { %6019 = vtanh.f32 %v4745_v58  ;;  %v4839_v12 = vrot.slane %v4745_v58, 6 }
0x31e7   :  { %v6020_v59 = vpop.eup %6019 }
0x31e8   :  { %4748 = vrot.lane.b32.xlu0 %v6020_v59, %s6737_s1 }
0x325a   :  { %v4749_v60 = vpop.permute.xlu0 %4748 }
0x325b   :  { %v4751_v61 = vmul.f32 %v6018_v53, %v4749_v60 }
0x325d   :  { %4753 = vrot.lane.b32.xlu1 %v4751_v61, %s6738_s24 }
0x32cf   :  { %v4754_v62 = vpop.permute.xlu1 %4753 }
0x32d0   :  { %5762 = vmatmul.mubr.msk.f32.vlgmr.msra.gmra.mxu0 %vm2204_vm12, %v4754_v62 }
0x32d1   :  { %5803 = vmatprep.mubr.msk.f32.mxu0 %vm6734_vm8, %v6732_v0  ;;  %5772 = vmatpush3.msra.mxu0 %v4959_v20 }
0x32d2   :  { %5773 = vmatprep.subr.mxu0 %v6732_v0 }
0x32d3   :  { %5774 = vmatpush3.msra.mxu0 %v4958_v19 }
0x32d4   :  { %5775 = vmatprep.subr.mxu0 %v6732_v0 }
0x32d5   :  { %5776 = vmatpush3.msra.mxu0 %v4957_v21 }
0x32d6   :  { %5777 = vmatprep.subr.mxu0 %v6732_v0 }
0x32d7   :  { %5778 = vmatpush3.msra.mxu0 %v4956_v22 }
0x32d8   :  { %5779 = vmatprep.subr.mxu0 %v6732_v0 }
0x32d9   :  { %5780 = vmatpush3.msra.mxu0 %v4955_v23 }
0x32da   :  { %5781 = vmatprep.subr.mxu0 %v6732_v0 }
0x32db   :  { %5782 = vmatpush3.msra.mxu0 %v4954_v25 }
0x32dc   :  { %5783 = vmatprep.subr.mxu0 %v6732_v0 }
0x32dd   :  { %5784 = vmatpush3.msra.mxu0 %v4953_v27 }
0x32de   :  { %5785 = vmatprep.subr.mxu0 %v6732_v0 }
0x32df   :  { %5786 = vmatpush3.msra.mxu0 %v4952_v29 }
0x32e0   :  { %5787 = vmatprep.subr.mxu0 %v6732_v0 }
0x32e1   :  { %5788 = vmatpush3.msra.mxu0 %v4951_v30 }
0x32e2   :  { %5789 = vmatprep.subr.mxu0 %v6732_v0 }
0x32e3   :  { %5790 = vmatpush3.msra.mxu0 %v4950_v31 }
0x32e4   :  { %5791 = vmatprep.subr.mxu0 %v6732_v0 }
0x32e5   :  { %5792 = vmatpush3.msra.mxu0 %v4949_v32 }
0x32e6   :  { %5793 = vmatprep.subr.mxu0 %v6732_v0 }
0x32e7   :  { %5794 = vmatpush3.msra.mxu0 %v4948_v33 }
0x32e8   :  { %5795 = vmatprep.subr.mxu0 %v6732_v0 }
0x32e9   :  { %5796 = vmatpush3.msra.mxu0 %v4947_v34 }
0x32ea   :  { %5797 = vmatprep.subr.mxu0 %v6732_v0 }
0x32eb   :  { %5798 = vmatpush3.msra.mxu0 %v4946_v36 }
0x32ec   :  { %5799 = vmatprep.subr.mxu0 %v6732_v0 }
0x32ed   :  { %5800 = vmatpush3.msra.mxu0 %v4945_v37 }
0x32ee   :  { %5801 = vmatprep.subr.mxu0 %v6732_v0 }
0x32ef   :  { %5802 = vmatpush3.msra.mxu0 %v4944_v4 }
0x3390   :  { %v4823_v63 = vpop.f32.mrf.mxu0 }
0x3391   :  { %v4828_v1 = vrot.slane %v4823_v63, 6 }
0x3392   :  { %v5763_v2 = vpop.f32.mrf.mxu0 }
0x3393   :  { %v4830_v3 = vadd.f32 %v4828_v1, %v4652_v47 }
0x3395   :  { %6021 = vtanh.f32 %v4830_v3  ;;  %v5200_v6 = vmul.f32 -1.442695, %v4830_v3 }
0x3397   :  { %6023 = vpow2.f32 %v5200_v6 }
0x33a2   :  { %v6022_v5 = vpop.eup %6021 }
0x33a3   :  { %4843 = vrot.lane.b32.xlu0 %v6022_v5, %s6735_s5 }
0x33a4   :  { %v6024_v7 = vpop.eup %6023 }
0x33a5   :  { %v4834_v8 = vadd.f32 1.0, %v6024_v7 }
0x33a7   :  { %6025 = vrcp.f32 %v4834_v8 }
0x33b4   :  { %v6026_v9 = vpop.eup %6025 }
0x33b5   :  { %v4841_v13 = vmul.f32 %v6026_v9, %v4839_v12 }
0x3415   :  { %v4844_v10 = vpop.permute.xlu0 %4843 }
0x3416   :  { %v4846_v11 = vmul.f32 %v6026_v9, %v4844_v10 }
0x3418   :  { %4848 = vrot.lane.b32.xlu1 %v4846_v11, %s6736_s28 }
0x348a   :  { %v4849_v14 = vpop.permute.xlu1 %4848 }
0x348b   :  { %v4851_v15 = vadd.f32 %v4849_v14, %v4841_v13 }
0x348d   :  { %6027 = vtanh.f32 %v4851_v15 }
0x349a   :  { %v6028_v18 = vpop.eup %6027 }
0x349b   :  { %4854 = vrot.lane.b32.xlu0 %v6028_v18, %s6737_s1 }
0x350d   :  { %v4855_v24 = vpop.permute.xlu0 %4854 }
0x350e   :  { %v4857_v26 = vmul.f32 %v6026_v9, %v4855_v24 }
0x3510   :  { %v4868_v28 = vrot.slane %v4857_v26, 2 }
0x3512   :  { %4869 = vrot.lane.b32.xlu1 %v4868_v28, %s6738_s24 }
0x3584   :  { %v4870_v35 = vpop.permute.xlu1 %4869 }
0x3585   :  { %5769 = vmatmul.mubr.msk.f32.vlgmr.msra.gmra.mxu1 %vm2204_vm12, %v4870_v35 }
0x3645   :  { %v4939_v39 = vpop.f32.mrf.mxu1 }
0x3646   :  { %v4940_v40 = vadd.f32 %v5201_v38, %v4939_v39 }
0x3647   :  { %v5770_v41 = vpop.f32.mrf.mxu1 }
0x3648   :  { %v4943_v42 = vmax.f32 %v4940_v40, 0.0 }
0x364a   :  { %5804 = vmatmul.mubr.f32.vlgmr.msra.gmra.mxu0 %v4943_v42 }
0x370a   :  { %v5033_v44 = vpop.f32.mrf.mxu0 }
0x370b   :  { %v5034_v45 = vadd.f32 %v5203_v43, %v5033_v44 }
0x370c   :  { %v5805_v47 = vpop.f32.mrf.mxu0 }
0x370d   :  { %5038 = vst.msk [vmem:[#allocation59] sm:$0x3] %vm5037_vm15, %v5034_v45 }
0x370e   :  { %6620 = shalt.err (!%p6617_p9)
}
0x370f   :  { %5048 = dma.vmem_to_hbm [thread:$0]  %s5046_s6, 32, %s6938_s8, [#allocation16]  }
0x3710   :  { %6659 = dma.done.wait [#allocation16], 32  }
0x3711   :  { %6660 = vsyncadd [#allocation16], 4294967264 }
0x3712   :  { %5052 = vsyncpa [#allocation15], 1 }
0x3713   :  { %5053 = vsyncpa [#allocation18], 1 }
0x3714   :  { %5054 = vsyncpa [#allocation21], 1 }
0x3715   :  { %5055 = vsyncpa [#allocation24], 1 }
0x3716   :  { %5056 = vsyncpa [#allocation27], 1 }
0x3717   :  { %5057 = vsyncpa [#allocation30], 1 }
0x3718   :  { %5058 = vsyncpa [#allocation33], 1 }
0x3719   :  { %5059 = vsyncpa [#allocation36], 1 }
0x371a   :  { %5060 = vsyncpa [#allocation39], 1 }
0x371b   :  { %5061 = vsyncpa [#allocation42], 1 }
0x371c   :  { %5062 = vsyncpa [#allocation45], 1 }
0x371d   :  { %5063 = vsyncpa [#allocation48], 1 }
0x371e   :  { %5064 = vsyncpa [#allocation51], 1 }
0x371f   :  { %5065 = vsyncpa [#allocation54], 1 }
0x3720   :  { %5066 = vsyncpa [#allocation57], 1 }
0x3721   :  { %5067 = vsyncpa [#allocation16], 1 }

</bundles_post_ra>
